<compile_context>
chip_gen: v7x
topology: tpu7x:2x2x1
jax: 0.10.0
libtpu: 0.0.40
codegen_flags: <defaults>
</compile_context>

<pallas_src>
import functools

import jax
import jax.numpy as jnp
from jax.experimental import pallas as pl
from jax.experimental.pallas import tpu as pltpu


# ----------------------------- Pallas kernels ------------------------------

def _ngcf_layer_kernel(a_ref, egok_ref, egor_ref, wcat_ref, bgc_ref,
                       ego_out_ref, norm_out_ref, side_acc, *, ego_resident):
    """One NGCF propagation layer, tiled over (row-tile i, contraction-tile k).

    egok_ref is either the full bf16 ego array (ego_resident=True, block-invariant,
    DMA'd once) or a streamed (tk, d_in) contraction tile (ego_resident=False).
    """
    k = pl.program_id(1)
    tk = a_ref.shape[1]

    # init accumulator at first contraction step
    @pl.when(k == 0)
    def _():
        side_acc[...] = jnp.zeros_like(side_acc)

    # side = A @ ego   (bf16 operands, f32 accumulate on the MXU)
    if ego_resident:
        off = pl.multiple_of(k * tk, 128)
        ego_k = egok_ref[pl.ds(off, tk), :]
    else:
        ego_k = egok_ref[...]
    side_acc[...] += jnp.dot(a_ref[...], ego_k,
                             preferred_element_type=jnp.float32)

    # epilogue: runs once per row tile, at the last contraction step
    @pl.when(k == pl.num_programs(1) - 1)
    def _():
        side = side_acc[...]            # (tm, d_in), f32
        ego = egor_ref[...]             # (tm, d_in), f32

        # Fused: [side | ego*side] @ [W_gc ; W_bi + b_bi]  (one K=2*d_in bf16 MXU pass)
        lhs = jnp.concatenate(
            [side.astype(jnp.bfloat16), (ego * side).astype(jnp.bfloat16)],
            axis=1)                                           # (tm, 2*d_in) bf16
        pre = jnp.dot(lhs, wcat_ref[...],
                      preferred_element_type=jnp.float32) + bgc_ref[...]

        # LeakyReLU(0.2)
        ego_new = jnp.where(pre > 0, pre, 0.2 * pre)

        # F.normalize(p=2, dim=1):  x / max(||x||, 1e-12)  == x * rsqrt(max(sumsq, 1e-24))
        sumsq = jnp.sum(ego_new * ego_new, axis=1, keepdims=True)
        inv = jax.lax.rsqrt(jnp.maximum(sumsq, 1e-24))

        ego_out_ref[...] = ego_new
        norm_out_ref[...] = ego_new * inv


def _score_kernel(u_ref, i_ref, c_ref, out_ref):
    """Scoring head. Packs [logits, sigmoid(logits), per-row L1 dist] into one
    lane-dense (m, 128) output (single unmasked store instead of three (m,1) stores)."""
    u = u_ref[...]
    it = i_ref[...]
    c = c_ref[...]

    logits = jnp.sum(u * it, axis=1, keepdims=True)          # (m, 1)
    pred = jax.nn.sigmoid(logits)                             # (m, 1)
    cf_row = jnp.sum(jnp.abs(it - c), axis=1, keepdims=True)  # (m, 1)

    m, lanes = out_ref.shape
    lane = jax.lax.broadcasted_iota(jnp.int32, (m, lanes), 1)
    out = jnp.where(lane == 0, logits, 0.0)
    out = jnp.where(lane == 1, pred, out)
    out = jnp.where(lane == 2, cf_row, out)
    out_ref[...] = out


_VMEM_SPEC = pl.BlockSpec(memory_space=pltpu.MemorySpace.VMEM)


# ------------------------------- wrappers -----------------------------------

def _choose_tile(n, target, step):
    """Largest multiple of `step` that divides n and is <= target, else n (full)."""
    t = min(target, n)
    t -= t % step
    while t >= step:
        if n % t == 0:
            return t
        t -= step
    return n


def _default_vmem_limit():
    """Scoped VMEM limit with headroom: ~3/4 of physical, capped at 112 MiB.
    v7x (64 MiB physical) -> 48 MiB; v5e/v6e (128 MiB) -> 96 MiB."""
    cap = 64 * 1024 * 1024  # conservative fallback (v7x physical)
    try:
        info = pltpu.get_tpu_info()
        c = getattr(info, "vmem_capacity_bytes", None)
        if c:
            cap = int(c)
    except Exception:
        pass
    return int(min(cap * 3 // 4, 112 * 1024 * 1024))


def ngcf_layer(A_bf16, ego, W_cat_bf16, b_gc, *, tm, tk, ego_resident, vmem_limit):
    """ego' , norm = NGCF layer.  W_cat_bf16 = concat([W_gc, W_bi + b_bi], 0) in bf16."""
    N, d_in = ego.shape
    d_out = W_cat_bf16.shape[1]
    ego_bf16 = ego.astype(jnp.bfloat16)     # bf16 only at the MXU operand boundary

    if ego_resident:
        egok_spec = pl.BlockSpec((N, d_in), lambda i, k: (0, 0))   # whole array, DMA'd once
    else:
        egok_spec = pl.BlockSpec((tk, d_in), lambda i, k: (k, 0))  # streamed per k-step

    grid = (N // tm, N // tk)
    kernel = functools.partial(_ngcf_layer_kernel, ego_resident=ego_resident)
    return pl.pallas_call(
        kernel,
        out_shape=(jax.ShapeDtypeStruct((N, d_out), jnp.float32),
                   jax.ShapeDtypeStruct((N, d_out), jnp.float32)),
        grid_spec=pltpu.PrefetchScalarGridSpec(
            num_scalar_prefetch=0,
            grid=grid,
            in_specs=[
                pl.BlockSpec((tm, tk), lambda i, k: (i, k)),            # A tile (bf16 stream)
                egok_spec,                                              # ego contraction (bf16)
                pl.BlockSpec((tm, d_in), lambda i, k: (i, 0)),          # ego row tile (f32)
                pl.BlockSpec((2 * d_in, d_out), lambda i, k: (0, 0)),   # [W_gc ; W_bi+b_bi] bf16
                pl.BlockSpec((1, d_out), lambda i, k: (0, 0)),          # b_gc (f32)
            ],
            out_specs=(pl.BlockSpec((tm, d_out), lambda i, k: (i, 0)),
                       pl.BlockSpec((tm, d_out), lambda i, k: (i, 0))),
            scratch_shapes=[pltpu.VMEM((tm, d_in), jnp.float32)],       # side accumulator
        ),
        compiler_params=pltpu.CompilerParams(
            dimension_semantics=("parallel", "arbitrary"),
            vmem_limit_bytes=vmem_limit),
    )(A_bf16, ego_bf16, ego, W_cat_bf16, b_gc)


def score_head(u_cause, i_emb, control_emb):
    # TODO(synk): tile over rows with a BlockSpec grid if the scoring batch grows large.
    m = u_cause.shape[0]
    out = pl.pallas_call(
        _score_kernel,
        out_shape=jax.ShapeDtypeStruct((m, 128), jnp.float32),
        in_specs=[_VMEM_SPEC] * 3,
        out_specs=_VMEM_SPEC,
    )(u_cause, i_emb, control_emb)
    logits = out[:, 0:1]
    prediction = out[:, 1:2]
    # forward() uses: mean over rows of per-row L1 sums (cf_distance == 'l1')
    cf_loss = jnp.mean(out[:, 2])
    return logits, prediction, cf_loss


# ----------------------------- parameter init ------------------------------

def xavier_uniform(key, shape):
    fan_in, fan_out = shape
    bound = (6.0 / (fan_in + fan_out)) ** 0.5
    return jax.random.uniform(key, shape, jnp.float32, -bound, bound)


def init_params(key, n_user, n_item, emb_size, layer_sizes):
    params = {}
    keys = jax.random.split(key, 2 + 4 * len(layer_sizes))
    params['user_emb'] = xavier_uniform(keys[0], (n_user, emb_size))
    params['item_emb'] = xavier_uniform(keys[1], (n_item, emb_size))
    dims = [emb_size] + list(layer_sizes)
    for k in range(len(layer_sizes)):
        base = 2 + 4 * k
        params[f'W_gc_{k}'] = xavier_uniform(keys[base + 0], (dims[k], dims[k + 1]))
        params[f'b_gc_{k}'] = xavier_uniform(keys[base + 1], (1, dims[k + 1]))
        params[f'W_bi_{k}'] = xavier_uniform(keys[base + 2], (dims[k], dims[k + 1]))
        params[f'b_bi_{k}'] = xavier_uniform(keys[base + 3], (1, dims[k + 1]))
    return params


def build_norm_adj(key, n_user, n_item):
    # deterministic dense bipartite interaction matrix, row-normalised, with self-loops
    R = (jax.random.uniform(key, (n_user, n_item)) < 0.4).astype(jnp.float32)
    N = n_user + n_item
    A = jnp.zeros((N, N), jnp.float32)
    A = A.at[:n_user, n_user:].set(R)
    A = A.at[n_user:, :n_user].set(R.T)
    A = A + jnp.eye(N, dtype=jnp.float32)
    d = jnp.sum(A, axis=1, keepdims=True)
    return A / jnp.maximum(d, 1.0)


# ------------------------------- forward -----------------------------------

@functools.partial(jax.jit,
                   static_argnames=("n_user", "n_item", "n_layers",
                                    "tm_target", "tk_target"))
def ngcf_cause_forward(params, A_bf16, users, pos_items, neg_items, *,
                       n_user, n_item, n_layers, tm_target=512, tk_target=2048):
    """A_bf16 must already be bf16 (cast hoisted out of the step; A is static)."""
    N = n_user + n_item

    # Tile selection:
    #  - tm: multiple of 16 (bf16 sublane packing), capped at N/2 so the "parallel"
    #    row axis has >= 2 tiles (v7x dual-TensorCore sharding).
    #  - tk: multiple of 128 (lane-aligned contraction slices).
    tm_cap = max(16, N // 2) if N >= 32 else N
    tm = _choose_tile(N, min(tm_target, tm_cap), 16)
    tk = _choose_tile(N, tk_target, 128)

    vmem_limit = _default_vmem_limit()

    # ego_embeddings = cat([user_emb, item_emb], 0)
    ego = jnp.concatenate([params['user_emb'], params['item_emb']], axis=0)
    all_embs = [ego]
    for k in range(n_layers):
        d_in = ego.shape[1]
        # Keep the full bf16 ego VMEM-resident (no per-row-tile re-stream) when small enough.
        ego_resident = (N * d_in * 2) <= 16 * 1024 * 1024
        # bias fused into weight exactly as in the torch code: bi @ (W_bi + b_bi);
        # both epilogue weights pre-concatenated so the kernel runs ONE K=2*d_in matmul.
        W_cat = jnp.concatenate(
            [params[f'W_gc_{k}'], params[f'W_bi_{k}'] + params[f'b_bi_{k}']],
            axis=0).astype(jnp.bfloat16)
        ego, norm = ngcf_layer(A_bf16, ego, W_cat, params[f'b_gc_{k}'],
                               tm=tm, tk=tk, ego_resident=ego_resident,
                               vmem_limit=vmem_limit)
        all_embs.append(norm)
    all_embeddings = jnp.concatenate(all_embs, axis=1)

    u_g = all_embeddings[:n_user, :]
    i_g = all_embeddings[n_user:, :]

    users_cause = jnp.concatenate([users, users], axis=0)        # users + users
    pos_neg = jnp.concatenate([pos_items, neg_items], axis=0)    # pos_items + neg_items

    u_cause_emb = u_g[users_cause, :]
    pos_i_g = i_g[pos_items, :]
    neg_i_g = i_g[neg_items, :]
    i_emb = i_g[pos_neg, :]

    half = n_item // 2
    control = jnp.where(pos_neg < half, pos_neg + half, pos_neg - half)
    control_emb = i_g[control, :]

    logits, prediction, cf_loss = score_head(u_cause_emb, i_emb, control_emb)

    return (all_embeddings, u_g[users, :], i_emb, pos_i_g, neg_i_g,
            logits, prediction, cf_loss)


# --------------------------------- main -------------------------------------

if __name__ == "__main__":
    n_user, n_item = 256, 256         # N = 512 -> exercises the (rows, K) tiling
    emb_size = 128                    # lane-dense feature dim (multiple of 128)
    layer_sizes = [128, 128]
    batch_size = 4

    key = jax.random.PRNGKey(0)
    k_params, k_adj, k_u, k_p, k_n = jax.random.split(key, 5)

    params = init_params(k_params, n_user, n_item, emb_size, layer_sizes)
    A_hat = build_norm_adj(k_adj, n_user, n_item)
    # A is static across steps: convert to bf16 ONCE, outside the jitted forward.
    A_bf16 = jax.block_until_ready(A_hat.astype(jnp.bfloat16))

    users = jax.random.randint(k_u, (batch_size,), 0, n_user)
    pos_items = jax.random.randint(k_p, (batch_size,), 0, n_item)
    neg_items = jax.random.randint(k_n, (batch_size,), 0, n_item)

    out = ngcf_cause_forward(params, A_bf16, users, pos_items, neg_items,
                             n_user=n_user, n_item=n_item,
                             n_layers=len(layer_sizes),
                             # small targets here so the test still runs a (2, 2) grid
                             # (row + contraction tiling, accumulator + resident-ego slicing);
                             # production defaults are tm_target=512, tk_target=2048.
                             tm_target=256, tk_target=256)
    out = jax.block_until_ready(out)

    all_embeddings, u_emb, i_emb, pos_i, neg_i, logits, prediction, cf_loss = out
    assert all_embeddings.shape == (n_user + n_item, emb_size * (1 + len(layer_sizes)))
    assert logits.shape == (2 * batch_size, 1)
    assert prediction.shape == (2 * batch_size, 1)
    assert bool(jnp.all(jnp.isfinite(all_embeddings)))
    assert bool(jnp.all((prediction >= 0.0) & (prediction <= 1.0)))
    assert bool(jnp.isfinite(cf_loss))

    print("KERNEL_OK")
</pallas_src>

<mosaic_0001>
module attributes {stable_mosaic.version = 11 : i64} {
  func.func @_ngcf_layer_kernel(%arg0: i32, %arg1: i32, %arg2: memref<256x256xbf16, #tpu.memory_space<vmem>>, %arg3: memref<512x128xbf16, #tpu.memory_space<vmem>>, %arg4: memref<256x128xf32, #tpu.memory_space<vmem>>, %arg5: memref<256x128xbf16, #tpu.memory_space<vmem>>, %arg6: memref<1x128xf32, #tpu.memory_space<vmem>>, %arg7: memref<256x128xf32, #tpu.memory_space<vmem>>, %arg8: memref<256x128xf32, #tpu.memory_space<vmem>>, %arg9: memref<256x128xf32, #tpu.memory_space<vmem>>) attributes {dimension_semantics = [#tpu.dimension_semantics<parallel>, #tpu.dimension_semantics<arbitrary>], iteration_bounds = array<i64: 2, 2>, scalar_prefetch = 0 : i64, scratch_operands = 1 : i64, tpu.core_type = #tpu.core_type<tc>, window_params = [{transform_indices = @transform_0, window_bounds = array<i64: 256, 256>}, {pipeline_mode = #tpu.pipeline_mode<synchronous>, transform_indices = @transform_1, window_bounds = array<i64: 512, 128>}, {transform_indices = @transform_2, window_bounds = array<i64: 256, 128>}, {pipeline_mode = #tpu.pipeline_mode<synchronous>, transform_indices = @transform_3, window_bounds = array<i64: 256, 128>}, {pipeline_mode = #tpu.pipeline_mode<synchronous>, transform_indices = @transform_4, window_bounds = array<i64: 1, 128>}, {transform_indices = @transform_5, window_bounds = array<i64: 256, 128>}, {transform_indices = @transform_6, window_bounds = array<i64: 256, 128>}]} {
    %c0_i32 = arith.constant 0 : i32
    %0 = arith.cmpi eq, %arg1, %c0_i32 : i32
    %1 = arith.extui %0 : i1 to i32
    %c0_i32_0 = arith.constant 0 : i32
    %2 = arith.cmpi ne, %1, %c0_i32_0 : i32
    scf.if %2 {
      %cst_8 = arith.constant 0.000000e+00 : f32
      %15 = vector.broadcast %cst_8 : f32 to vector<256x128xf32>
      %c0_9 = arith.constant 0 : index
      %c0_10 = arith.constant 0 : index
      %16 = vector.load %arg9[%c0_9, %c0_10] : memref<256x128xf32, #tpu.memory_space<vmem>>, vector<256x128xf32>
      tpu.vector_store %arg9[%c0_9, %c0_10], %15 {strides = array<i32>} : memref<256x128xf32, #tpu.memory_space<vmem>>, vector<256x128xf32>,
    } else {
    }
    %c256_i32 = arith.constant 256 : i32
    %3 = arith.muli %arg1, %c256_i32 : i32
    %4 = tpu.assume_multiple %3, 128 : i32
    %5 = arith.index_cast %4 : i32 to index
    %c0 = arith.constant 0 : index
    %6 = vector.load %arg3[%5, %c0] : memref<512x128xbf16, #tpu.memory_space<vmem>>, vector<256x128xbf16>
    %c0_1 = arith.constant 0 : index
    %c0_2 = arith.constant 0 : index
    %7 = vector.load %arg9[%c0_1, %c0_2] : memref<256x128xf32, #tpu.memory_space<vmem>>, vector<256x128xf32>
    %c0_3 = arith.constant 0 : index
    %c0_4 = arith.constant 0 : index
    %8 = vector.load %arg2[%c0_3, %c0_4] : memref<256x256xbf16, #tpu.memory_space<vmem>>, vector<256x256xbf16>
    %cst = arith.constant dense<0.000000e+00> : vector<256x128xf32>
    %9 = tpu.matmul %8, %6, %cst {dimension_numbers = #tpu.dot_dimension_numbers<[1], [0], [0], [1], [0, 0, 1, 1], [], []>} : vector<256x256xbf16>, vector<256x128xbf16>, vector<256x128xf32> -> vector<256x128xf32>
    %10 = arith.addf %7, %9 : vector<256x128xf32>
    %c0_5 = arith.constant 0 : index
    %c0_6 = arith.constant 0 : index
    %11 = vector.load %arg9[%c0_5, %c0_6] : memref<256x128xf32, #tpu.memory_space<vmem>>, vector<256x128xf32>
    tpu.vector_store %arg9[%c0_5, %c0_6], %10 {strides = array<i32>} : memref<256x128xf32, #tpu.memory_space<vmem>>, vector<256x128xf32>,
    %c1_i32 = arith.constant 1 : i32
    %12 = arith.cmpi eq, %arg1, %c1_i32 : i32
    %13 = arith.extui %12 : i1 to i32
    %c0_i32_7 = arith.constant 0 : i32
    %14 = arith.cmpi ne, %13, %c0_i32_7 : i32
    scf.if %14 {
      %c0_8 = arith.constant 0 : index
      %c0_9 = arith.constant 0 : index
      %15 = vector.load %arg9[%c0_8, %c0_9] : memref<256x128xf32, #tpu.memory_space<vmem>>, vector<256x128xf32>
      %c0_10 = arith.constant 0 : index
      %c0_11 = arith.constant 0 : index
      %16 = vector.load %arg4[%c0_10, %c0_11] : memref<256x128xf32, #tpu.memory_space<vmem>>, vector<256x128xf32>
      %17 = arith.truncf %15 : vector<256x128xf32> to vector<256x128xbf16>
      %18 = arith.mulf %16, %15 : vector<256x128xf32>
      %19 = arith.truncf %18 : vector<256x128xf32> to vector<256x128xbf16>
      %20 = tpu.concatenate %17, %19 in 1 : vector<256x128xbf16>, vector<256x128xbf16> -> vector<256x256xbf16>
      %c0_12 = arith.constant 0 : index
      %c0_13 = arith.constant 0 : index
      %21 = vector.load %arg5[%c0_12, %c0_13] : memref<256x128xbf16, #tpu.memory_space<vmem>>, vector<256x128xbf16>
      %cst_14 = arith.constant dense<0.000000e+00> : vector<256x128xf32>
      %22 = tpu.matmul %20, %21, %cst_14 {dimension_numbers = #tpu.dot_dimension_numbers<[1], [0], [0], [1], [0, 0, 1, 1], [], []>} : vector<256x256xbf16>, vector<256x128xbf16>, vector<256x128xf32> -> vector<256x128xf32>
      %c0_15 = arith.constant 0 : index
      %c0_16 = arith.constant 0 : index
      %23 = vector.load %arg6[%c0_15, %c0_16] : memref<1x128xf32, #tpu.memory_space<vmem>>, vector<1x128xf32>
      %24 = vector.broadcast %23 : vector<1x128xf32> to vector<256x128xf32>
      %25 = arith.addf %22, %24 : vector<256x128xf32>
      %cst_17 = arith.constant 0.000000e+00 : f32
      %26 = vector.broadcast %cst_17 : f32 to vector<256x128xf32>
      %27 = arith.cmpf ogt, %25, %26 : vector<256x128xf32>
      %cst_18 = arith.constant 2.000000e-01 : f32
      %28 = vector.broadcast %cst_18 : f32 to vector<256x128xf32>
      %29 = arith.mulf %28, %25 : vector<256x128xf32>
      %30 = arith.select %27, %25, %29 : vector<256x128xi1>, vector<256x128xf32>
      %31 = arith.mulf %30, %30 : vector<256x128xf32>
      %cst_19 = arith.constant dense<0.000000e+00> : vector<256xf32>
      %32 = vector.multi_reduction <add>, %31, %cst_19 [1] : vector<256x128xf32> to vector<256xf32>
      %33 = vector.shape_cast %32 : vector<256xf32> to vector<256x1xf32>
      %cst_20 = arith.constant 1.000000e-24 : f32
      %34 = vector.broadcast %cst_20 : f32 to vector<256x1xf32>
      %35 = arith.maximumf %33, %34 : vector<256x1xf32>
      %36 = math.rsqrt %35 : vector<256x1xf32>
      %c0_21 = arith.constant 0 : index
      %c0_22 = arith.constant 0 : index
      %37 = vector.load %arg7[%c0_21, %c0_22] : memref<256x128xf32, #tpu.memory_space<vmem>>, vector<256x128xf32>
      tpu.vector_store %arg7[%c0_21, %c0_22], %30 {strides = array<i32>} : memref<256x128xf32, #tpu.memory_space<vmem>>, vector<256x128xf32>,
      %38 = vector.broadcast %36 : vector<256x1xf32> to vector<256x128xf32>
      %39 = arith.mulf %30, %38 : vector<256x128xf32>
      %c0_23 = arith.constant 0 : index
      %c0_24 = arith.constant 0 : index
      %40 = vector.load %arg8[%c0_23, %c0_24] : memref<256x128xf32, #tpu.memory_space<vmem>>, vector<256x128xf32>
      tpu.vector_store %arg8[%c0_23, %c0_24], %39 {strides = array<i32>} : memref<256x128xf32, #tpu.memory_space<vmem>>, vector<256x128xf32>,
    } else {
    }
    return
  }
  func.func @transform_0(%arg0: i32, %arg1: i32) -> (i32, i32) {
    %c0_i32 = arith.constant 0 : i32
    return %arg0, %arg1 : i32, i32
  }
  func.func @transform_1(%arg0: i32, %arg1: i32) -> (i32, i32) {
    %c0_i32 = arith.constant 0 : i32
    %c0_i32_0 = arith.constant 0 : i32
    %c0_i32_1 = arith.constant 0 : i32
    return %c0_i32, %c0_i32_0 : i32, i32
  }
  func.func @transform_2(%arg0: i32, %arg1: i32) -> (i32, i32) {
    %c0_i32 = arith.constant 0 : i32
    %c0_i32_0 = arith.constant 0 : i32
    return %arg0, %c0_i32 : i32, i32
  }
  func.func @transform_3(%arg0: i32, %arg1: i32) -> (i32, i32) {
    %c0_i32 = arith.constant 0 : i32
    %c0_i32_0 = arith.constant 0 : i32
    %c0_i32_1 = arith.constant 0 : i32
    return %c0_i32, %c0_i32_0 : i32, i32
  }
  func.func @transform_4(%arg0: i32, %arg1: i32) -> (i32, i32) {
    %c0_i32 = arith.constant 0 : i32
    %c0_i32_0 = arith.constant 0 : i32
    %c0_i32_1 = arith.constant 0 : i32
    return %c0_i32, %c0_i32_0 : i32, i32
  }
  func.func @transform_5(%arg0: i32, %arg1: i32) -> (i32, i32) {
    %c0_i32 = arith.constant 0 : i32
    %c0_i32_0 = arith.constant 0 : i32
    return %arg0, %c0_i32 : i32, i32
  }
  func.func @transform_6(%arg0: i32, %arg1: i32) -> (i32, i32) {
    %c0_i32 = arith.constant 0 : i32
    %c0_i32_0 = arith.constant 0 : i32
    return %arg0, %c0_i32 : i32, i32
  }
}

module attributes {stable_mosaic.version = 11 : i64} {
  func.func @_ngcf_layer_kernel(%arg0: i32, %arg1: i32, %arg2: memref<256x256xbf16, #tpu.memory_space<vmem>>, %arg3: memref<512x128xbf16, #tpu.memory_space<vmem>>, %arg4: memref<256x128xf32, #tpu.memory_space<vmem>>, %arg5: memref<256x128xbf16, #tpu.memory_space<vmem>>, %arg6: memref<1x128xf32, #tpu.memory_space<vmem>>, %arg7: memref<256x128xf32, #tpu.memory_space<vmem>>, %arg8: memref<256x128xf32, #tpu.memory_space<vmem>>, %arg9: memref<256x128xf32, #tpu.memory_space<vmem>>) attributes {dimension_semantics = [#tpu.dimension_semantics<parallel>, #tpu.dimension_semantics<arbitrary>], iteration_bounds = array<i64: 2, 2>, scalar_prefetch = 0 : i64, scratch_operands = 1 : i64, tpu.core_type = #tpu.core_type<tc>, window_params = [{transform_indices = @transform_0, window_bounds = array<i64: 256, 256>}, {pipeline_mode = #tpu.pipeline_mode<synchronous>, transform_indices = @transform_1, window_bounds = array<i64: 512, 128>}, {transform_indices = @transform_2, window_bounds = array<i64: 256, 128>}, {pipeline_mode = #tpu.pipeline_mode<synchronous>, transform_indices = @transform_3, window_bounds = array<i64: 256, 128>}, {pipeline_mode = #tpu.pipeline_mode<synchronous>, transform_indices = @transform_4, window_bounds = array<i64: 1, 128>}, {transform_indices = @transform_5, window_bounds = array<i64: 256, 128>}, {transform_indices = @transform_6, window_bounds = array<i64: 256, 128>}]} {
    %c0_i32 = arith.constant 0 : i32
    %0 = arith.cmpi eq, %arg1, %c0_i32 : i32
    %1 = arith.extui %0 : i1 to i32
    %c0_i32_0 = arith.constant 0 : i32
    %2 = arith.cmpi ne, %1, %c0_i32_0 : i32
    scf.if %2 {
      %cst_8 = arith.constant 0.000000e+00 : f32
      %15 = vector.broadcast %cst_8 : f32 to vector<256x128xf32>
      %c0_9 = arith.constant 0 : index
      %c0_10 = arith.constant 0 : index
      %16 = vector.load %arg9[%c0_9, %c0_10] : memref<256x128xf32, #tpu.memory_space<vmem>>, vector<256x128xf32>
      tpu.vector_store %arg9[%c0_9, %c0_10], %15 {strides = array<i32>} : memref<256x128xf32, #tpu.memory_space<vmem>>, vector<256x128xf32>,
    } else {
    }
    %c256_i32 = arith.constant 256 : i32
    %3 = arith.muli %arg1, %c256_i32 : i32
    %4 = tpu.assume_multiple %3, 128 : i32
    %5 = arith.index_cast %4 : i32 to index
    %c0 = arith.constant 0 : index
    %6 = vector.load %arg3[%5, %c0] : memref<512x128xbf16, #tpu.memory_space<vmem>>, vector<256x128xbf16>
    %c0_1 = arith.constant 0 : index
    %c0_2 = arith.constant 0 : index
    %7 = vector.load %arg9[%c0_1, %c0_2] : memref<256x128xf32, #tpu.memory_space<vmem>>, vector<256x128xf32>
    %c0_3 = arith.constant 0 : index
    %c0_4 = arith.constant 0 : index
    %8 = vector.load %arg2[%c0_3, %c0_4] : memref<256x256xbf16, #tpu.memory_space<vmem>>, vector<256x256xbf16>
    %cst = arith.constant dense<0.000000e+00> : vector<256x128xf32>
    %9 = tpu.matmul %8, %6, %cst {dimension_numbers = #tpu.dot_dimension_numbers<[1], [0], [0], [1], [0, 0, 1, 1], [], []>} : vector<256x256xbf16>, vector<256x128xbf16>, vector<256x128xf32> -> vector<256x128xf32>
    %10 = arith.addf %7, %9 : vector<256x128xf32>
    %c0_5 = arith.constant 0 : index
    %c0_6 = arith.constant 0 : index
    %11 = vector.load %arg9[%c0_5, %c0_6] : memref<256x128xf32, #tpu.memory_space<vmem>>, vector<256x128xf32>
    tpu.vector_store %arg9[%c0_5, %c0_6], %10 {strides = array<i32>} : memref<256x128xf32, #tpu.memory_space<vmem>>, vector<256x128xf32>,
    %c1_i32 = arith.constant 1 : i32
    %12 = arith.cmpi eq, %arg1, %c1_i32 : i32
    %13 = arith.extui %12 : i1 to i32
    %c0_i32_7 = arith.constant 0 : i32
    %14 = arith.cmpi ne, %13, %c0_i32_7 : i32
    scf.if %14 {
      %c0_8 = arith.constant 0 : index
      %c0_9 = arith.constant 0 : index
      %15 = vector.load %arg9[%c0_8, %c0_9] : memref<256x128xf32, #tpu.memory_space<vmem>>, vector<256x128xf32>
      %c0_10 = arith.constant 0 : index
      %c0_11 = arith.constant 0 : index
      %16 = vector.load %arg4[%c0_10, %c0_11] : memref<256x128xf32, #tpu.memory_space<vmem>>, vector<256x128xf32>
      %17 = arith.truncf %15 : vector<256x128xf32> to vector<256x128xbf16>
      %18 = arith.mulf %16, %15 : vector<256x128xf32>
      %19 = arith.truncf %18 : vector<256x128xf32> to vector<256x128xbf16>
      %20 = tpu.concatenate %17, %19 in 1 : vector<256x128xbf16>, vector<256x128xbf16> -> vector<256x256xbf16>
      %c0_12 = arith.constant 0 : index
      %c0_13 = arith.constant 0 : index
      %21 = vector.load %arg5[%c0_12, %c0_13] : memref<256x128xbf16, #tpu.memory_space<vmem>>, vector<256x128xbf16>
      %cst_14 = arith.constant dense<0.000000e+00> : vector<256x128xf32>
      %22 = tpu.matmul %20, %21, %cst_14 {dimension_numbers = #tpu.dot_dimension_numbers<[1], [0], [0], [1], [0, 0, 1, 1], [], []>} : vector<256x256xbf16>, vector<256x128xbf16>, vector<256x128xf32> -> vector<256x128xf32>
      %c0_15 = arith.constant 0 : index
      %c0_16 = arith.constant 0 : index
      %23 = vector.load %arg6[%c0_15, %c0_16] : memref<1x128xf32, #tpu.memory_space<vmem>>, vector<1x128xf32>
      %24 = vector.broadcast %23 : vector<1x128xf32> to vector<256x128xf32>
      %25 = arith.addf %22, %24 : vector<256x128xf32>
      %cst_17 = arith.constant 0.000000e+00 : f32
      %26 = vector.broadcast %cst_17 : f32 to vector<256x128xf32>
      %27 = arith.cmpf ogt, %25, %26 : vector<256x128xf32>
      %cst_18 = arith.constant 2.000000e-01 : f32
      %28 = vector.broadcast %cst_18 : f32 to vector<256x128xf32>
      %29 = arith.mulf %28, %25 : vector<256x128xf32>
      %30 = arith.select %27, %25, %29 : vector<256x128xi1>, vector<256x128xf32>
      %31 = arith.mulf %30, %30 : vector<256x128xf32>
      %cst_19 = arith.constant dense<0.000000e+00> : vector<256xf32>
      %32 = vector.multi_reduction <add>, %31, %cst_19 [1] : vector<256x128xf32> to vector<256xf32>
      %33 = vector.shape_cast %32 : vector<256xf32> to vector<256x1xf32>
      %cst_20 = arith.constant 1.000000e-24 : f32
      %34 = vector.broadcast %cst_20 : f32 to vector<256x1xf32>
      %35 = arith.maximumf %33, %34 : vector<256x1xf32>
      %36 = math.rsqrt %35 : vector<256x1xf32>
      %c0_21 = arith.constant 0 : index
      %c0_22 = arith.constant 0 : index
      %37 = vector.load %arg7[%c0_21, %c0_22] : memref<256x128xf32, #tpu.memory_space<vmem>>, vector<256x128xf32>
      tpu.vector_store %arg7[%c0_21, %c0_22], %30 {strides = array<i32>} : memref<256x128xf32, #tpu.memory_space<vmem>>, vector<256x128xf32>,
      %38 = vector.broadcast %36 : vector<256x1xf32> to vector<256x128xf32>
      %39 = arith.mulf %30, %38 : vector<256x128xf32>
      %c0_23 = arith.constant 0 : index
      %c0_24 = arith.constant 0 : index
      %40 = vector.load %arg8[%c0_23, %c0_24] : memref<256x128xf32, #tpu.memory_space<vmem>>, vector<256x128xf32>
      tpu.vector_store %arg8[%c0_23, %c0_24], %39 {strides = array<i32>} : memref<256x128xf32, #tpu.memory_space<vmem>>, vector<256x128xf32>,
    } else {
    }
    return
  }
  func.func @transform_0(%arg0: i32, %arg1: i32) -> (i32, i32) {
    %c0_i32 = arith.constant 0 : i32
    return %arg0, %arg1 : i32, i32
  }
  func.func @transform_1(%arg0: i32, %arg1: i32) -> (i32, i32) {
    %c0_i32 = arith.constant 0 : i32
    %c0_i32_0 = arith.constant 0 : i32
    %c0_i32_1 = arith.constant 0 : i32
    return %c0_i32, %c0_i32_0 : i32, i32
  }
  func.func @transform_2(%arg0: i32, %arg1: i32) -> (i32, i32) {
    %c0_i32 = arith.constant 0 : i32
    %c0_i32_0 = arith.constant 0 : i32
    return %arg0, %c0_i32 : i32, i32
  }
  func.func @transform_3(%arg0: i32, %arg1: i32) -> (i32, i32) {
    %c0_i32 = arith.constant 0 : i32
    %c0_i32_0 = arith.constant 0 : i32
    %c0_i32_1 = arith.constant 0 : i32
    return %c0_i32, %c0_i32_0 : i32, i32
  }
  func.func @transform_4(%arg0: i32, %arg1: i32) -> (i32, i32) {
    %c0_i32 = arith.constant 0 : i32
    %c0_i32_0 = arith.constant 0 : i32
    %c0_i32_1 = arith.constant 0 : i32
    return %c0_i32, %c0_i32_0 : i32, i32
  }
  func.func @transform_5(%arg0: i32, %arg1: i32) -> (i32, i32) {
    %c0_i32 = arith.constant 0 : i32
    %c0_i32_0 = arith.constant 0 : i32
    return %arg0, %c0_i32 : i32, i32
  }
  func.func @transform_6(%arg0: i32, %arg1: i32) -> (i32, i32) {
    %c0_i32 = arith.constant 0 : i32
    %c0_i32_0 = arith.constant 0 : i32
    return %arg0, %c0_i32 : i32, i32
  }
}

module attributes {stable_mosaic.version = 11 : i64} {
  func.func @_score_kernel(%arg0: memref<8x384xf32, #tpu.memory_space<vmem>>, %arg1: memref<8x384xf32, #tpu.memory_space<vmem>>, %arg2: memref<8x384xf32, #tpu.memory_space<vmem>>, %arg3: memref<8x128xf32, #tpu.memory_space<vmem>>) attributes {dimension_semantics = [], scalar_prefetch = 0 : i64, scratch_operands = 0 : i64, tpu.core_type = #tpu.core_type<tc>} {
    %c0 = arith.constant 0 : index
    %c0_0 = arith.constant 0 : index
    %0 = vector.load %arg0[%c0, %c0_0] : memref<8x384xf32, #tpu.memory_space<vmem>>, vector<8x384xf32>
    %c0_1 = arith.constant 0 : index
    %c0_2 = arith.constant 0 : index
    %1 = vector.load %arg1[%c0_1, %c0_2] : memref<8x384xf32, #tpu.memory_space<vmem>>, vector<8x384xf32>
    %c0_3 = arith.constant 0 : index
    %c0_4 = arith.constant 0 : index
    %2 = vector.load %arg2[%c0_3, %c0_4] : memref<8x384xf32, #tpu.memory_space<vmem>>, vector<8x384xf32>
    %3 = arith.mulf %0, %1 : vector<8x384xf32>
    %cst = arith.constant dense<0.000000e+00> : vector<8xf32>
    %4 = vector.multi_reduction <add>, %3, %cst [1] : vector<8x384xf32> to vector<8xf32>
    %5 = vector.shape_cast %4 : vector<8xf32> to vector<8x1xf32>
    %6 = arith.negf %5 : vector<8x1xf32>
    %7 = math.exp %6 : vector<8x1xf32>
    %cst_5 = arith.constant 1.000000e+00 : f32
    %8 = vector.broadcast %cst_5 : f32 to vector<8x1xf32>
    %9 = arith.addf %8, %7 : vector<8x1xf32>
    %10 = arith.divf %8, %9 : vector<8x1xf32>
    %11 = arith.subf %1, %2 : vector<8x384xf32>
    %12 = math.absf %11 : vector<8x384xf32>
    %cst_6 = arith.constant dense<0.000000e+00> : vector<8xf32>
    %13 = vector.multi_reduction <add>, %12, %cst_6 [1] : vector<8x384xf32> to vector<8xf32>
    %14 = vector.shape_cast %13 : vector<8xf32> to vector<8x1xf32>
    %15 = tpu.iota {dimensions = array<i32: 1>} : vector<8x128xi32>
    %c0_i32 = arith.constant 0 : i32
    %16 = vector.broadcast %c0_i32 : i32 to vector<8x128xi32>
    %17 = arith.cmpi eq, %15, %16 : vector<8x128xi32>
    %cst_7 = arith.constant 0.000000e+00 : f32
    %18 = vector.shape_cast %5 : vector<8x1xf32> to vector<8x1xf32>
    %19 = vector.broadcast %18 : vector<8x1xf32> to vector<8x128xf32>
    %20 = vector.broadcast %cst_7 : f32 to vector<8x128xf32>
    %21 = arith.select %17, %19, %20 : vector<8x128xi1>, vector<8x128xf32>
    %c1_i32 = arith.constant 1 : i32
    %22 = vector.broadcast %c1_i32 : i32 to vector<8x128xi32>
    %23 = arith.cmpi eq, %15, %22 : vector<8x128xi32>
    %24 = vector.shape_cast %10 : vector<8x1xf32> to vector<8x1xf32>
    %25 = vector.broadcast %24 : vector<8x1xf32> to vector<8x128xf32>
    %26 = arith.select %23, %25, %21 : vector<8x128xi1>, vector<8x128xf32>
    %c2_i32 = arith.constant 2 : i32
    %27 = vector.broadcast %c2_i32 : i32 to vector<8x128xi32>
    %28 = arith.cmpi eq, %15, %27 : vector<8x128xi32>
    %29 = vector.shape_cast %14 : vector<8x1xf32> to vector<8x1xf32>
    %30 = vector.broadcast %29 : vector<8x1xf32> to vector<8x128xf32>
    %31 = arith.select %28, %30, %26 : vector<8x128xi1>, vector<8x128xf32>
    %c0_8 = arith.constant 0 : index
    %c0_9 = arith.constant 0 : index
    %32 = vector.load %arg3[%c0_8, %c0_9] : memref<8x128xf32, #tpu.memory_space<vmem>>, vector<8x128xf32>
    tpu.vector_store %arg3[%c0_8, %c0_9], %31 {strides = array<i32>} : memref<8x128xf32, #tpu.memory_space<vmem>>, vector<8x128xf32>,
    return
  }
}

</mosaic_0001>

<bundles_post_ra>
// kernel: ngcf_cause_forward.5
= control target key start
LH: loop header
LB: loop body
LE: loop exit
PB: predicated region body
PF: predicated region fallthrough
CT: control target
= control target key end

     0   :  { %v46_v26 = vlaneseq  ;;  %s114_s0 = inlined_call_operand.vmem [shape: f32[8,384], index: 0, kind: input, shape index: {}]   ;;  %s115_s1 = inlined_call_operand.vmem [shape: f32[8,384], index: 1, kind: input, shape index: {}]   ;;  %s116_s2 = inlined_call_operand.vmem [shape: f32[8,384], index: 2, kind: input, shape index: {}]   ;;  %s117_s3 = inlined_call_operand.vmem [shape: f32[8,128], index: 3, kind: output, shape index: {}]  }
   0x1   :  { %v14_v0 = vld [vmem:[%s114_s0] sm:$0xff]  ;;  %v15_v1 = vld [vmem:[%s114_s0 + $0x8] sm:$0xff]  ;;  %v16_v2 = vld [vmem:[%s114_s0 + $0x10] sm:$0xff] }
   0x2   :  { %v17_v3 = vld [vmem:[%s115_s1] sm:$0xff]  ;;  %v18_v4 = vld [vmem:[%s115_s1 + $0x8] sm:$0xff]  ;;  %v19_v5 = vld [vmem:[%s115_s1 + $0x10] sm:$0xff]  ;;  %v47_v27 = vand.u32 127, %v46_v26 }
   0x3   :  { %v23_v6 = vmul.f32 %v17_v3, %v14_v0  ;;  %v24_v7 = vmul.f32 %v18_v4, %v15_v1  ;;  %v25_v8 = vmul.f32 %v19_v5, %v16_v2  ;;  %v20_v9 = vld [vmem:[%s116_s2] sm:$0xff]  ;;  %v21_v10 = vld [vmem:[%s116_s2 + $0x8] sm:$0xff]  ;;  %v22_v11 = vld [vmem:[%s116_s2 + $0x10] sm:$0xff] }
   0x4   :  { %v36_v12 = vsub.f32 %v17_v3, %v20_v9  ;;  %v37_v13 = vsub.f32 %v18_v4, %v21_v10  ;;  %v38_v14 = vsub.f32 %v19_v5, %v22_v11  ;;  %vm48_vm0 = vcmp.eq.s32.totalorder %v47_v27, 0 }
   0x5   :  { %v26_v15 = vadd.f32 %v24_v7, %v23_v6  ;;  %vm50_vm1 = vcmp.eq.s32.totalorder %v47_v27, 1  ;;  %vm52_vm2 = vcmp.eq.s32.totalorder %v47_v27, 2 }
   0x6   :  { %v39_v16 = vand.u32 2147483647, %v36_v12  ;;  %v40_v17 = vand.u32 2147483647, %v37_v13  ;;  %v41_v18 = vand.u32 2147483647, %v38_v14 }
   0x7   :  { %v27_v19 = vadd.f32 %v26_v15, %v25_v8 }
   0x8   :  { %v42_v20 = vadd.f32 %v40_v17, %v39_v16 }
   0x9   :  { %28 = vadd.xlane.f32.xlu0 %v27_v19 }
   0xa   :  { %v43_v21 = vadd.f32 %v42_v20, %v41_v18 }
   0xd   :  { %44 = vadd.xlane.f32.xlu0 %v43_v21 }
  0x96   :  { %v29_v22 = vpop.xlane.xlu0 %28 }
  0x97   :  { %v59_v23 = vmul.f32 -1.442695, %v29_v22  ;;  %v49_v30 = vsel %vm48_vm0, %v29_v22, 0.0 }
  0x99   :  { %60 = vpow2.f32 %v59_v23 }
  0x9a   :  { %v45_v28 = vpop.xlane.xlu0 %44 }
  0xa3   :  { %v61_v24 = vpop.eup %60 }
  0xa4   :  { %v33_v25 = vadd.f32 1.0, %v61_v24 }
  0xa6   :  { %62 = vrcp.f32 %v33_v25 }
  0xb0   :  { %v63_v29 = vpop.eup %62 }
  0xb1   :  { %v51_v31 = vsel %vm50_vm1, %v63_v29, %v49_v30 }
  0xb2   :  { %v53_v32 = vsel %vm52_vm2, %v45_v28, %v51_v31 }
  0xb3   :  { %54 = vst [vmem:[%s117_s3] sm:$0xff] %v53_v32 }

// kernel: ngcf_cause_forward.3
= control target key start
LH: loop header
LB: loop body
LE: loop exit
PB: predicated region body
PF: predicated region fallthrough
CT: control target
= control target key end

     0   :  { %s2629_s21 = smov 0   ;;  %s2631_s22 = smov 0   ;;  %s3229_s0 = inlined_call_operand.vmem [shape: bf16[512,512], index: 0, kind: input, shape index: {}]   ;;  %s3230_s1 = inlined_call_operand.vmem [shape: bf16[512,128], index: 1, kind: input, shape index: {}]   ;;  %s3231_s2 = inlined_call_operand.vmem [shape: f32[512,128], index: 2, kind: input, shape index: {}]   ;;  %s3232_s3 = inlined_call_operand.vmem [shape: bf16[256,128], index: 3, kind: input, shape index: {}]   ;;  %s3233_s4 = inlined_call_operand.vmem [shape: f32[1,128], index: 4, kind: input, shape index: {}]   ;;  %s3234_s5 = inlined_call_operand.vmem [shape: f32[512,128], index: 5, kind: output, shape index: {0}]   ;;  %s3235_s6 = inlined_call_operand.vmem [shape: f32[512,128], index: 6, kind: output, shape index: {1}]  }
   0x1   :  { %s2633_s23 = smov 0   ;;  %s2635_s24 = smov 0  }
   0x2   :  { %s2637_s25 = smov 0   ;;  %s2639_s26 = smov 0  }
   0x3   :  { %s2641_s27 = smov 0  }
   0x4 LB: > { %s26_s28 = sadd.s32 1, %s2583_s25  ;;  %s29_s29 = sadd.s32 1, %s2587_s26  ;;  %s2591_s27 = sphi %s2641_s27, %s17_s27   ;;  %s2587_s26 = sphi %s2639_s26, %s3241_s26   ;;  %s2583_s25 = sphi %s2637_s25, %s3240_s25   ;;  %s2579_s24 = sphi %s2635_s24, %s3239_s24   ;;  %s2575_s23 = sphi %s2633_s23, %s3238_s23   ;;  %s2571_s22 = sphi %s2631_s22, %s3237_s22   ;;  %s2567_s21 = sphi %s2629_s21, %s3236_s21  }
   0x5   : > { %p27_p0 = scmp.ge.s32.totalorder %s26_s28, 2  ;;  %p45_p1 = scmp.ne.s32.totalorder %s2571_s22, %s2567_s21 }
   0x6   : > { %p46_p2 = scmp.eq.s32.totalorder %s2591_s27, 0  ;;  %s38_s9 = sadd.s32 1, %s2571_s22 }
   0x7   : > { %s3243_s28 = smov (%p27_p0, %s26_s28), 0  ;;  %s3245_s29 = smov (!%p27_p0, %s29_s29), %s2587_s26 }
   0x8   : > { %p47_p3 = por %p46_p2, %p45_p1  ;;  %p31_p4 = scmp.ge.s32.totalorder %s3245_s29, 2 }
   0x9   : > { %s34_s30 = ssub.s32 %s2583_s25, %s3243_s28  ;;  %p1994_p6 = scmp.ge.s32.totalorder %s2591_s27, 4 }
   0xa   : > { %s3247_s29 = smov (%p31_p4, %s3245_s29), 0 }
   0xb   : > { %s33_s7 = ssub.s32 %s2587_s26, %s3247_s29  ;;  %221 = sbr.rel (%p1994_p6) target bundleno = 41 (0x29), region = 28 }
   0xc   : > { %s35_s8 = sor.u32 %s34_s30, %s33_s7 }
   0xd   : > { %p36_p5 = scmp.eq.s32.totalorder %s35_s8, 0 }
   0xf   : > { %s2680_s10 = scalar_select %p36_p5, %s2571_s22, %s38_s9  }
  0x12   : > { %224 = sbr.rel (!%p47_p3) target bundleno = 41 (0x29), region = 32  ;;  %s226_s11 = sand.u32 (%p47_p3), 1, %s2571_s22  }
  0x13   : > { %s1997_s12 = sshll.u32 (%p47_p3), %s2583_s25, 1  ;;  %s1995_s13 = sshll.u32 (%p47_p3), %s226_s11, 8 }
  0x14   : > { %s2079_s14 = sshll.u32 (%p47_p3), %s2587_s26, 7  ;;  %s2694_s20 = scalar_lea.vmem (%p47_p3), [#allocation3], %s1995_s13 }
  0x15   : > { %s232_s15 = sadd.s32 (%p47_p3), %s2079_s14, %s1997_s12 }
  0x16   : > { %s1999_s16 = sshll.u32 (%p47_p3), %s232_s15, 2 }
  0x17   : > { %s2689_s19 = scalar_lea.vmem (%p47_p3), %s3229_s0, %s1999_s16 }
  0x18   : > { %v324_v0 = vld [vmem:[%s2689_s19] sm:$0xff] (%p47_p3)  ;;  %v326_v1 = vld [vmem:[%s2689_s19 + $0x10] sm:$0xff] (%p47_p3) }
  0x19   : > { %v328_v2 = vld [vmem:[%s2689_s19 + $0x20] sm:$0xff]  ;;  %325 = vst [vmem:[%s2694_s20] sm:$0xff] %v324_v0  ;;  %327 = vst [vmem:[%s2694_s20 + $0x8] sm:$0xff] %v326_v1  ;;  %v330_v3 = vld [vmem:[%s2689_s19 + $0x30] sm:$0xff] }
  0x1a   : > { %329 = vst [vmem:[%s2694_s20 + $0x10] sm:$0xff] %v328_v2  ;;  %v332_v4 = vld [vmem:[%s2689_s19 + $0x40] sm:$0xff]  ;;  %v334_v5 = vld [vmem:[%s2689_s19 + $0x50] sm:$0xff]  ;;  %331 = vst [vmem:[%s2694_s20 + $0x18] sm:$0xff] %v330_v3 }
  0x1b   : > { %333 = vst [vmem:[%s2694_s20 + $0x20] sm:$0xff] %v332_v4  ;;  %335 = vst [vmem:[%s2694_s20 + $0x28] sm:$0xff] %v334_v5  ;;  %v336_v6 = vld [vmem:[%s2689_s19 + $0x60] sm:$0xff]  ;;  %v338_v7 = vld [vmem:[%s2689_s19 + $0x70] sm:$0xff] }
  0x1c   : > { %v340_v8 = vld [vmem:[%s2689_s19 + $0x80] sm:$0xff]  ;;  %337 = vst [vmem:[%s2694_s20 + $0x30] sm:$0xff] %v336_v6  ;;  %339 = vst [vmem:[%s2694_s20 + $0x38] sm:$0xff] %v338_v7  ;;  %v342_v9 = vld [vmem:[%s2689_s19 + $0x90] sm:$0xff] }
  0x1d   : > { %341 = vst [vmem:[%s2694_s20 + $0x40] sm:$0xff] %v340_v8  ;;  %v344_v10 = vld [vmem:[%s2689_s19 + $0xa0] sm:$0xff]  ;;  %v346_v11 = vld [vmem:[%s2689_s19 + $0xb0] sm:$0xff]  ;;  %343 = vst [vmem:[%s2694_s20 + $0x48] sm:$0xff] %v342_v9 }
  0x1e   : > { %345 = vst [vmem:[%s2694_s20 + $0x50] sm:$0xff] %v344_v10  ;;  %347 = vst [vmem:[%s2694_s20 + $0x58] sm:$0xff] %v346_v11  ;;  %v348_v12 = vld [vmem:[%s2689_s19 + $0xc0] sm:$0xff]  ;;  %v350_v13 = vld [vmem:[%s2689_s19 + $0xd0] sm:$0xff] }
  0x1f   : > { %v352_v14 = vld [vmem:[%s2689_s19 + $0xe0] sm:$0xff]  ;;  %349 = vst [vmem:[%s2694_s20 + $0x60] sm:$0xff] %v348_v12  ;;  %351 = vst [vmem:[%s2694_s20 + $0x68] sm:$0xff] %v350_v13  ;;  %v354_v15 = vld [vmem:[%s2689_s19 + $0xf0] sm:$0xff] }
  0x20   : > { %353 = vst [vmem:[%s2694_s20 + $0x70] sm:$0xff] %v352_v14  ;;  %v356_v16 = vld [vmem:[%s2689_s19 + $0x100] sm:$0xff]  ;;  %v358_v17 = vld [vmem:[%s2689_s19 + $0x110] sm:$0xff]  ;;  %355 = vst [vmem:[%s2694_s20 + $0x78] sm:$0xff] %v354_v15 }
  0x21   : > { %357 = vst [vmem:[%s2694_s20 + $0x80] sm:$0xff] %v356_v16  ;;  %359 = vst [vmem:[%s2694_s20 + $0x88] sm:$0xff] %v358_v17  ;;  %v360_v18 = vld [vmem:[%s2689_s19 + $0x120] sm:$0xff]  ;;  %v362_v19 = vld [vmem:[%s2689_s19 + $0x130] sm:$0xff] }
  0x22   : > { %v364_v20 = vld [vmem:[%s2689_s19 + $0x140] sm:$0xff]  ;;  %361 = vst [vmem:[%s2694_s20 + $0x90] sm:$0xff] %v360_v18  ;;  %363 = vst [vmem:[%s2694_s20 + $0x98] sm:$0xff] %v362_v19  ;;  %v366_v21 = vld [vmem:[%s2689_s19 + $0x150] sm:$0xff] }
  0x23   : > { %365 = vst [vmem:[%s2694_s20 + $0xa0] sm:$0xff] %v364_v20  ;;  %v368_v22 = vld [vmem:[%s2689_s19 + $0x160] sm:$0xff]  ;;  %v370_v23 = vld [vmem:[%s2689_s19 + $0x170] sm:$0xff]  ;;  %367 = vst [vmem:[%s2694_s20 + $0xa8] sm:$0xff] %v366_v21 }
  0x24   : > { %369 = vst [vmem:[%s2694_s20 + $0xb0] sm:$0xff] %v368_v22  ;;  %371 = vst [vmem:[%s2694_s20 + $0xb8] sm:$0xff] %v370_v23  ;;  %v372_v24 = vld [vmem:[%s2689_s19 + $0x180] sm:$0xff]  ;;  %v374_v25 = vld [vmem:[%s2689_s19 + $0x190] sm:$0xff] }
  0x25   : > { %v376_v26 = vld [vmem:[%s2689_s19 + $0x1a0] sm:$0xff]  ;;  %373 = vst [vmem:[%s2694_s20 + $0xc0] sm:$0xff] %v372_v24  ;;  %375 = vst [vmem:[%s2694_s20 + $0xc8] sm:$0xff] %v374_v25  ;;  %v378_v27 = vld [vmem:[%s2689_s19 + $0x1b0] sm:$0xff] }
  0x26   : > { %377 = vst [vmem:[%s2694_s20 + $0xd0] sm:$0xff] %v376_v26  ;;  %v380_v28 = vld [vmem:[%s2689_s19 + $0x1c0] sm:$0xff]  ;;  %v382_v29 = vld [vmem:[%s2689_s19 + $0x1d0] sm:$0xff]  ;;  %379 = vst [vmem:[%s2694_s20 + $0xd8] sm:$0xff] %v378_v27 }
  0x27   : > { %381 = vst [vmem:[%s2694_s20 + $0xe0] sm:$0xff] %v380_v28  ;;  %383 = vst [vmem:[%s2694_s20 + $0xe8] sm:$0xff] %v382_v29  ;;  %v384_v30 = vld [vmem:[%s2689_s19 + $0x1e0] sm:$0xff]  ;;  %v386_v31 = vld [vmem:[%s2689_s19 + $0x1f0] sm:$0xff] }
  0x28   : > { %385 = vst [vmem:[%s2694_s20 + $0xf0] sm:$0xff] %v384_v30  ;;  %387 = vst [vmem:[%s2694_s20 + $0xf8] sm:$0xff] %v386_v31 }
  0x29 PF: > { %p2000_p7 = scmp.ge.s32.totalorder %s2591_s27, 1  ;;  %p401_p8 = scmp.lt.s32.totalorder %s2591_s27, 5 }
  0x2b   : > { %p402_p9 = pnand %p2000_p7, %p401_p8 }
  0x2c   : > { %s408_s30 = sand.u32 (!%p402_p9), 1, %s2567_s21   ;;  %s2002_s7 = sshll.u32 (!%p402_p9), %s2579_s24, 5 }
  0x2d   : > { %405 = sbr.rel (%p402_p9) target bundleno = 833 (0x341), region = 74  ;;  %s2001_s8 = sshll.u32 (!%p402_p9), %s408_s30, 8 }
  0x2e   : > { %p450_p10 = scmp.lt.s32.totalorder (!%p402_p9), %s2002_s7, 63  ;;  %s2776_s21 = scalar_lea.vmem (!%p402_p9), [#allocation3], %s2001_s8 }
  0x2f   : > { %p2008_p11 = scmp.ne.s32.totalorder (!%p402_p9), %s2575_s23, 0 }
  0x34   : > { %s3249_s7 = smov (!%p450_p10, %s2002_s7), 63  ;;  %471 = sbr.rel (%p2008_p11) target bundleno = 70 (0x46), region = 82 }
  0x35   : > { %s2003_s9 = sshll.u32 %s3249_s7, 3  ;;  %v2593_v32 = vmov (!%p2008_p11), 0.0  }
  0x36   : > { %s2764_s13 = scalar_lea.vmem %s3231_s2, %s2003_s9  ;;  %s2769_s16 = scalar_lea.vmem %s3234_s5, %s2003_s9  ;;  %472 = vst [vmem:[#allocation2] sm:$0xff] (!%p2008_p11), %v2593_v32  ;;  %473 = vst [vmem:[#allocation2 + $0x8] sm:$0xff] (!%p2008_p11), %v2593_v32 }
  0x37   : > { %s2774_s19 = scalar_lea.vmem %s3235_s6, %s2003_s9  ;;  %474 = vst [vmem:[#allocation2 + $0x10] sm:$0xff] (!%p2008_p11), %v2593_v32  ;;  %475 = vst [vmem:[#allocation2 + $0x18] sm:$0xff] (!%p2008_p11), %v2593_v32 }
  0x38   : > { %476 = vst [vmem:[#allocation2 + $0x20] sm:$0xff] (!%p2008_p11), %v2593_v32  ;;  %477 = vst [vmem:[#allocation2 + $0x28] sm:$0xff] (!%p2008_p11), %v2593_v32 }
  0x39   : > { %478 = vst [vmem:[#allocation2 + $0x30] sm:$0xff] (!%p2008_p11), %v2593_v32  ;;  %479 = vst [vmem:[#allocation2 + $0x38] sm:$0xff] (!%p2008_p11), %v2593_v32 }
  0x3a   : > { %480 = vst [vmem:[#allocation2 + $0x40] sm:$0xff] (!%p2008_p11), %v2593_v32  ;;  %481 = vst [vmem:[#allocation2 + $0x48] sm:$0xff] (!%p2008_p11), %v2593_v32 }
  0x3b   : > { %482 = vst [vmem:[#allocation2 + $0x50] sm:$0xff] %v2593_v32  ;;  %483 = vst [vmem:[#allocation2 + $0x58] sm:$0xff] %v2593_v32 }
  0x3c   : > { %484 = vst [vmem:[#allocation2 + $0x60] sm:$0xff] %v2593_v32  ;;  %485 = vst [vmem:[#allocation2 + $0x68] sm:$0xff] %v2593_v32 }
  0x3d   : > { %486 = vst [vmem:[#allocation2 + $0x70] sm:$0xff] %v2593_v32  ;;  %487 = vst [vmem:[#allocation2 + $0x78] sm:$0xff] %v2593_v32 }
  0x3e   : > { %488 = vst [vmem:[#allocation2 + $0x80] sm:$0xff] %v2593_v32  ;;  %489 = vst [vmem:[#allocation2 + $0x88] sm:$0xff] %v2593_v32 }
  0x3f   : > { %490 = vst [vmem:[#allocation2 + $0x90] sm:$0xff] %v2593_v32  ;;  %491 = vst [vmem:[#allocation2 + $0x98] sm:$0xff] %v2593_v32 }
  0x40   : > { %492 = vst [vmem:[#allocation2 + $0xa0] sm:$0xff] %v2593_v32  ;;  %493 = vst [vmem:[#allocation2 + $0xa8] sm:$0xff] %v2593_v32 }
  0x41   : > { %494 = vst [vmem:[#allocation2 + $0xb0] sm:$0xff] %v2593_v32  ;;  %495 = vst [vmem:[#allocation2 + $0xb8] sm:$0xff] %v2593_v32 }
  0x42   : > { %496 = vst [vmem:[#allocation2 + $0xc0] sm:$0xff] %v2593_v32  ;;  %497 = vst [vmem:[#allocation2 + $0xc8] sm:$0xff] %v2593_v32 }
  0x43   : > { %498 = vst [vmem:[#allocation2 + $0xd0] sm:$0xff] %v2593_v32  ;;  %499 = vst [vmem:[#allocation2 + $0xd8] sm:$0xff] %v2593_v32 }
  0x44   : > { %500 = vst [vmem:[#allocation2 + $0xe0] sm:$0xff] %v2593_v32  ;;  %501 = vst [vmem:[#allocation2 + $0xe8] sm:$0xff] %v2593_v32 }
  0x45   : > { %502 = vst [vmem:[#allocation2 + $0xf0] sm:$0xff] %v2593_v32  ;;  %503 = vst [vmem:[#allocation2 + $0xf8] sm:$0xff] %v2593_v32 }
  0x46 PF: > { %s2009_s24 = sshll.u32 %s2575_s23, 8  ;;  %v2411_v33 = vld [vmem:[%s2776_s21 + $0x4] ss:$8 sps:$4 sm:$0xff]   ;;  %v2409_v51 = vld [vmem:[%s2776_s21] ss:$8 sps:$4 sm:$0xff]   ;;  %p2059_p12 = scmp.ne.s32.totalorder %s2575_s23, 1 }
  0x47   : > { %s505_s20 = sshra.s32 %s2009_s24, 3  ;;  %v2414_v34 = vld [vmem:[%s2776_s21 + $0x84] ss:$8 sps:$4 sm:$0xff]   ;;  %893 = vmatprep.mubr.bf16.mxu0 %v2411_v33  ;;  %v2412_v52 = vld [vmem:[%s2776_s21 + $0x80] ss:$8 sps:$4 sm:$0xff]  }
  0x48   : > { %s2010_s30 = sshll.u32 %s505_s20, 2  ;;  %957 = vmatprep.mubr.bf16.mxu1 %v2414_v34  ;;  %v2415_v53 = vld [vmem:[%s2776_s21 + $0x14] ss:$8 sps:$4 sm:$0xff]   ;;  %v2419_v55 = vld [vmem:[%s2776_s21 + $0x10] ss:$8 sps:$4 sm:$0xff]   ;;  %v541_v19 = vld [vmem:[#allocation2] sm:$0xff] }
  0x49   : > { %s2785_s9 = scalar_lea.vmem %s3230_s1, %s2010_s30  ;;  %v2417_v54 = vld [vmem:[%s2776_s21 + $0x94] ss:$8 sps:$4 sm:$0xff]   ;;  %v2420_v56 = vld [vmem:[%s2776_s21 + $0x90] ss:$8 sps:$4 sm:$0xff]   ;;  %v2421_v57 = vld [vmem:[%s2776_s21 + $0x24] ss:$8 sps:$4 sm:$0xff]  }
  0x4a   : > { %v2393_v35 = vld [vmem:[%s2785_s9 + $0x40] sm:$0xff]   ;;  %v2395_v37 = vld [vmem:[%s2785_s9 + $0x48] sm:$0xff]   ;;  %v2397_v39 = vld [vmem:[%s2785_s9 + $0x50] sm:$0xff]  }
  0x4b   : > { %v2394_v36 = vld [vmem:[%s2785_s9] sm:$0xff]   ;;  %2080 = vmatprep.subr.bf16.mxu0 %v2393_v35  ;;  %2304 = vmatprep.subr.bf16.mxu1 %v2393_v35  ;;  %v2396_v38 = vld [vmem:[%s2785_s9 + $0x8] sm:$0xff]   ;;  %v2398_v40 = vld [vmem:[%s2785_s9 + $0x10] sm:$0xff]  }
  0x4c   : > { %2081 = vmatpush3.bf16.msra.mxu0 %v2394_v36  ;;  %2312 = vmatpush3.bf16.msra.mxu1 %v2394_v36  ;;  %v2399_v41 = vld [vmem:[%s2785_s9 + $0x58] sm:$0xff]   ;;  %v2401_v43 = vld [vmem:[%s2785_s9 + $0x60] sm:$0xff]   ;;  %v2403_v45 = vld [vmem:[%s2785_s9 + $0x68] sm:$0xff]  }
  0x4d   : > { %2082 = vmatprep.subr.bf16.mxu0 %v2395_v37  ;;  %2305 = vmatprep.subr.bf16.mxu1 %v2395_v37  ;;  %v2400_v42 = vld [vmem:[%s2785_s9 + $0x18] sm:$0xff]   ;;  %v2402_v44 = vld [vmem:[%s2785_s9 + $0x20] sm:$0xff]   ;;  %v2404_v46 = vld [vmem:[%s2785_s9 + $0x28] sm:$0xff]  }
  0x4e   : > { %v2405_v47 = vld [vmem:[%s2785_s9 + $0x70] sm:$0xff]   ;;  %v2407_v49 = vld [vmem:[%s2785_s9 + $0x78] sm:$0xff]   ;;  %v2423_v58 = vld [vmem:[%s2776_s21 + $0xa4] ss:$8 sps:$4 sm:$0xff]  }
  0x4f   : > { %v2406_v48 = vld [vmem:[%s2785_s9 + $0x30] sm:$0xff]   ;;  %v2408_v50 = vld [vmem:[%s2785_s9 + $0x38] sm:$0xff]   ;;  %v2425_v59 = vld [vmem:[%s2776_s21 + $0x20] ss:$8 sps:$4 sm:$0xff]  }
  0x50   : > { %2083 = vmatpush3.bf16.msra.mxu0 %v2396_v38  ;;  %2313 = vmatpush3.bf16.msra.mxu1 %v2396_v38  ;;  %v2426_v60 = vld [vmem:[%s2776_s21 + $0xa0] ss:$8 sps:$4 sm:$0xff]   ;;  %v2427_v61 = vld [vmem:[%s2776_s21 + $0x34] ss:$8 sps:$4 sm:$0xff]   ;;  %v2431_v63 = vld [vmem:[%s2776_s21 + $0x30] ss:$8 sps:$4 sm:$0xff]  }
  0x51   : > { %2084 = vmatprep.subr.bf16.mxu0 %v2397_v39  ;;  %2306 = vmatprep.subr.bf16.mxu1 %v2397_v39  ;;  %v2429_v62 = vld [vmem:[%s2776_s21 + $0xb4] ss:$8 sps:$4 sm:$0xff]   ;;  %v2432_v0 = vld [vmem:[%s2776_s21 + $0xb0] ss:$8 sps:$4 sm:$0xff]   ;;  %v2433_v1 = vld [vmem:[%s2776_s21 + $0x44] ss:$8 sps:$4 sm:$0xff]  }
  0x52   : > { %v2435_v2 = vld [vmem:[%s2776_s21 + $0xc4] ss:$8 sps:$4 sm:$0xff]   ;;  %v2437_v3 = vld [vmem:[%s2776_s21 + $0x40] ss:$8 sps:$4 sm:$0xff]   ;;  %v2439_v5 = vld [vmem:[%s2776_s21 + $0x54] ss:$8 sps:$4 sm:$0xff]  }
  0x53   : > { %v2438_v4 = vld [vmem:[%s2776_s21 + $0xc0] ss:$8 sps:$4 sm:$0xff]   ;;  %v2441_v6 = vld [vmem:[%s2776_s21 + $0xd4] ss:$8 sps:$4 sm:$0xff]   ;;  %v2443_v7 = vld [vmem:[%s2776_s21 + $0x50] ss:$8 sps:$4 sm:$0xff]  }
  0x54   : > { %2085 = vmatpush3.bf16.msra.mxu0 %v2398_v40  ;;  %2314 = vmatpush3.bf16.msra.mxu1 %v2398_v40  ;;  %v2444_v8 = vld [vmem:[%s2776_s21 + $0xd0] ss:$8 sps:$4 sm:$0xff]   ;;  %v2445_v9 = vld [vmem:[%s2776_s21 + $0x64] ss:$8 sps:$4 sm:$0xff]   ;;  %v2449_v11 = vld [vmem:[%s2776_s21 + $0x60] ss:$8 sps:$4 sm:$0xff]  }
  0x55   : > { %2086 = vmatprep.subr.bf16.mxu0 %v2399_v41  ;;  %2307 = vmatprep.subr.bf16.mxu1 %v2399_v41  ;;  %v2447_v10 = vld [vmem:[%s2776_s21 + $0xe4] ss:$8 sps:$4 sm:$0xff]   ;;  %v2450_v12 = vld [vmem:[%s2776_s21 + $0xe0] ss:$8 sps:$4 sm:$0xff]   ;;  %v2451_v13 = vld [vmem:[%s2776_s21 + $0x74] ss:$8 sps:$4 sm:$0xff]  }
  0x56   : > { %v2453_v14 = vld [vmem:[%s2776_s21 + $0xf4] ss:$8 sps:$4 sm:$0xff]   ;;  %v2455_v15 = vld [vmem:[%s2776_s21 + $0x70] ss:$8 sps:$4 sm:$0xff]   ;;  %v557_v21 = vld [vmem:[#allocation2 + $0x80] sm:$0xff] }
  0x57   : > { %v2456_v16 = vld [vmem:[%s2776_s21 + $0xf0] ss:$8 sps:$4 sm:$0xff]   ;;  %v542_v27 = vld [vmem:[#allocation2 + $0x8] sm:$0xff] }
  0x58   : > { %2087 = vmatpush3.bf16.msra.mxu0 %v2400_v42  ;;  %2315 = vmatpush3.bf16.msra.mxu1 %v2400_v42  ;;  %v558_v29 = vld [vmem:[#allocation2 + $0x88] sm:$0xff]  ;;  %v543_v39 = vld [vmem:[#allocation2 + $0x10] sm:$0xff] }
  0x59   : > { %2088 = vmatprep.subr.bf16.mxu0 %v2401_v43  ;;  %2308 = vmatprep.subr.bf16.mxu1 %v2401_v43  ;;  %v559_v41 = vld [vmem:[#allocation2 + $0x90] sm:$0xff] }
  0x5c   : > { %2089 = vmatpush3.bf16.msra.mxu0 %v2402_v44  ;;  %2316 = vmatpush3.bf16.msra.mxu1 %v2402_v44 }
  0x5d   : > { %2090 = vmatprep.subr.bf16.mxu0 %v2403_v45  ;;  %2309 = vmatprep.subr.bf16.mxu1 %v2403_v45 }
  0x60   : > { %2091 = vmatpush3.bf16.msra.mxu0 %v2404_v46  ;;  %2317 = vmatpush3.bf16.msra.mxu1 %v2404_v46 }
  0x61   : > { %2092 = vmatprep.subr.bf16.mxu0 %v2405_v47  ;;  %2310 = vmatprep.subr.bf16.mxu1 %v2405_v47  ;;  %v544_v47 = vld [vmem:[#allocation2 + $0x18] sm:$0xff] }
  0x64   : > { %2093 = vmatpush3.bf16.msra.mxu0 %v2406_v48  ;;  %2318 = vmatpush3.bf16.msra.mxu1 %v2406_v48 }
  0x65   : > { %2094 = vmatprep.subr.bf16.mxu0 %v2407_v49  ;;  %2311 = vmatprep.subr.bf16.mxu1 %v2407_v49  ;;  %v560_v49 = vld [vmem:[#allocation2 + $0x98] sm:$0xff] }
  0x68   : > { %2095 = vmatpush3.bf16.msra.mxu0 %v2408_v50  ;;  %2319 = vmatpush3.bf16.msra.mxu1 %v2408_v50 }
  0x6b   : > { %894 = vmatmul.mubr.bf16.vlgmr.msra.gmra.mrb[0].mxu0 %v2409_v51  ;;  %958 = vmatmul.mubr.bf16.vlgmr.msra.gmra.mrb[0].mxu1 %v2412_v52 }
  0x6c   : > { %901 = vmatprep.mubr.bf16.mxu0 %v2415_v53  ;;  %965 = vmatprep.mubr.bf16.mxu1 %v2417_v54 }
  0x73   : > { %902 = vmatmul.mubr.bf16.gmra.mrb[4].mxu0 %v2419_v55  ;;  %966 = vmatmul.mubr.bf16.gmra.mrb[4].mxu1 %v2420_v56 }
  0x74   : > { %909 = vmatprep.mubr.bf16.mxu0 %v2421_v57  ;;  %973 = vmatprep.mubr.bf16.mxu1 %v2423_v58 }
  0x7b   : > { %910 = vmatmul.mubr.bf16.gmra.mrb[8].mxu0 %v2425_v59  ;;  %974 = vmatmul.mubr.bf16.gmra.mrb[8].mxu1 %v2426_v60  ;;  %v545_v59 = vld [vmem:[#allocation2 + $0x20] sm:$0xff] }
  0x7c   : > { %917 = vmatprep.mubr.bf16.mxu0 %v2427_v61  ;;  %981 = vmatprep.mubr.bf16.mxu1 %v2429_v62  ;;  %v561_v61 = vld [vmem:[#allocation2 + $0xa0] sm:$0xff] }
  0x83   : > { %918 = vmatmul.mubr.bf16.gmra.mrb[12].mxu0 %v2431_v63  ;;  %982 = vmatmul.mubr.bf16.gmra.mrb[12].mxu1 %v2432_v0 }
  0x84   : > { %925 = vmatprep.mubr.bf16.mxu0 %v2433_v1  ;;  %989 = vmatprep.mubr.bf16.mxu1 %v2435_v2 }
  0x8b   : > { %926 = vmatmul.mubr.bf16.gmra.mrb[16].mxu0 %v2437_v3  ;;  %990 = vmatmul.mubr.bf16.gmra.mrb[16].mxu1 %v2438_v4  ;;  %v546_v3 = vld [vmem:[#allocation2 + $0x28] sm:$0xff] }
  0x8c   : > { %933 = vmatprep.mubr.bf16.mxu0 %v2439_v5  ;;  %997 = vmatprep.mubr.bf16.mxu1 %v2441_v6  ;;  %v562_v5 = vld [vmem:[#allocation2 + $0xa8] sm:$0xff] }
  0x93   : > { %934 = vmatmul.mubr.bf16.gmra.mrb[20].mxu0 %v2443_v7  ;;  %998 = vmatmul.mubr.bf16.gmra.mrb[20].mxu1 %v2444_v8 }
  0x94   : > { %941 = vmatprep.mubr.bf16.mxu0 %v2445_v9  ;;  %1005 = vmatprep.mubr.bf16.mxu1 %v2447_v10 }
  0x9b   : > { %942 = vmatmul.mubr.bf16.gmra.mrb[24].mxu0 %v2449_v11  ;;  %1006 = vmatmul.mubr.bf16.gmra.mrb[24].mxu1 %v2450_v12 }
  0x9c   : > { %949 = vmatprep.mubr.bf16.mxu0 %v2451_v13  ;;  %1013 = vmatprep.mubr.bf16.mxu1 %v2453_v14 }
  0xa3   : > { %950 = vmatmul.mubr.bf16.gmra.mrb[28].mxu0 %v2455_v15  ;;  %1014 = vmatmul.mubr.bf16.gmra.mrb[28].mxu1 %v2456_v16  ;;  %v547_v15 = vld [vmem:[#allocation2 + $0x30] sm:$0xff] }
 0x13e   : > { %v2096_v17 = vpop.f32.mrb[0].mxu0  ;;  %v2144_v18 = vpop.f32.mrb[0].mxu1 }
 0x13f   : > { %v2097_v20 = vpop.f32.mrb[1].mxu0  ;;  %v2145_v22 = vpop.f32.mrb[1].mxu1 }
 0x140   : > { %v2098_v23 = vadd.f32 %v2097_v20, %v2096_v17  ;;  %v2146_v24 = vadd.f32 %v2145_v22, %v2144_v18  ;;  %v2099_v25 = vpop.f32.mrb[2].mxu0  ;;  %v2147_v26 = vpop.f32.mrb[2].mxu1  ;;  %v563_v17 = vld [vmem:[#allocation2 + $0xb0] sm:$0xff] }
 0x141   : > { %v2100_v28 = vpop.f32.mrb[3].mxu0  ;;  %v2148_v30 = vpop.f32.mrb[3].mxu1 }
 0x142   : > { %v1022_v31 = vadd.f32 %v2098_v23, %v541_v19  ;;  %v1038_v32 = vadd.f32 %v2146_v24, %v557_v21  ;;  %v2101_v33 = vadd.f32 %v2100_v28, %v2099_v25  ;;  %v2149_v34 = vadd.f32 %v2148_v30, %v2147_v26  ;;  %v548_v23 = vld [vmem:[#allocation2 + $0x38] sm:$0xff] }
 0x143   : > { %v564_v25 = vld [vmem:[#allocation2 + $0xb8] sm:$0xff] }
 0x144   : > { %1054 = vst [vmem:[#allocation2] sm:$0xff] %v1022_v31  ;;  %1070 = vst [vmem:[#allocation2 + $0x80] sm:$0xff] %v1038_v32  ;;  %v1023_v35 = vadd.f32 %v2101_v33, %v542_v27  ;;  %v1039_v36 = vadd.f32 %v2149_v34, %v558_v29 }
 0x146   : > { %1055 = vst [vmem:[#allocation2 + $0x8] sm:$0xff] %v1023_v35  ;;  %1071 = vst [vmem:[#allocation2 + $0x88] sm:$0xff] %v1039_v36  ;;  %v2102_v37 = vpop.f32.mrb[4].mxu0  ;;  %v2150_v38 = vpop.f32.mrb[4].mxu1  ;;  %v549_v35 = vld [vmem:[#allocation2 + $0x40] sm:$0xff] }
 0x147   : > { %v2103_v40 = vpop.f32.mrb[5].mxu0  ;;  %v2151_v42 = vpop.f32.mrb[5].mxu1 }
 0x148   : > { %v2104_v43 = vadd.f32 %v2103_v40, %v2102_v37  ;;  %v2152_v44 = vadd.f32 %v2151_v42, %v2150_v38  ;;  %v2105_v45 = vpop.f32.mrb[6].mxu0  ;;  %v2153_v46 = vpop.f32.mrb[6].mxu1  ;;  %v565_v37 = vld [vmem:[#allocation2 + $0xc0] sm:$0xff] }
 0x149   : > { %v2106_v48 = vpop.f32.mrb[7].mxu0  ;;  %v2154_v50 = vpop.f32.mrb[7].mxu1 }
 0x14a   : > { %v1024_v51 = vadd.f32 %v2104_v43, %v543_v39  ;;  %v1040_v52 = vadd.f32 %v2152_v44, %v559_v41  ;;  %v2107_v53 = vadd.f32 %v2106_v48, %v2105_v45  ;;  %v2155_v54 = vadd.f32 %v2154_v50, %v2153_v46  ;;  %v550_v43 = vld [vmem:[#allocation2 + $0x48] sm:$0xff] }
 0x14b   : > { %v566_v45 = vld [vmem:[#allocation2 + $0xc8] sm:$0xff] }
 0x14c   : > { %1056 = vst [vmem:[#allocation2 + $0x10] sm:$0xff] %v1024_v51  ;;  %1072 = vst [vmem:[#allocation2 + $0x90] sm:$0xff] %v1040_v52  ;;  %v1025_v55 = vadd.f32 %v2107_v53, %v544_v47  ;;  %v1041_v56 = vadd.f32 %v2155_v54, %v560_v49 }
 0x14e   : > { %1057 = vst [vmem:[#allocation2 + $0x18] sm:$0xff] %v1025_v55  ;;  %1073 = vst [vmem:[#allocation2 + $0x98] sm:$0xff] %v1041_v56  ;;  %v2108_v57 = vpop.f32.mrb[8].mxu0  ;;  %v2156_v58 = vpop.f32.mrb[8].mxu1  ;;  %v551_v55 = vld [vmem:[#allocation2 + $0x50] sm:$0xff] }
 0x14f   : > { %v2109_v60 = vpop.f32.mrb[9].mxu0  ;;  %v2157_v62 = vpop.f32.mrb[9].mxu1 }
 0x150   : > { %v2110_v63 = vadd.f32 %v2109_v60, %v2108_v57  ;;  %v2158_v0 = vadd.f32 %v2157_v62, %v2156_v58  ;;  %v2111_v1 = vpop.f32.mrb[10].mxu0  ;;  %v2159_v2 = vpop.f32.mrb[10].mxu1  ;;  %v567_v57 = vld [vmem:[#allocation2 + $0xd0] sm:$0xff] }
 0x151   : > { %v2112_v4 = vpop.f32.mrb[11].mxu0  ;;  %v2160_v6 = vpop.f32.mrb[11].mxu1 }
 0x152   : > { %v1026_v7 = vadd.f32 %v2110_v63, %v545_v59  ;;  %v1042_v8 = vadd.f32 %v2158_v0, %v561_v61  ;;  %v2113_v9 = vadd.f32 %v2112_v4, %v2111_v1  ;;  %v2161_v10 = vadd.f32 %v2160_v6, %v2159_v2  ;;  %v552_v63 = vld [vmem:[#allocation2 + $0x58] sm:$0xff] }
 0x153   : > { %v568_v1 = vld [vmem:[#allocation2 + $0xd8] sm:$0xff] }
 0x154   : > { %1058 = vst [vmem:[#allocation2 + $0x20] sm:$0xff] %v1026_v7  ;;  %1074 = vst [vmem:[#allocation2 + $0xa0] sm:$0xff] %v1042_v8  ;;  %v1027_v11 = vadd.f32 %v2113_v9, %v546_v3  ;;  %v1043_v12 = vadd.f32 %v2161_v10, %v562_v5 }
 0x156   : > { %1059 = vst [vmem:[#allocation2 + $0x28] sm:$0xff] %v1027_v11  ;;  %1075 = vst [vmem:[#allocation2 + $0xa8] sm:$0xff] %v1043_v12  ;;  %v2114_v13 = vpop.f32.mrb[12].mxu0  ;;  %v2162_v14 = vpop.f32.mrb[12].mxu1  ;;  %v553_v11 = vld [vmem:[#allocation2 + $0x60] sm:$0xff] }
 0x157   : > { %v2115_v16 = vpop.f32.mrb[13].mxu0  ;;  %v2163_v18 = vpop.f32.mrb[13].mxu1 }
 0x158   : > { %v2116_v19 = vadd.f32 %v2115_v16, %v2114_v13  ;;  %v2164_v20 = vadd.f32 %v2163_v18, %v2162_v14  ;;  %v2117_v21 = vpop.f32.mrb[14].mxu0  ;;  %v2165_v22 = vpop.f32.mrb[14].mxu1  ;;  %v569_v13 = vld [vmem:[#allocation2 + $0xe0] sm:$0xff] }
 0x159   : > { %v2118_v24 = vpop.f32.mrb[15].mxu0  ;;  %v2166_v26 = vpop.f32.mrb[15].mxu1 }
 0x15a   : > { %v1028_v27 = vadd.f32 %v2116_v19, %v547_v15  ;;  %v1044_v28 = vadd.f32 %v2164_v20, %v563_v17  ;;  %v2119_v29 = vadd.f32 %v2118_v24, %v2117_v21  ;;  %v2167_v30 = vadd.f32 %v2166_v26, %v2165_v22  ;;  %v554_v19 = vld [vmem:[#allocation2 + $0x68] sm:$0xff] }
 0x15b   : > { %v570_v21 = vld [vmem:[#allocation2 + $0xe8] sm:$0xff] }
 0x15c   : > { %1060 = vst [vmem:[#allocation2 + $0x30] sm:$0xff] %v1028_v27  ;;  %1076 = vst [vmem:[#allocation2 + $0xb0] sm:$0xff] %v1044_v28  ;;  %v1029_v31 = vadd.f32 %v2119_v29, %v548_v23  ;;  %v1045_v32 = vadd.f32 %v2167_v30, %v564_v25 }
 0x15e   : > { %1061 = vst [vmem:[#allocation2 + $0x38] sm:$0xff] %v1029_v31  ;;  %1077 = vst [vmem:[#allocation2 + $0xb8] sm:$0xff] %v1045_v32  ;;  %v2120_v33 = vpop.f32.mrb[16].mxu0  ;;  %v2168_v34 = vpop.f32.mrb[16].mxu1  ;;  %v555_v31 = vld [vmem:[#allocation2 + $0x70] sm:$0xff] }
 0x15f   : > { %v2121_v36 = vpop.f32.mrb[17].mxu0  ;;  %v2169_v38 = vpop.f32.mrb[17].mxu1 }
 0x160   : > { %v2122_v39 = vadd.f32 %v2121_v36, %v2120_v33  ;;  %v2170_v40 = vadd.f32 %v2169_v38, %v2168_v34  ;;  %v2123_v41 = vpop.f32.mrb[18].mxu0  ;;  %v2171_v42 = vpop.f32.mrb[18].mxu1  ;;  %v571_v33 = vld [vmem:[#allocation2 + $0xf0] sm:$0xff] }
 0x161   : > { %v2124_v44 = vpop.f32.mrb[19].mxu0  ;;  %v2172_v46 = vpop.f32.mrb[19].mxu1 }
 0x162   : > { %v1030_v47 = vadd.f32 %v2122_v39, %v549_v35  ;;  %v1046_v48 = vadd.f32 %v2170_v40, %v565_v37  ;;  %v2125_v49 = vadd.f32 %v2124_v44, %v2123_v41  ;;  %v2173_v50 = vadd.f32 %v2172_v46, %v2171_v42  ;;  %v556_v39 = vld [vmem:[#allocation2 + $0x78] sm:$0xff] }
 0x163   : > { %v572_v41 = vld [vmem:[#allocation2 + $0xf8] sm:$0xff] }
 0x164   : > { %1062 = vst [vmem:[#allocation2 + $0x40] sm:$0xff] %v1030_v47  ;;  %1078 = vst [vmem:[#allocation2 + $0xc0] sm:$0xff] %v1046_v48  ;;  %v1031_v51 = vadd.f32 %v2125_v49, %v550_v43  ;;  %v1047_v52 = vadd.f32 %v2173_v50, %v566_v45  ;;  %v2457_v49 = vld [vmem:[%s3232_s3 + $0x40] sm:$0xff] (!%p2059_p12)  }
 0x165   : > { %v2458_v50 = vld [vmem:[%s3232_s3] sm:$0xff] (!%p2059_p12)   ;;  %2192 = vmatprep.subr.bf16.mxu0 (!%p2059_p12), %v2457_v49  ;;  %2320 = vmatprep.subr.bf16.mxu1 (!%p2059_p12), %v2457_v49  ;;  %v1128_v49 = vld [vmem:[%s2764_s13 + $0x30] sm:$0xff] (!%p2059_p12) }
 0x166   : > { %1063 = vst [vmem:[#allocation2 + $0x48] sm:$0xff] %v1031_v51  ;;  %1079 = vst [vmem:[#allocation2 + $0xc8] sm:$0xff] %v1047_v52  ;;  %v2126_v53 = vpop.f32.mrb[20].mxu0  ;;  %v2174_v54 = vpop.f32.mrb[20].mxu1  ;;  %v2459_v51 = vld [vmem:[%s3232_s3 + $0x48] sm:$0xff] (!%p2059_p12)   ;;  %2193 = vmatpush3.bf16.msra.mxu0 (!%p2059_p12), %v2458_v50  ;;  %2328 = vmatpush3.bf16.msra.mxu1 (!%p2059_p12), %v2458_v50  ;;  %v1129_v50 = vld [vmem:[%s2764_s13 + $0x38] sm:$0xff] (!%p2059_p12) }
 0x167   : > { %v2127_v56 = vpop.f32.mrb[21].mxu0  ;;  %v2175_v58 = vpop.f32.mrb[21].mxu1  ;;  %v2460_v52 = vld [vmem:[%s3232_s3 + $0x8] sm:$0xff] (!%p2059_p12)   ;;  %2194 = vmatprep.subr.bf16.mxu0 (!%p2059_p12), %v2459_v51  ;;  %2321 = vmatprep.subr.bf16.mxu1 (!%p2059_p12), %v2459_v51  ;;  %v1112_v51 = vld [vmem:[#allocation2 + $0xb0] sm:$0xff] (!%p2059_p12) }
 0x168   : > { %v2128_v59 = vadd.f32 %v2127_v56, %v2126_v53  ;;  %v2176_v60 = vadd.f32 %v2175_v58, %v2174_v54  ;;  %v2129_v61 = vpop.f32.mrb[22].mxu0  ;;  %v2177_v62 = vpop.f32.mrb[22].mxu1  ;;  %v2461_v53 = vld [vmem:[%s3232_s3 + $0x50] sm:$0xff] (!%p2059_p12)   ;;  %v2464_v56 = vld [vmem:[%s3232_s3 + $0x18] sm:$0xff] (!%p2059_p12)   ;;  %v2466_v58 = vld [vmem:[%s3232_s3 + $0x20] sm:$0xff] (!%p2059_p12)  }
 0x169   : > { %v2130_v0 = vpop.f32.mrb[23].mxu0  ;;  %v2178_v2 = vpop.f32.mrb[23].mxu1  ;;  %v2462_v54 = vld [vmem:[%s3232_s3 + $0x10] sm:$0xff] (!%p2059_p12)  }
 0x16a   : > { %v1032_v3 = vadd.f32 %v2128_v59, %v551_v55  ;;  %v1048_v4 = vadd.f32 %v2176_v60, %v567_v57  ;;  %v2131_v5 = vadd.f32 %v2130_v0, %v2129_v61  ;;  %v2179_v6 = vadd.f32 %v2178_v2, %v2177_v62  ;;  %2195 = vmatpush3.bf16.msra.mxu0 (!%p2059_p12), %v2460_v52  ;;  %v2463_v55 = vld [vmem:[%s3232_s3 + $0x58] sm:$0xff] (!%p2059_p12)   ;;  %v2465_v57 = vld [vmem:[%s3232_s3 + $0x60] sm:$0xff] (!%p2059_p12)   ;;  %v2467_v59 = vld [vmem:[%s3232_s3 + $0x68] sm:$0xff] (!%p2059_p12)  }
 0x16b   : > { %2329 = vmatpush3.bf16.msra.mxu1 (!%p2059_p12), %v2460_v52  ;;  %2196 = vmatprep.subr.bf16.mxu0 (!%p2059_p12), %v2461_v53  ;;  %v1090_v60 = vld [vmem:[#allocation2] sm:$0xff] (!%p2059_p12)  ;;  %v1091_v61 = vld [vmem:[#allocation2 + $0x8] sm:$0xff] (!%p2059_p12)  ;;  %v1113_v52 = vld [vmem:[#allocation2 + $0xb8] sm:$0xff] (!%p2059_p12) }
 0x16c   : > { %1064 = vst [vmem:[#allocation2 + $0x50] sm:$0xff] %v1032_v3  ;;  %1080 = vst [vmem:[#allocation2 + $0xd0] sm:$0xff] %v1048_v4  ;;  %v1033_v7 = vadd.f32 %v2131_v5, %v552_v63  ;;  %v1049_v8 = vadd.f32 %v2179_v6, %v568_v1  ;;  %2322 = vmatprep.subr.bf16.mxu1 (!%p2059_p12), %v2461_v53  ;;  %v1122_v62 = vld [vmem:[%s2764_s13] sm:$0xff] (!%p2059_p12)  ;;  %v1123_v63 = vld [vmem:[%s2764_s13 + $0x8] sm:$0xff] (!%p2059_p12) }
 0x16d   : > { %v1170_v0 = vmul.f32 (!%p2059_p12), %v1122_v62, %v1090_v60  ;;  %v1106_v1 = vld [vmem:[#allocation2 + $0x80] sm:$0xff] (!%p2059_p12)  ;;  %v1107_v2 = vld [vmem:[#allocation2 + $0x88] sm:$0xff] (!%p2059_p12)  ;;  %v1171_v3 = vmul.f32 (!%p2059_p12), %v1123_v63, %v1091_v61  ;;  %v1144_v53 = vld [vmem:[%s2764_s13 + $0xb0] sm:$0xff] (!%p2059_p12) }
 0x16e   : > { %1065 = vst [vmem:[#allocation2 + $0x58] sm:$0xff] %v1033_v7  ;;  %1081 = vst [vmem:[#allocation2 + $0xd8] sm:$0xff] %v1049_v8  ;;  %v2132_v9 = vpop.f32.mrb[24].mxu0  ;;  %v2180_v10 = vpop.f32.mrb[24].mxu1  ;;  %2197 = vmatpush3.bf16.msra.mxu0 (!%p2059_p12), %v2462_v54  ;;  %v1138_v4 = vld [vmem:[%s2764_s13 + $0x80] sm:$0xff] (!%p2059_p12)  ;;  %v1139_v5 = vld [vmem:[%s2764_s13 + $0x88] sm:$0xff] (!%p2059_p12) }
 0x16f   : > { %v2133_v12 = vpop.f32.mrb[25].mxu0  ;;  %v2181_v14 = vpop.f32.mrb[25].mxu1  ;;  %2330 = vmatpush3.bf16.msra.mxu1 (!%p2059_p12), %v2462_v54  ;;  %2198 = vmatprep.subr.bf16.mxu0 (!%p2059_p12), %v2463_v55  ;;  %v2468_v6 = vld [vmem:[%s3232_s3 + $0x28] sm:$0xff] (!%p2059_p12)   ;;  %v1186_v7 = vmul.f32 (!%p2059_p12), %v1138_v4, %v1106_v1  ;;  %v1187_v8 = vmul.f32 (!%p2059_p12), %v1139_v5, %v1107_v2  ;;  %v1145_v54 = vld [vmem:[%s2764_s13 + $0xb8] sm:$0xff] (!%p2059_p12)  ;;  %v1146_v5 = vld [vmem:[%s2764_s13 + $0xc0] sm:$0xff] (!%p2059_p12) }
 0x170   : > { %v2134_v15 = vadd.f32 %v2133_v12, %v2132_v9  ;;  %v2182_v16 = vadd.f32 %v2181_v14, %v2180_v10  ;;  %v2135_v17 = vpop.f32.mrb[26].mxu0  ;;  %v2183_v18 = vpop.f32.mrb[26].mxu1  ;;  %2323 = vmatprep.subr.bf16.mxu1 (!%p2059_p12), %v2463_v55  ;;  %v2469_v9 = vld [vmem:[%s3232_s3 + $0x70] sm:$0xff] (!%p2059_p12)   ;;  %v1202_v10 = vpack.c.bf16 (!%p2059_p12), %v1171_v3, %v1170_v0  ;;  %v1099_v62 = vld [vmem:[#allocation2 + $0x48] sm:$0xff] (!%p2059_p12)  ;;  %v1114_v3 = vld [vmem:[#allocation2 + $0xc0] sm:$0xff] (!%p2059_p12) }
 0x171   : > { %v2136_v20 = vpop.f32.mrb[27].mxu0  ;;  %v2184_v22 = vpop.f32.mrb[27].mxu1  ;;  %v1210_v12 = vpack.c.bf16 (!%p2059_p12), %v1187_v8, %v1186_v7  ;;  %v1092_v14 = vld [vmem:[#allocation2 + $0x10] sm:$0xff] (!%p2059_p12)  ;;  %v1115_v4 = vld [vmem:[#allocation2 + $0xc8] sm:$0xff] (!%p2059_p12) }
 0x172   : > { %v1034_v23 = vadd.f32 %v2134_v15, %v553_v11  ;;  %v1050_v24 = vadd.f32 %v2182_v16, %v569_v13  ;;  %v2137_v25 = vadd.f32 %v2136_v20, %v2135_v17  ;;  %v2185_v26 = vadd.f32 %v2184_v22, %v2183_v18  ;;  %2199 = vmatpush3.bf16.msra.mxu0 (!%p2059_p12), %v2464_v56  ;;  %v2470_v11 = vld [vmem:[%s3232_s3 + $0x30] sm:$0xff] (!%p2059_p12)   ;;  %v2471_v13 = vld [vmem:[%s3232_s3 + $0x78] sm:$0xff] (!%p2059_p12)  }
 0x173   : > { %2331 = vmatpush3.bf16.msra.mxu1 (!%p2059_p12), %v2464_v56  ;;  %2200 = vmatprep.subr.bf16.mxu0 (!%p2059_p12), %v2465_v57  ;;  %v1093_v15 = vld [vmem:[#allocation2 + $0x18] sm:$0xff] (!%p2059_p12)  ;;  %v1124_v16 = vld [vmem:[%s2764_s13 + $0x10] sm:$0xff] (!%p2059_p12) }
 0x174   : > { %1066 = vst [vmem:[#allocation2 + $0x60] sm:$0xff] %v1034_v23  ;;  %1082 = vst [vmem:[#allocation2 + $0xe0] sm:$0xff] %v1050_v24  ;;  %v1035_v27 = vadd.f32 %v2137_v25, %v554_v19  ;;  %v1051_v28 = vadd.f32 %v2185_v26, %v570_v21  ;;  %2324 = vmatprep.subr.bf16.mxu1 (!%p2059_p12), %v2465_v57  ;;  %1385 = vmatprep.mubr.bf16.mxu0 (!%p2059_p12), %v1202_v10  ;;  %v1125_v17 = vld [vmem:[%s2764_s13 + $0x18] sm:$0xff] (!%p2059_p12)  ;;  %v1108_v18 = vld [vmem:[#allocation2 + $0x90] sm:$0xff] (!%p2059_p12) }
 0x175   : > { %v1109_v19 = vld [vmem:[#allocation2 + $0x98] sm:$0xff] (!%p2059_p12)  ;;  %v1140_v20 = vld [vmem:[%s2764_s13 + $0x90] sm:$0xff] (!%p2059_p12)  ;;  %1449 = vmatprep.mubr.bf16.mxu1 (!%p2059_p12), %v1210_v12  ;;  %v1172_v22 = vmul.f32 (!%p2059_p12), %v1124_v16, %v1092_v14  ;;  %v1173_v24 = vmul.f32 (!%p2059_p12), %v1125_v17, %v1093_v15  ;;  %v1192_v57 = vmul.f32 (!%p2059_p12), %v1144_v53, %v1112_v51  ;;  %v1165_v12 = vpack.c.bf16 (!%p2059_p12), %v1113_v52, %v1112_v51 }
 0x176   : > { %1067 = vst [vmem:[#allocation2 + $0x68] sm:$0xff] %v1035_v27  ;;  %1083 = vst [vmem:[#allocation2 + $0xe8] sm:$0xff] %v1051_v28  ;;  %v2138_v29 = vpop.f32.mrb[28].mxu0  ;;  %v2186_v30 = vpop.f32.mrb[28].mxu1  ;;  %2201 = vmatpush3.bf16.msra.mxu0 (!%p2059_p12), %v2466_v58  ;;  %v1141_v21 = vld [vmem:[%s2764_s13 + $0x98] sm:$0xff] (!%p2059_p12)  ;;  %v1188_v25 = vmul.f32 (!%p2059_p12), %v1140_v20, %v1108_v18  ;;  %v1154_v27 = vpack.c.bf16 (!%p2059_p12), %v1091_v61, %v1090_v60  ;;  %v1162_v28 = vpack.c.bf16 (!%p2059_p12), %v1107_v2, %v1106_v1  ;;  %v1098_v61 = vld [vmem:[#allocation2 + $0x40] sm:$0xff] (!%p2059_p12) }
 0x177   : > { %v2139_v32 = vpop.f32.mrb[29].mxu0  ;;  %v2187_v34 = vpop.f32.mrb[29].mxu1  ;;  %2332 = vmatpush3.bf16.msra.mxu1 (!%p2059_p12), %v2466_v58  ;;  %2202 = vmatprep.subr.bf16.mxu0 (!%p2059_p12), %v2467_v59  ;;  %v2472_v23 = vld [vmem:[%s3232_s3 + $0x38] sm:$0xff] (!%p2059_p12)   ;;  %v1189_v26 = vmul.f32 (!%p2059_p12), %v1141_v21, %v1109_v19  ;;  %v1193_v58 = vmul.f32 (!%p2059_p12), %v1145_v54, %v1113_v52  ;;  %v1130_v1 = vld [vmem:[%s2764_s13 + $0x40] sm:$0xff] (!%p2059_p12)  ;;  %v1131_v2 = vld [vmem:[%s2764_s13 + $0x48] sm:$0xff] (!%p2059_p12) }
 0x178   : > { %v2140_v35 = vadd.f32 %v2139_v32, %v2138_v29  ;;  %v2188_v36 = vadd.f32 %v2187_v34, %v2186_v30  ;;  %v2141_v37 = vpop.f32.mrb[30].mxu0  ;;  %v2189_v38 = vpop.f32.mrb[30].mxu1  ;;  %1089 = sbr.rel (%p2059_p12) target bundleno = 833 (0x341), region = 86  ;;  %2325 = vmatprep.subr.bf16.mxu1 (!%p2059_p12), %v2467_v59  ;;  %v1094_v29 = vld [vmem:[#allocation2 + $0x20] sm:$0xff] (!%p2059_p12)  ;;  %v1095_v30 = vld [vmem:[#allocation2 + $0x28] sm:$0xff] (!%p2059_p12)  ;;  %v1178_v7 = vmul.f32 (!%p2059_p12), %v1130_v1, %v1098_v61  ;;  %v1179_v8 = vmul.f32 (!%p2059_p12), %v1131_v2, %v1099_v62  ;;  %v1132_v17 = vld [vmem:[%s2764_s13 + $0x50] sm:$0xff] (!%p2059_p12) }
 0x179   : > { %v2142_v40 = vpop.f32.mrb[31].mxu0  ;;  %v2190_v42 = vpop.f32.mrb[31].mxu1  ;;  %v1211_v32 = vpack.c.bf16 (!%p2059_p12), %v1189_v26, %v1188_v25  ;;  %v1127_v34 = vld [vmem:[%s2764_s13 + $0x28] sm:$0xff] (!%p2059_p12)  ;;  %v1156_v59 = vpack.c.bf16 (!%p2059_p12), %v1095_v30, %v1094_v29  ;;  %v1213_v0 = vpack.c.bf16 (!%p2059_p12), %v1193_v58, %v1192_v57  ;;  %v1117_v20 = vld [vmem:[#allocation2 + $0xd8] sm:$0xff] (!%p2059_p12)  ;;  %v1148_v21 = vld [vmem:[%s2764_s13 + $0xd0] sm:$0xff] (!%p2059_p12) }
 0x17a   : > { %v1036_v43 = vadd.f32 %v2140_v35, %v555_v31  ;;  %v1052_v44 = vadd.f32 %v2188_v36, %v571_v33  ;;  %v2143_v45 = vadd.f32 %v2142_v40, %v2141_v37  ;;  %v2191_v46 = vadd.f32 %v2190_v42, %v2189_v38  ;;  %2203 = vmatpush3.bf16.msra.mxu0 (!%p2059_p12), %v2468_v6  ;;  %v1126_v33 = vld [vmem:[%s2764_s13 + $0x20] sm:$0xff] (!%p2059_p12)  ;;  %v1111_v36 = vld [vmem:[#allocation2 + $0xa8] sm:$0xff] (!%p2059_p12)  ;;  %v1152_v53 = vld [vmem:[%s2764_s13 + $0xf0] sm:$0xff] (!%p2059_p12) }
 0x17b   : > { %2333 = vmatpush3.bf16.msra.mxu1 (!%p2059_p12), %v2468_v6  ;;  %2204 = vmatprep.subr.bf16.mxu0 (!%p2059_p12), %v2469_v9  ;;  %v1203_v31 = vpack.c.bf16 (!%p2059_p12), %v1173_v24, %v1172_v22  ;;  %v1110_v35 = vld [vmem:[#allocation2 + $0xa0] sm:$0xff] (!%p2059_p12)  ;;  %v1143_v38 = vld [vmem:[%s2764_s13 + $0xa8] sm:$0xff] (!%p2059_p12)  ;;  %v1175_v40 = vmul.f32 (!%p2059_p12), %v1127_v34, %v1095_v30  ;;  %v1149_v22 = vld [vmem:[%s2764_s13 + $0xd8] sm:$0xff] (!%p2059_p12) }
 0x17c   : > { %1068 = vst [vmem:[#allocation2 + $0x70] sm:$0xff] %v1036_v43  ;;  %1084 = vst [vmem:[#allocation2 + $0xf0] sm:$0xff] %v1052_v44  ;;  %v1037_v47 = vadd.f32 %v2143_v45, %v556_v39  ;;  %v1053_v48 = vadd.f32 %v2191_v46, %v572_v41  ;;  %2326 = vmatprep.subr.bf16.mxu1 (!%p2059_p12), %v2469_v9  ;;  %v1142_v37 = vld [vmem:[%s2764_s13 + $0xa0] sm:$0xff] (!%p2059_p12)  ;;  %v1174_v39 = vmul.f32 (!%p2059_p12), %v1126_v33, %v1094_v29  ;;  %v1096_v45 = vld [vmem:[#allocation2 + $0x30] sm:$0xff] (!%p2059_p12) }
 0x17d   : > { %v1190_v41 = vmul.f32 (!%p2059_p12), %v1142_v37, %v1110_v35  ;;  %v1191_v42 = vmul.f32 (!%p2059_p12), %v1143_v38, %v1111_v36  ;;  %v1155_v43 = vpack.c.bf16 (!%p2059_p12), %v1093_v15, %v1092_v14  ;;  %v1163_v44 = vpack.c.bf16 (!%p2059_p12), %v1109_v19, %v1108_v18  ;;  %v1097_v46 = vld [vmem:[#allocation2 + $0x38] sm:$0xff] (!%p2059_p12)  ;;  %v1147_v6 = vld [vmem:[%s2764_s13 + $0xc8] sm:$0xff] (!%p2059_p12)  ;;  %v1116_v19 = vld [vmem:[#allocation2 + $0xd0] sm:$0xff] (!%p2059_p12) }
 0x17e   : > { %1069 = vst [vmem:[#allocation2 + $0x78] sm:$0xff] %v1037_v47  ;;  %1085 = vst [vmem:[#allocation2 + $0xf8] sm:$0xff] %v1053_v48  ;;  %2205 = vmatpush3.bf16.msra.mxu0 (!%p2059_p12), %v2470_v11  ;;  %v1204_v47 = vpack.c.bf16 (!%p2059_p12), %v1175_v40, %v1174_v39  ;;  %v1176_v55 = vmul.f32 (!%p2059_p12), %v1128_v49, %v1096_v45  ;;  %v1177_v56 = vmul.f32 (!%p2059_p12), %v1129_v50, %v1097_v46  ;;  %v1101_v14 = vld [vmem:[#allocation2 + $0x58] sm:$0xff] (!%p2059_p12)  ;;  %v1102_v29 = vld [vmem:[#allocation2 + $0x60] sm:$0xff] (!%p2059_p12) }
 0x17f   : > { %2334 = vmatpush3.bf16.msra.mxu1 %v2470_v11  ;;  %2206 = vmatprep.subr.bf16.mxu0 %v2471_v13  ;;  %v1212_v48 = vpack.c.bf16 %v1191_v42, %v1190_v41  ;;  %v1164_v60 = vpack.c.bf16 %v1111_v36, %v1110_v35  ;;  %v1194_v9 = vmul.f32 %v1146_v5, %v1114_v3  ;;  %v1133_v18 = vld [vmem:[%s2764_s13 + $0x58] sm:$0xff]  ;;  %v1103_v30 = vld [vmem:[#allocation2 + $0x68] sm:$0xff]  ;;  %v1134_v33 = vld [vmem:[%s2764_s13 + $0x60] sm:$0xff] }
 0x180   : > { %2327 = vmatprep.subr.bf16.mxu1 %v2471_v13  ;;  %v1205_v63 = vpack.c.bf16 %v1177_v56, %v1176_v55  ;;  %v1195_v10 = vmul.f32 %v1147_v6, %v1115_v4  ;;  %v1157_v11 = vpack.c.bf16 %v1097_v46, %v1096_v45  ;;  %v1100_v13 = vld [vmem:[#allocation2 + $0x50] sm:$0xff]  ;;  %v1206_v15 = vpack.c.bf16 %v1179_v8, %v1178_v7  ;;  %v1135_v34 = vld [vmem:[%s2764_s13 + $0x68] sm:$0xff]  ;;  %v1118_v35 = vld [vmem:[#allocation2 + $0xe0] sm:$0xff] }
 0x181   : > { %v1181_v24 = vmul.f32 %v1133_v18, %v1101_v14  ;;  %v1196_v25 = vmul.f32 %v1148_v21, %v1116_v19  ;;  %v1197_v26 = vmul.f32 %v1149_v22, %v1117_v20  ;;  %v1119_v36 = vld [vmem:[#allocation2 + $0xe8] sm:$0xff]  ;;  %v1150_v37 = vld [vmem:[%s2764_s13 + $0xe0] sm:$0xff]  ;;  %v1182_v39 = vmul.f32 %v1134_v33, %v1102_v29  ;;  %v1136_v49 = vld [vmem:[%s2764_s13 + $0x70] sm:$0xff] }
 0x182   : > { %2207 = vmatpush3.bf16.msra.mxu0 %v2472_v23  ;;  %v1214_v16 = vpack.c.bf16 %v1195_v10, %v1194_v9  ;;  %v1151_v38 = vld [vmem:[%s2764_s13 + $0xe8] sm:$0xff]  ;;  %v1183_v40 = vmul.f32 %v1135_v34, %v1103_v30  ;;  %v1198_v41 = vmul.f32 %v1150_v37, %v1118_v35  ;;  %v1137_v50 = vld [vmem:[%s2764_s13 + $0x78] sm:$0xff] }
 0x183   : > { %2335 = vmatpush3.bf16.msra.mxu1 %v2472_v23  ;;  %v1180_v23 = vmul.f32 %v1132_v17, %v1100_v13  ;;  %v1199_v42 = vmul.f32 %v1151_v38, %v1119_v36  ;;  %v1104_v45 = vld [vmem:[#allocation2 + $0x70] sm:$0xff]  ;;  %v1153_v54 = vld [vmem:[%s2764_s13 + $0xf8] sm:$0xff] }
 0x184   : > { %v1120_v51 = vld [vmem:[#allocation2 + $0xf0] sm:$0xff]  ;;  %v1184_v55 = vmul.f32 %v1136_v49, %v1104_v45 }
 0x185   : > { %1386 = vmatmul.mubr.bf16.vlgmr.msra.gmra.mrb[0].mxu0 %v1154_v27  ;;  %v1158_v27 = vpack.c.bf16 %v1099_v62, %v1098_v61  ;;  %v1105_v46 = vld [vmem:[#allocation2 + $0x78] sm:$0xff]  ;;  %v1200_v57 = vmul.f32 %v1152_v53, %v1120_v51 }
 0x186   : > { %1450 = vmatmul.mubr.bf16.vlgmr.msra.gmra.mrb[0].mxu1 %v1162_v28  ;;  %1393 = vmatprep.mubr.bf16.mxu0 %v1203_v31  ;;  %v1166_v28 = vpack.c.bf16 %v1115_v4, %v1114_v3  ;;  %v1207_v31 = vpack.c.bf16 %v1181_v24, %v1180_v23  ;;  %v1121_v52 = vld [vmem:[#allocation2 + $0xf8] sm:$0xff]  ;;  %v1185_v56 = vmul.f32 %v1137_v50, %v1105_v46  ;;  %v2917_v3 = vld [vmem:[%s3233_s4] ss:$0 sm:$0xff] }
 0x187   : > { %1457 = vmatprep.mubr.bf16.mxu1 %v1211_v32  ;;  %v1215_v32 = vpack.c.bf16 %v1197_v26, %v1196_v25  ;;  %v1201_v58 = vmul.f32 %v1153_v54, %v1121_v52 }
 0x188   : > { %v1209_v61 = vpack.c.bf16 %v1185_v56, %v1184_v55 }
 0x189   : > { %v1217_v62 = vpack.c.bf16 %v1201_v58, %v1200_v57 }
 0x18d   : > { %1394 = vmatmul.mubr.bf16.gmra.mrb[4].mxu0 %v1155_v43  ;;  %v1159_v43 = vpack.c.bf16 %v1101_v14, %v1100_v13 }
 0x18e   : > { %1458 = vmatmul.mubr.bf16.gmra.mrb[4].mxu1 %v1163_v44  ;;  %1401 = vmatprep.mubr.bf16.mxu0 %v1204_v47  ;;  %v1167_v44 = vpack.c.bf16 %v1117_v20, %v1116_v19  ;;  %v1208_v47 = vpack.c.bf16 %v1183_v40, %v1182_v39 }
 0x18f   : > { %1465 = vmatprep.mubr.bf16.mxu1 %v1212_v48  ;;  %v1216_v48 = vpack.c.bf16 %v1199_v42, %v1198_v41 }
 0x195   : > { %1402 = vmatmul.mubr.bf16.gmra.mrb[8].mxu0 %v1156_v59  ;;  %v1160_v59 = vpack.c.bf16 %v1103_v30, %v1102_v29 }
 0x196   : > { %1466 = vmatmul.mubr.bf16.gmra.mrb[8].mxu1 %v1164_v60  ;;  %1409 = vmatprep.mubr.bf16.mxu0 %v1205_v63  ;;  %v1168_v60 = vpack.c.bf16 %v1119_v36, %v1118_v35  ;;  %v1161_v63 = vpack.c.bf16 %v1105_v46, %v1104_v45 }
 0x197   : > { %1473 = vmatprep.mubr.bf16.mxu1 %v1213_v0  ;;  %v1169_v0 = vpack.c.bf16 %v1121_v52, %v1120_v51 }
 0x19d   : > { %1410 = vmatmul.mubr.bf16.gmra.mrb[12].mxu0 %v1157_v11 }
 0x19e   : > { %1474 = vmatmul.mubr.bf16.gmra.mrb[12].mxu1 %v1165_v12  ;;  %1417 = vmatprep.mubr.bf16.mxu0 %v1206_v15 }
 0x19f   : > { %1481 = vmatprep.mubr.bf16.mxu1 %v1214_v16 }
 0x1a5   : > { %1418 = vmatmul.mubr.bf16.gmra.mrb[16].mxu0 %v1158_v27 }
 0x1a6   : > { %1482 = vmatmul.mubr.bf16.gmra.mrb[16].mxu1 %v1166_v28  ;;  %1425 = vmatprep.mubr.bf16.mxu0 %v1207_v31 }
 0x1a7   : > { %1489 = vmatprep.mubr.bf16.mxu1 %v1215_v32 }
 0x1ad   : > { %1426 = vmatmul.mubr.bf16.gmra.mrb[20].mxu0 %v1159_v43 }
 0x1ae   : > { %1490 = vmatmul.mubr.bf16.gmra.mrb[20].mxu1 %v1167_v44  ;;  %1433 = vmatprep.mubr.bf16.mxu0 %v1208_v47 }
 0x1af   : > { %1497 = vmatprep.mubr.bf16.mxu1 %v1216_v48 }
 0x1b5   : > { %1434 = vmatmul.mubr.bf16.gmra.mrb[24].mxu0 %v1160_v59 }
 0x1b6   : > { %1498 = vmatmul.mubr.bf16.gmra.mrb[24].mxu1 %v1168_v60  ;;  %1441 = vmatprep.mubr.bf16.mxu0 %v1209_v61 }
 0x1b7   : > { %1505 = vmatprep.mubr.bf16.mxu1 %v1217_v62 }
 0x1bd   : > { %1442 = vmatmul.mubr.bf16.gmra.mrb[28].mxu0 %v1161_v63 }
 0x1be   : > { %1506 = vmatmul.mubr.bf16.gmra.mrb[28].mxu1 %v1169_v0 }
 0x258   : > { %v2208_v1 = vpop.f32.mrb[0].mxu0 }
 0x259   : > { %v2256_v2 = vpop.f32.mrb[0].mxu1  ;;  %v2209_v4 = vpop.f32.mrb[1].mxu0 }
 0x25a   : > { %v2257_v5 = vpop.f32.mrb[1].mxu1  ;;  %v2210_v6 = vadd.f32 %v2209_v4, %v2208_v1  ;;  %v2211_v8 = vpop.f32.mrb[2].mxu0 }
 0x25b   : > { %v2258_v7 = vadd.f32 %v2257_v5, %v2256_v2  ;;  %v2259_v9 = vpop.f32.mrb[2].mxu1  ;;  %v2212_v10 = vpop.f32.mrb[3].mxu0 }
 0x25c   : > { %v2260_v11 = vpop.f32.mrb[3].mxu1  ;;  %v1388_v12 = vadd.f32 %v2210_v6, %v2917_v3  ;;  %v2213_v14 = vadd.f32 %v2212_v10, %v2211_v8 }
 0x25d   : > { %v1452_v13 = vadd.f32 %v2258_v7, %v2917_v3  ;;  %v2261_v15 = vadd.f32 %v2260_v11, %v2259_v9 }
 0x25e   : > { %v1391_v17 = vadd.f32 %v2213_v14, %v2917_v3  ;;  %vm1514_vm0 = vcmp.gt.f32.partialorder %v1388_v12, 0.0  ;;  %v1546_v19 = vmul.f32 0.2, %v1388_v12 }
 0x25f   : > { %v1562_v16 = vmul.f32 0.2, %v1452_v13  ;;  %v1455_v18 = vadd.f32 %v2261_v15, %v2917_v3  ;;  %vm1530_vm1 = vcmp.gt.f32.partialorder %v1452_v13, 0.0 }
 0x260   : > { %v1547_v20 = vmul.f32 0.2, %v1391_v17  ;;  %v2214_v21 = vpop.f32.mrb[4].mxu0  ;;  %vm1515_vm3 = vcmp.gt.f32.partialorder %v1391_v17, 0.0  ;;  %v2925_v26 = vsel %vm1514_vm0, %v1388_v12, %v1546_v19 }
 0x261   : > { %v2262_v22 = vpop.f32.mrb[4].mxu1  ;;  %vm1531_vm2 = vcmp.gt.f32.partialorder %v1455_v18, 0.0  ;;  %v2923_v23 = vsel %vm1530_vm1, %v1452_v13, %v1562_v16  ;;  %v2215_v24 = vpop.f32.mrb[5].mxu0  ;;  %v1563_v27 = vmul.f32 0.2, %v1455_v18  ;;  %v1610_v32 = vmul.f32 %v2925_v26, %v2925_v26  ;;  %1770 = vst [vmem:[%s2769_s16] sm:$0xff] %v2925_v26 }
 0x262   : > { %v2263_v25 = vpop.f32.mrb[5].mxu1  ;;  %1786 = vst [vmem:[%s2769_s16 + $0x80] sm:$0xff] %v2923_v23  ;;  %v2216_v28 = vadd.f32 %v2215_v24, %v2214_v21  ;;  %v2217_v29 = vpop.f32.mrb[6].mxu0  ;;  %v2933_v33 = vsel %vm1515_vm3, %v1391_v17, %v1547_v20  ;;  %v1626_v42 = vmul.f32 %v2923_v23, %v2923_v23 }
 0x263   : > { %v2264_v30 = vadd.f32 %v2263_v25, %v2262_v22  ;;  %v2265_v31 = vpop.f32.mrb[6].mxu1  ;;  %v2218_v34 = vpop.f32.mrb[7].mxu0  ;;  %v2936_v36 = vsel %vm1531_vm2, %v1455_v18, %v1563_v27  ;;  %1771 = vst [vmem:[%s2769_s16 + $0x8] sm:$0xff] %v2933_v33  ;;  %1642 = vadd.xlane.f32.xlu0 %v1610_v32  ;;  %v1611_v56 = vmul.f32 %v2933_v33, %v2933_v33 }
 0x264   : > { %v2266_v35 = vpop.f32.mrb[7].mxu1  ;;  %v1396_v37 = vadd.f32 %v2216_v28, %v2917_v3  ;;  %v2219_v39 = vadd.f32 %v2218_v34, %v2217_v29  ;;  %1787 = vst [vmem:[%s2769_s16 + $0x88] sm:$0xff] %v2936_v36  ;;  %v1627_v41 = vmul.f32 %v2936_v36, %v2936_v36 }
 0x265   : > { %v1460_v38 = vadd.f32 %v2264_v30, %v2917_v3  ;;  %v2267_v40 = vadd.f32 %v2266_v35, %v2265_v31 }
 0x266   : > { %v1548_v43 = vmul.f32 0.2, %v1396_v37  ;;  %v1399_v45 = vadd.f32 %v2219_v39, %v2917_v3  ;;  %1676 = vadd.xlane.f32.xlu1 %v1627_v41  ;;  %vm1516_vm4 = vcmp.gt.f32.partialorder %v1396_v37, 0.0 }
 0x267   : > { %v1564_v44 = vmul.f32 0.2, %v1460_v38  ;;  %v1463_v46 = vadd.f32 %v2267_v40, %v2917_v3  ;;  %vm1532_vm5 = vcmp.gt.f32.partialorder %v1460_v38, 0.0  ;;  %1674 = vadd.xlane.f32.xlu0 %v1626_v42 }
 0x268   : > { %v1549_v47 = vmul.f32 0.2, %v1399_v45  ;;  %v2220_v49 = vpop.f32.mrb[8].mxu0  ;;  %v2950_v51 = vsel %vm1516_vm4, %v1396_v37, %v1548_v43  ;;  %vm1517_vm6 = vcmp.gt.f32.partialorder %v1399_v45, 0.0 }
 0x269   : > { %v1565_v48 = vmul.f32 0.2, %v1463_v46  ;;  %v2268_v50 = vpop.f32.mrb[8].mxu1  ;;  %v2952_v52 = vsel %vm1532_vm5, %v1460_v38, %v1564_v44  ;;  %v2221_v53 = vpop.f32.mrb[9].mxu0  ;;  %v1612_v55 = vmul.f32 %v2950_v51, %v2950_v51  ;;  %1772 = vst [vmem:[%s2769_s16 + $0x10] sm:$0xff] %v2950_v51  ;;  %vm1533_vm7 = vcmp.gt.f32.partialorder %v1463_v46, 0.0 }
 0x26a   : > { %v2269_v54 = vpop.f32.mrb[9].mxu1  ;;  %1788 = vst [vmem:[%s2769_s16 + $0x90] sm:$0xff] %v2952_v52  ;;  %v2222_v57 = vadd.f32 %v2221_v53, %v2220_v49  ;;  %v2223_v58 = vpop.f32.mrb[10].mxu0  ;;  %v2962_v61 = vsel %vm1517_vm6, %v1399_v45, %v1549_v47  ;;  %v1628_v1 = vmul.f32 %v2952_v52, %v2952_v52 }
 0x26b   : > { %v2270_v59 = vadd.f32 %v2269_v54, %v2268_v50  ;;  %v2271_v60 = vpop.f32.mrb[10].mxu1  ;;  %v2964_v62 = vsel %vm1533_vm7, %v1463_v46, %v1565_v48  ;;  %v2224_v63 = vpop.f32.mrb[11].mxu0  ;;  %1646 = vadd.xlane.f32.xlu1 %v1612_v55  ;;  %1773 = vst [vmem:[%s2769_s16 + $0x18] sm:$0xff] %v2962_v61  ;;  %1644 = vadd.xlane.f32.xlu0 %v1611_v56 }
 0x26c   : > { %v2272_v0 = vpop.f32.mrb[11].mxu1  ;;  %1789 = vst [vmem:[%s2769_s16 + $0x98] sm:$0xff] %v2964_v62  ;;  %v1404_v2 = vadd.f32 %v2222_v57, %v2917_v3  ;;  %v2225_v5 = vadd.f32 %v2224_v63, %v2223_v58  ;;  %v1613_v7 = vmul.f32 %v2962_v61, %v2962_v61  ;;  %v1629_v20 = vmul.f32 %v2964_v62, %v2964_v62 }
 0x26d   : > { %v1468_v4 = vadd.f32 %v2270_v59, %v2917_v3  ;;  %v2273_v6 = vadd.f32 %v2272_v0, %v2271_v60 }
 0x26e   : > { %v1550_v8 = vmul.f32 0.2, %v1404_v2  ;;  %v1407_v10 = vadd.f32 %v2225_v5, %v2917_v3  ;;  %vm1518_vm8 = vcmp.gt.f32.partialorder %v1404_v2, 0.0 }
 0x26f   : > { %v1566_v9 = vmul.f32 0.2, %v1468_v4  ;;  %v1471_v11 = vadd.f32 %v2273_v6, %v2917_v3  ;;  %1648 = vadd.xlane.f32.xlu1 %v1613_v7  ;;  %vm1534_vm9 = vcmp.gt.f32.partialorder %v1468_v4, 0.0  ;;  %1678 = vadd.xlane.f32.xlu0 %v1628_v1 }
 0x270   : > { %v1551_v12 = vmul.f32 0.2, %v1407_v10  ;;  %v2226_v14 = vpop.f32.mrb[12].mxu0  ;;  %v2978_v16 = vsel %vm1518_vm8, %v1404_v2, %v1550_v8  ;;  %vm1519_vm10 = vcmp.gt.f32.partialorder %v1407_v10, 0.0 }
 0x271   : > { %v1567_v13 = vmul.f32 0.2, %v1471_v11  ;;  %v2274_v15 = vpop.f32.mrb[12].mxu1  ;;  %v2980_v17 = vsel %vm1534_vm9, %v1468_v4, %v1566_v9  ;;  %v2227_v18 = vpop.f32.mrb[13].mxu0  ;;  %v1614_v21 = vmul.f32 %v2978_v16, %v2978_v16  ;;  %1774 = vst [vmem:[%s2769_s16 + $0x20] sm:$0xff] %v2978_v16  ;;  %vm1535_vm11 = vcmp.gt.f32.partialorder %v1471_v11, 0.0 }
 0x272   : > { %v2275_v19 = vpop.f32.mrb[13].mxu1  ;;  %1790 = vst [vmem:[%s2769_s16 + $0xa0] sm:$0xff] %v2980_v17  ;;  %v2228_v22 = vadd.f32 %v2227_v18, %v2226_v14  ;;  %v2229_v24 = vpop.f32.mrb[14].mxu0  ;;  %v2990_v28 = vsel %vm1519_vm10, %v1407_v10, %v1551_v12  ;;  %v1630_v32 = vmul.f32 %v2980_v17, %v2980_v17 }
 0x273   : > { %v2276_v25 = vadd.f32 %v2275_v19, %v2274_v15  ;;  %v2277_v27 = vpop.f32.mrb[14].mxu1  ;;  %v2992_v29 = vsel %vm1535_vm11, %v1471_v11, %v1567_v13  ;;  %v2230_v30 = vpop.f32.mrb[15].mxu0  ;;  %1680 = vadd.xlane.f32.xlu1 %v1629_v20  ;;  %1775 = vst [vmem:[%s2769_s16 + $0x28] sm:$0xff] %v2990_v28  ;;  %1650 = vadd.xlane.f32.xlu0 %v1614_v21 }
 0x274   : > { %v2278_v31 = vpop.f32.mrb[15].mxu1  ;;  %1791 = vst [vmem:[%s2769_s16 + $0xa8] sm:$0xff] %v2992_v29  ;;  %v1412_v34 = vadd.f32 %v2228_v22, %v2917_v3  ;;  %v2231_v37 = vadd.f32 %v2230_v30, %v2229_v24  ;;  %v1615_v39 = vmul.f32 %v2990_v28, %v2990_v28  ;;  %v1631_v54 = vmul.f32 %v2992_v29, %v2992_v29 }
 0x275   : > { %v1476_v35 = vadd.f32 %v2276_v25, %v2917_v3  ;;  %v2279_v38 = vadd.f32 %v2278_v31, %v2277_v27 }
 0x276   : > { %v1552_v40 = vmul.f32 0.2, %v1412_v34  ;;  %v1415_v42 = vadd.f32 %v2231_v37, %v2917_v3  ;;  %vm1520_vm12 = vcmp.gt.f32.partialorder %v1412_v34, 0.0 }
 0x277   : > { %v1568_v41 = vmul.f32 0.2, %v1476_v35  ;;  %v1479_v43 = vadd.f32 %v2279_v38, %v2917_v3  ;;  %1652 = vadd.xlane.f32.xlu1 %v1615_v39  ;;  %vm1536_vm13 = vcmp.gt.f32.partialorder %v1476_v35, 0.0  ;;  %1682 = vadd.xlane.f32.xlu0 %v1630_v32 }
 0x278   : > { %v1553_v44 = vmul.f32 0.2, %v1415_v42  ;;  %v2232_v46 = vpop.f32.mrb[16].mxu0  ;;  %v3006_v48 = vsel %vm1520_vm12, %v1412_v34, %v1552_v40  ;;  %vm1521_vm14 = vcmp.gt.f32.partialorder %v1415_v42, 0.0 }
 0x279   : > { %v1569_v45 = vmul.f32 0.2, %v1479_v43  ;;  %v2280_v47 = vpop.f32.mrb[16].mxu1  ;;  %v3008_v49 = vsel %vm1536_vm13, %v1476_v35, %v1568_v41  ;;  %v2233_v50 = vpop.f32.mrb[17].mxu0  ;;  %v1616_v55 = vmul.f32 %v3006_v48, %v3006_v48  ;;  %1776 = vst [vmem:[%s2769_s16 + $0x30] sm:$0xff] %v3006_v48  ;;  %vm1537_vm15 = vcmp.gt.f32.partialorder %v1479_v43, 0.0 }
 0x27a   : > { %v2281_v53 = vpop.f32.mrb[17].mxu1  ;;  %1792 = vst [vmem:[%s2769_s16 + $0xb0] sm:$0xff] %v3008_v49  ;;  %v2234_v56 = vadd.f32 %v2233_v50, %v2232_v46  ;;  %v2235_v57 = vpop.f32.mrb[18].mxu0  ;;  %v3018_v60 = vsel %vm1521_vm14, %v1415_v42, %v1553_v44  ;;  %v1632_v2 = vmul.f32 %v3008_v49, %v3008_v49 }
 0x27b   : > { %v2282_v58 = vadd.f32 %v2281_v53, %v2280_v47  ;;  %v2283_v59 = vpop.f32.mrb[18].mxu1  ;;  %v3020_v63 = vsel %vm1537_vm15, %v1479_v43, %v1569_v45  ;;  %v2236_v0 = vpop.f32.mrb[19].mxu0  ;;  %1684 = vadd.xlane.f32.xlu1 %v1631_v54  ;;  %1777 = vst [vmem:[%s2769_s16 + $0x38] sm:$0xff] %v3018_v60  ;;  %1654 = vadd.xlane.f32.xlu0 %v1616_v55 }
 0x27c   : > { %v2284_v1 = vpop.f32.mrb[19].mxu1  ;;  %1793 = vst [vmem:[%s2769_s16 + $0xb8] sm:$0xff] %v3020_v63  ;;  %v1420_v4 = vadd.f32 %v2234_v56, %v2917_v3  ;;  %v2237_v6 = vadd.f32 %v2236_v0, %v2235_v57  ;;  %v1617_v8 = vmul.f32 %v3018_v60, %v3018_v60  ;;  %v1633_v24 = vmul.f32 %v3020_v63, %v3020_v63 }
 0x27d   : > { %v1484_v5 = vadd.f32 %v2282_v58, %v2917_v3  ;;  %v2285_v7 = vadd.f32 %v2284_v1, %v2283_v59 }
 0x27e   : > { %v1554_v9 = vmul.f32 0.2, %v1420_v4  ;;  %v1423_v11 = vadd.f32 %v2237_v6, %v2917_v3  ;;  %vm1522_vm0 = vcmp.gt.f32.partialorder %v1420_v4, 0.0 }
 0x27f   : > { %v1570_v10 = vmul.f32 0.2, %v1484_v5  ;;  %v1487_v12 = vadd.f32 %v2285_v7, %v2917_v3  ;;  %1656 = vadd.xlane.f32.xlu1 %v1617_v8  ;;  %vm1538_vm1 = vcmp.gt.f32.partialorder %v1484_v5, 0.0  ;;  %1686 = vadd.xlane.f32.xlu0 %v1632_v2 }
 0x280   : > { %v1555_v13 = vmul.f32 0.2, %v1423_v11  ;;  %v2238_v15 = vpop.f32.mrb[20].mxu0  ;;  %v3034_v19 = vsel %vm1522_vm0, %v1420_v4, %v1554_v9  ;;  %vm1523_vm2 = vcmp.gt.f32.partialorder %v1423_v11, 0.0 }
 0x281   : > { %v1571_v14 = vmul.f32 0.2, %v1487_v12  ;;  %v2286_v18 = vpop.f32.mrb[20].mxu1  ;;  %v3036_v20 = vsel %vm1538_vm1, %v1484_v5, %v1570_v10  ;;  %v2239_v21 = vpop.f32.mrb[21].mxu0  ;;  %v1618_v25 = vmul.f32 %v3034_v19, %v3034_v19  ;;  %1778 = vst [vmem:[%s2769_s16 + $0x40] sm:$0xff] %v3034_v19  ;;  %vm1539_vm3 = vcmp.gt.f32.partialorder %v1487_v12, 0.0 }
 0x282   : > { %v2287_v22 = vpop.f32.mrb[21].mxu1  ;;  %1794 = vst [vmem:[%s2769_s16 + $0xc0] sm:$0xff] %v3036_v20  ;;  %v2240_v27 = vadd.f32 %v2239_v21, %v2238_v15  ;;  %v2241_v30 = vpop.f32.mrb[22].mxu0  ;;  %v3046_v34 = vsel %vm1523_vm2, %v1423_v11, %v1555_v13  ;;  %v1634_v39 = vmul.f32 %v3036_v20, %v3036_v20 }
 0x283   : > { %v2288_v31 = vadd.f32 %v2287_v22, %v2286_v18  ;;  %v2289_v32 = vpop.f32.mrb[22].mxu1  ;;  %v3048_v35 = vsel %vm1539_vm3, %v1487_v12, %v1571_v14  ;;  %v2242_v37 = vpop.f32.mrb[23].mxu0  ;;  %1688 = vadd.xlane.f32.xlu1 %v1633_v24  ;;  %1779 = vst [vmem:[%s2769_s16 + $0x48] sm:$0xff] %v3046_v34  ;;  %1658 = vadd.xlane.f32.xlu0 %v1618_v25 }
 0x284   : > { %v2290_v38 = vpop.f32.mrb[23].mxu1  ;;  %1795 = vst [vmem:[%s2769_s16 + $0xc8] sm:$0xff] %v3048_v35  ;;  %v1428_v40 = vadd.f32 %v2240_v27, %v2917_v3  ;;  %v2243_v42 = vadd.f32 %v2242_v37, %v2241_v30  ;;  %v1619_v44 = vmul.f32 %v3046_v34, %v3046_v34  ;;  %v1635_v1 = vmul.f32 %v3048_v35, %v3048_v35 }
 0x285   : > { %v1492_v41 = vadd.f32 %v2288_v31, %v2917_v3  ;;  %v2291_v43 = vadd.f32 %v2290_v38, %v2289_v32 }
 0x286   : > { %v1556_v45 = vmul.f32 0.2, %v1428_v40  ;;  %v1431_v47 = vadd.f32 %v2243_v42, %v2917_v3  ;;  %vm1524_vm4 = vcmp.gt.f32.partialorder %v1428_v40, 0.0 }
 0x287   : > { %v1572_v46 = vmul.f32 0.2, %v1492_v41  ;;  %v1495_v50 = vadd.f32 %v2291_v43, %v2917_v3  ;;  %1660 = vadd.xlane.f32.xlu1 %v1619_v44  ;;  %vm1540_vm5 = vcmp.gt.f32.partialorder %v1492_v41, 0.0  ;;  %1690 = vadd.xlane.f32.xlu0 %v1634_v39 }
 0x288   : > { %v1557_v53 = vmul.f32 0.2, %v1431_v47  ;;  %v2244_v55 = vpop.f32.mrb[24].mxu0  ;;  %v3062_v57 = vsel %vm1524_vm4, %v1428_v40, %v1556_v45  ;;  %vm1525_vm6 = vcmp.gt.f32.partialorder %v1431_v47, 0.0 }
 0x289   : > { %v1573_v54 = vmul.f32 0.2, %v1495_v50  ;;  %v2292_v56 = vpop.f32.mrb[24].mxu1  ;;  %v3064_v58 = vsel %vm1540_vm5, %v1492_v41, %v1572_v46  ;;  %v2245_v59 = vpop.f32.mrb[25].mxu0  ;;  %v1620_v2 = vmul.f32 %v3062_v57, %v3062_v57  ;;  %1780 = vst [vmem:[%s2769_s16 + $0x50] sm:$0xff] %v3062_v57  ;;  %vm1541_vm7 = vcmp.gt.f32.partialorder %v1495_v50, 0.0 }
 0x28a   : > { %v2293_v0 = vpop.f32.mrb[25].mxu1  ;;  %1796 = vst [vmem:[%s2769_s16 + $0xd0] sm:$0xff] %v3064_v58  ;;  %v2246_v4 = vadd.f32 %v2245_v59, %v2244_v55  ;;  %v2247_v5 = vpop.f32.mrb[26].mxu0  ;;  %v3074_v8 = vsel %vm1525_vm6, %v1431_v47, %v1557_v53  ;;  %v1636_v12 = vmul.f32 %v3064_v58, %v3064_v58 }
 0x28b   : > { %v2294_v6 = vadd.f32 %v2293_v0, %v2292_v56  ;;  %v2295_v7 = vpop.f32.mrb[26].mxu1  ;;  %v3076_v9 = vsel %vm1541_vm7, %v1495_v50, %v1573_v54  ;;  %v2248_v10 = vpop.f32.mrb[27].mxu0  ;;  %1692 = vadd.xlane.f32.xlu1 %v1635_v1  ;;  %1781 = vst [vmem:[%s2769_s16 + $0x58] sm:$0xff] %v3074_v8  ;;  %1662 = vadd.xlane.f32.xlu0 %v1620_v2 }
 0x28c   : > { %v2296_v11 = vpop.f32.mrb[27].mxu1  ;;  %1797 = vst [vmem:[%s2769_s16 + $0xd8] sm:$0xff] %v3076_v9  ;;  %v1436_v13 = vadd.f32 %v2246_v4, %v2917_v3  ;;  %v2249_v15 = vadd.f32 %v2248_v10, %v2247_v5  ;;  %v1621_v21 = vmul.f32 %v3074_v8, %v3074_v8  ;;  %v1637_v42 = vmul.f32 %v3076_v9, %v3076_v9 }
 0x28d   : > { %v1500_v14 = vadd.f32 %v2294_v6, %v2917_v3  ;;  %v2297_v18 = vadd.f32 %v2296_v11, %v2295_v7 }
 0x28e   : > { %v1558_v22 = vmul.f32 0.2, %v1436_v13  ;;  %v1439_v25 = vadd.f32 %v2249_v15, %v2917_v3  ;;  %vm1526_vm8 = vcmp.gt.f32.partialorder %v1436_v13, 0.0 }
 0x28f   : > { %v1574_v24 = vmul.f32 0.2, %v1500_v14  ;;  %v1503_v27 = vadd.f32 %v2297_v18, %v2917_v3  ;;  %1664 = vadd.xlane.f32.xlu1 %v1621_v21  ;;  %vm1542_vm9 = vcmp.gt.f32.partialorder %v1500_v14, 0.0  ;;  %1694 = vadd.xlane.f32.xlu0 %v1636_v12 }
 0x290   : > { %v1559_v30 = vmul.f32 0.2, %v1439_v25  ;;  %v2250_v32 = vpop.f32.mrb[28].mxu0  ;;  %v3090_v38 = vsel %vm1526_vm8, %v1436_v13, %v1558_v22  ;;  %vm1527_vm10 = vcmp.gt.f32.partialorder %v1439_v25, 0.0 }
 0x291   : > { %v1575_v31 = vmul.f32 0.2, %v1503_v27  ;;  %v2298_v37 = vpop.f32.mrb[28].mxu1  ;;  %v3092_v39 = vsel %vm1542_vm9, %v1500_v14, %v1574_v24  ;;  %v2251_v40 = vpop.f32.mrb[29].mxu0  ;;  %v1622_v43 = vmul.f32 %v3090_v38, %v3090_v38  ;;  %1782 = vst [vmem:[%s2769_s16 + $0x60] sm:$0xff] %v3090_v38  ;;  %vm1543_vm11 = vcmp.gt.f32.partialorder %v1503_v27, 0.0 }
 0x292   : > { %v2299_v41 = vpop.f32.mrb[29].mxu1  ;;  %1798 = vst [vmem:[%s2769_s16 + $0xe0] sm:$0xff] %v3092_v39  ;;  %v2252_v44 = vadd.f32 %v2251_v40, %v2250_v32  ;;  %v2253_v45 = vpop.f32.mrb[30].mxu0  ;;  %v3102_v50 = vsel %vm1527_vm10, %v1439_v25, %v1559_v30  ;;  %v1638_v56 = vmul.f32 %v3092_v39, %v3092_v39 }
 0x293   : > { %v2300_v46 = vadd.f32 %v2299_v41, %v2298_v37  ;;  %v2301_v47 = vpop.f32.mrb[30].mxu1  ;;  %v3104_v53 = vsel %vm1543_vm11, %v1503_v27, %v1575_v31  ;;  %v2254_v54 = vpop.f32.mrb[31].mxu0  ;;  %1696 = vadd.xlane.f32.xlu1 %v1637_v42  ;;  %1783 = vst [vmem:[%s2769_s16 + $0x68] sm:$0xff] %v3102_v50  ;;  %1666 = vadd.xlane.f32.xlu0 %v1622_v43 }
 0x294   : > { %v2302_v55 = vpop.f32.mrb[31].mxu1  ;;  %1799 = vst [vmem:[%s2769_s16 + $0xe8] sm:$0xff] %v3104_v53  ;;  %v1444_v59 = vadd.f32 %v2252_v44, %v2917_v3  ;;  %v2255_v1 = vadd.f32 %v2254_v54, %v2253_v45  ;;  %v1623_v4 = vmul.f32 %v3102_v50, %v3102_v50  ;;  %v1639_v14 = vmul.f32 %v3104_v53, %v3104_v53 }
 0x295   : > { %v1508_v0 = vadd.f32 %v2300_v46, %v2917_v3  ;;  %v2303_v2 = vadd.f32 %v2302_v55, %v2301_v47 }
 0x296   : > { %v1560_v5 = vmul.f32 0.2, %v1444_v59  ;;  %v1447_v7 = vadd.f32 %v2255_v1, %v2917_v3  ;;  %vm1528_vm12 = vcmp.gt.f32.partialorder %v1444_v59, 0.0 }
 0x297   : > { %v1576_v6 = vmul.f32 0.2, %v1508_v0  ;;  %v1511_v10 = vadd.f32 %v2303_v2, %v2917_v3  ;;  %1668 = vadd.xlane.f32.xlu1 %v1623_v4  ;;  %vm1544_vm13 = vcmp.gt.f32.partialorder %v1508_v0, 0.0  ;;  %1698 = vadd.xlane.f32.xlu0 %v1638_v56 }
 0x298   : > { %v1561_v11 = vmul.f32 0.2, %v1447_v7  ;;  %v3118_v13 = vsel %vm1528_vm12, %v1444_v59, %v1560_v5  ;;  %vm1529_vm14 = vcmp.gt.f32.partialorder %v1447_v7, 0.0 }
 0x299   : > { %v1577_v12 = vmul.f32 0.2, %v1511_v10  ;;  %v1624_v15 = vmul.f32 %v3118_v13, %v3118_v13  ;;  %1784 = vst [vmem:[%s2769_s16 + $0x70] sm:$0xff] %v3118_v13  ;;  %v3126_v3 = vsel %vm1544_vm13, %v1508_v0, %v1576_v6  ;;  %vm1545_vm15 = vcmp.gt.f32.partialorder %v1511_v10, 0.0 }
 0x29a   : > { %v3128_v18 = vsel %vm1529_vm14, %v1447_v7, %v1561_v11  ;;  %1800 = vst [vmem:[%s2769_s16 + $0xf0] sm:$0xff] %v3126_v3  ;;  %v1640_v22 = vmul.f32 %v3126_v3, %v3126_v3 }
 0x29b   : > { %v3132_v21 = vsel %vm1545_vm15, %v1511_v10, %v1577_v12  ;;  %1700 = vadd.xlane.f32.xlu1 %v1639_v14  ;;  %1785 = vst [vmem:[%s2769_s16 + $0x78] sm:$0xff] %v3128_v18  ;;  %1670 = vadd.xlane.f32.xlu0 %v1624_v15  ;;  %v1625_v24 = vmul.f32 %v3128_v18, %v3128_v18 }
 0x29c   : > { %1801 = vst [vmem:[%s2769_s16 + $0xf8] sm:$0xff] %v3132_v21  ;;  %v1641_v25 = vmul.f32 %v3132_v21, %v3132_v21 }
 0x29f   : > { %1672 = vadd.xlane.f32.xlu1 %v1625_v24  ;;  %1702 = vadd.xlane.f32.xlu0 %v1640_v22 }
 0x2a3   : > { %1704 = vadd.xlane.f32.xlu1 %v1641_v25 }
 0x2f0   : > { %v1643_v27 = vpop.xlane.xlu0 %1642 }
 0x2f1   : > { %v1706_v30 = vmax.f32 %v1643_v27, 1e-24 }
 0x2f3   : > { %2473 = vrsqrt.f32 %v1706_v30  ;;  %v1677_v31 = vpop.xlane.xlu1 %1676 }
 0x2f4   : > { %v1723_v32 = vmax.f32 %v1677_v31, 1e-24  ;;  %v1675_v37 = vpop.xlane.xlu0 %1674 }
 0x2f5   : > { %v1722_v40 = vmax.f32 %v1675_v37, 1e-24 }
 0x2f6   : > { %2475 = vrsqrt.f32 %v1723_v32 }
 0x2f7   : > { %2477 = vrsqrt.f32 %v1722_v40 }
 0x2f8   : > { %v1647_v41 = vpop.xlane.xlu1 %1646  ;;  %v1645_v43 = vpop.xlane.xlu0 %1644 }
 0x2f9   : > { %v1708_v42 = vmax.f32 %v1647_v41, 1e-24  ;;  %v1707_v44 = vmax.f32 %v1645_v43, 1e-24 }
 0x2fb   : > { %2479 = vrsqrt.f32 %v1708_v42 }
 0x2fc   : > { %2481 = vrsqrt.f32 %v1707_v44  ;;  %v1649_v45 = vpop.xlane.xlu1 %1648  ;;  %v1679_v47 = vpop.xlane.xlu0 %1678 }
 0x2fd   : > { %v1709_v46 = vmax.f32 %v1649_v45, 1e-24  ;;  %v2474_v54 = vpop.eup %2473  ;;  %v1724_v55 = vmax.f32 %v1679_v47, 1e-24 }
 0x2fe   : > { %v1802_v56 = vmul.f32 %v2474_v54, %v2925_v26 }
 0x2ff   : > { %2483 = vrsqrt.f32 %v1709_v46 }
 0x300   : > { %2485 = vrsqrt.f32 %v1724_v55  ;;  %v1681_v59 = vpop.xlane.xlu1 %1680  ;;  %v2476_v0 = vpop.eup %2475  ;;  %1834 = vst [vmem:[%s2774_s19] sm:$0xff] %v1802_v56 }
 0x301   : > { %v1725_v1 = vmax.f32 %v1681_v59, 1e-24  ;;  %v1651_v2 = vpop.xlane.xlu0 %1650  ;;  %v2478_v4 = vpop.eup %2477  ;;  %v1819_v5 = vmul.f32 %v2476_v0, %v2936_v36 }
 0x302   : > { %v1710_v6 = vmax.f32 %v1651_v2, 1e-24  ;;  %v1818_v7 = vmul.f32 %v2478_v4, %v2923_v23 }
 0x303   : > { %2487 = vrsqrt.f32 %v1725_v1  ;;  %1851 = vst [vmem:[%s2774_s19 + $0x88] sm:$0xff] %v1819_v5 }
 0x304   : > { %2489 = vrsqrt.f32 %v1710_v6  ;;  %v1653_v26 = vpop.xlane.xlu1 %1652  ;;  %1850 = vst [vmem:[%s2774_s19 + $0x80] sm:$0xff] %v1818_v7 }
 0x305   : > { %v2480_v10 = vpop.eup %2479  ;;  %v1711_v11 = vmax.f32 %v1653_v26, 1e-24  ;;  %v1683_v12 = vpop.xlane.xlu0 %1682 }
 0x306   : > { %v2482_v14 = vpop.eup %2481  ;;  %v1804_v15 = vmul.f32 %v2480_v10, %v2950_v51  ;;  %v1726_v22 = vmax.f32 %v1683_v12, 1e-24 }
 0x307   : > { %v1803_v36 = vmul.f32 %v2482_v14, %v2933_v33  ;;  %2491 = vrsqrt.f32 %v1711_v11 }
 0x308   : > { %1836 = vst [vmem:[%s2774_s19 + $0x10] sm:$0xff] %v1804_v15  ;;  %2493 = vrsqrt.f32 %v1726_v22  ;;  %v1685_v23 = vpop.xlane.xlu1 %1684 }
 0x309   : > { %v2484_v24 = vpop.eup %2483  ;;  %1835 = vst [vmem:[%s2774_s19 + $0x8] sm:$0xff] %v1803_v36  ;;  %v1727_v25 = vmax.f32 %v1685_v23, 1e-24  ;;  %v1655_v27 = vpop.xlane.xlu0 %1654 }
 0x30a   : > { %v2486_v30 = vpop.eup %2485  ;;  %v1805_v31 = vmul.f32 %v2484_v24, %v2962_v61  ;;  %v1712_v32 = vmax.f32 %v1655_v27, 1e-24 }
 0x30b   : > { %v1820_v51 = vmul.f32 %v2486_v30, %v2952_v52  ;;  %2495 = vrsqrt.f32 %v1727_v25 }
 0x30c   : > { %1837 = vst [vmem:[%s2774_s19 + $0x18] sm:$0xff] %v1805_v31  ;;  %2497 = vrsqrt.f32 %v1712_v32  ;;  %v1657_v33 = vpop.xlane.xlu1 %1656 }
 0x30d   : > { %v2488_v37 = vpop.eup %2487  ;;  %1852 = vst [vmem:[%s2774_s19 + $0x90] sm:$0xff] %v1820_v51  ;;  %v1713_v40 = vmax.f32 %v1657_v33, 1e-24  ;;  %v1687_v41 = vpop.xlane.xlu0 %1686 }
 0x30e   : > { %v2490_v42 = vpop.eup %2489  ;;  %v1821_v43 = vmul.f32 %v2488_v37, %v2964_v62  ;;  %v1728_v44 = vmax.f32 %v1687_v41, 1e-24 }
 0x30f   : > { %v1806_v61 = vmul.f32 %v2490_v42, %v2978_v16  ;;  %2499 = vrsqrt.f32 %v1713_v40 }
 0x310   : > { %1853 = vst [vmem:[%s2774_s19 + $0x98] sm:$0xff] %v1821_v43  ;;  %2501 = vrsqrt.f32 %v1728_v44  ;;  %v1689_v52 = vpop.xlane.xlu1 %1688 }
 0x311   : > { %v2492_v45 = vpop.eup %2491  ;;  %1838 = vst [vmem:[%s2774_s19 + $0x20] sm:$0xff] %v1806_v61  ;;  %v1729_v46 = vmax.f32 %v1689_v52, 1e-24  ;;  %v1659_v47 = vpop.xlane.xlu0 %1658 }
 0x312   : > { %v2494_v54 = vpop.eup %2493  ;;  %v1807_v55 = vmul.f32 %v2492_v45, %v2990_v28  ;;  %v1714_v56 = vmax.f32 %v1659_v47, 1e-24 }
 0x313   : > { %v1822_v62 = vmul.f32 %v2494_v54, %v2980_v17  ;;  %2503 = vrsqrt.f32 %v1729_v46 }
 0x314   : > { %1839 = vst [vmem:[%s2774_s19 + $0x28] sm:$0xff] %v1807_v55  ;;  %2505 = vrsqrt.f32 %v1714_v56  ;;  %v1661_v16 = vpop.xlane.xlu1 %1660 }
 0x315   : > { %v2496_v59 = vpop.eup %2495  ;;  %1854 = vst [vmem:[%s2774_s19 + $0xa0] sm:$0xff] %v1822_v62  ;;  %v1715_v0 = vmax.f32 %v1661_v16, 1e-24  ;;  %v1691_v1 = vpop.xlane.xlu0 %1690 }
 0x316   : > { %v2498_v2 = vpop.eup %2497  ;;  %v1823_v4 = vmul.f32 %v2496_v59, %v2992_v29  ;;  %v1730_v5 = vmax.f32 %v1691_v1, 1e-24 }
 0x317   : > { %v1808_v28 = vmul.f32 %v2498_v2, %v3006_v48  ;;  %2507 = vrsqrt.f32 %v1715_v0 }
 0x318   : > { %1855 = vst [vmem:[%s2774_s19 + $0xa8] sm:$0xff] %v1823_v4  ;;  %2509 = vrsqrt.f32 %v1730_v5  ;;  %v1693_v17 = vpop.xlane.xlu1 %1692 }
 0x319   : > { %v2500_v6 = vpop.eup %2499  ;;  %1840 = vst [vmem:[%s2774_s19 + $0x30] sm:$0xff] %v1808_v28  ;;  %v1731_v7 = vmax.f32 %v1693_v17, 1e-24  ;;  %v1663_v26 = vpop.xlane.xlu0 %1662 }
 0x31a   : > { %v2502_v10 = vpop.eup %2501  ;;  %v1809_v11 = vmul.f32 %v2500_v6, %v3018_v60  ;;  %v1716_v12 = vmax.f32 %v1663_v26, 1e-24 }
 0x31b   : > { %v1824_v29 = vmul.f32 %v2502_v10, %v3008_v49  ;;  %2511 = vrsqrt.f32 %v1731_v7 }
 0x31c   : > { %1841 = vst [vmem:[%s2774_s19 + $0x38] sm:$0xff] %v1809_v11  ;;  %2513 = vrsqrt.f32 %v1716_v12  ;;  %v1665_v48 = vpop.xlane.xlu1 %1664 }
 0x31d   : > { %v2504_v14 = vpop.eup %2503  ;;  %1856 = vst [vmem:[%s2774_s19 + $0xb0] sm:$0xff] %v1824_v29  ;;  %v1717_v15 = vmax.f32 %v1665_v48, 1e-24  ;;  %v1695_v22 = vpop.xlane.xlu0 %1694 }
 0x31e   : > { %v2506_v36 = vpop.eup %2505  ;;  %v1825_v23 = vmul.f32 %v2504_v14, %v3020_v63  ;;  %v1732_v24 = vmax.f32 %v1695_v22, 1e-24 }
 0x31f   : > { %v1810_v60 = vmul.f32 %v2506_v36, %v3034_v19  ;;  %2515 = vrsqrt.f32 %v1717_v15 }
 0x320   : > { %1857 = vst [vmem:[%s2774_s19 + $0xb8] sm:$0xff] %v1825_v23  ;;  %2517 = vrsqrt.f32 %v1732_v24  ;;  %v1697_v49 = vpop.xlane.xlu1 %1696 }
 0x321   : > { %v2508_v25 = vpop.eup %2507  ;;  %1842 = vst [vmem:[%s2774_s19 + $0x40] sm:$0xff] %v1810_v60  ;;  %v1733_v27 = vmax.f32 %v1697_v49, 1e-24  ;;  %v1667_v30 = vpop.xlane.xlu0 %1666 }
 0x322   : > { %v2510_v31 = vpop.eup %2509  ;;  %v1811_v32 = vmul.f32 %v2508_v25, %v3046_v34  ;;  %v1718_v51 = vmax.f32 %v1667_v30, 1e-24 }
 0x323   : > { %v1826_v63 = vmul.f32 %v2510_v31, %v3036_v20  ;;  %2519 = vrsqrt.f32 %v1733_v27 }
 0x324   : > { %1843 = vst [vmem:[%s2774_s19 + $0x48] sm:$0xff] %v1811_v32  ;;  %2521 = vrsqrt.f32 %v1718_v51  ;;  %v1669_v19 = vpop.xlane.xlu1 %1668 }
 0x325   : > { %v2512_v33 = vpop.eup %2511  ;;  %1858 = vst [vmem:[%s2774_s19 + $0xc0] sm:$0xff] %v1826_v63  ;;  %v1719_v37 = vmax.f32 %v1669_v19, 1e-24  ;;  %v1699_v40 = vpop.xlane.xlu0 %1698 }
 0x326   : > { %v2514_v41 = vpop.eup %2513  ;;  %v1827_v42 = vmul.f32 %v2512_v33, %v3048_v35  ;;  %v1734_v43 = vmax.f32 %v1699_v40, 1e-24 }
 0x327   : > { %v1812_v34 = vmul.f32 %v2514_v41, %v3062_v57  ;;  %2523 = vrsqrt.f32 %v1719_v37 }
 0x328   : > { %1859 = vst [vmem:[%s2774_s19 + $0xc8] sm:$0xff] %v1827_v42  ;;  %2525 = vrsqrt.f32 %v1734_v43  ;;  %v1701_v20 = vpop.xlane.xlu1 %1700 }
 0x329   : > { %v2516_v44 = vpop.eup %2515  ;;  %1844 = vst [vmem:[%s2774_s19 + $0x50] sm:$0xff] %v1812_v34  ;;  %v1735_v61 = vmax.f32 %v1701_v20, 1e-24  ;;  %v1671_v52 = vpop.xlane.xlu0 %1670 }
 0x32a   : > { %v2518_v45 = vpop.eup %2517  ;;  %v1813_v46 = vmul.f32 %v2516_v44, %v3074_v8  ;;  %v1720_v47 = vmax.f32 %v1671_v52, 1e-24 }
 0x32b   : > { %v1828_v35 = vmul.f32 %v2518_v45, %v3064_v58  ;;  %2527 = vrsqrt.f32 %v1735_v61 }
 0x32c   : > { %1845 = vst [vmem:[%s2774_s19 + $0x58] sm:$0xff] %v1813_v46  ;;  %2529 = vrsqrt.f32 %v1720_v47  ;;  %v1673_v57 = vpop.xlane.xlu1 %1672 }
 0x32d   : > { %v2520_v54 = vpop.eup %2519  ;;  %1860 = vst [vmem:[%s2774_s19 + $0xd0] sm:$0xff] %v1828_v35  ;;  %v1721_v55 = vmax.f32 %v1673_v57, 1e-24  ;;  %v1703_v56 = vpop.xlane.xlu0 %1702 }
 0x32e   : > { %v2522_v62 = vpop.eup %2521  ;;  %v1829_v16 = vmul.f32 %v2520_v54, %v3076_v9  ;;  %v1736_v59 = vmax.f32 %v1703_v56, 1e-24 }
 0x32f   : > { %v1814_v8 = vmul.f32 %v2522_v62, %v3090_v38  ;;  %2531 = vrsqrt.f32 %v1721_v55 }
 0x330   : > { %1861 = vst [vmem:[%s2774_s19 + $0xd8] sm:$0xff] %v1829_v16  ;;  %2533 = vrsqrt.f32 %v1736_v59  ;;  %v1705_v58 = vpop.xlane.xlu1 %1704 }
 0x331   : > { %v2524_v0 = vpop.eup %2523  ;;  %1846 = vst [vmem:[%s2774_s19 + $0x60] sm:$0xff] %v1814_v8  ;;  %v1737_v1 = vmax.f32 %v1705_v58, 1e-24 }
 0x332   : > { %v2526_v2 = vpop.eup %2525  ;;  %v1815_v4 = vmul.f32 %v2524_v0, %v3102_v50 }
 0x333   : > { %v1830_v5 = vmul.f32 %v2526_v2, %v3092_v39  ;;  %2535 = vrsqrt.f32 %v1737_v1 }
 0x334   : > { %1847 = vst [vmem:[%s2774_s19 + $0x68] sm:$0xff] %v1815_v4 }
 0x335   : > { %v2528_v9 = vpop.eup %2527  ;;  %1862 = vst [vmem:[%s2774_s19 + $0xe0] sm:$0xff] %v1830_v5 }
 0x336   : > { %v2530_v38 = vpop.eup %2529  ;;  %v1831_v28 = vmul.f32 %v2528_v9, %v3104_v53 }
 0x337   : > { %v1816_v17 = vmul.f32 %v2530_v38, %v3118_v13 }
 0x338   : > { %1863 = vst [vmem:[%s2774_s19 + $0xe8] sm:$0xff] %v1831_v28 }
 0x339   : > { %v2532_v6 = vpop.eup %2531  ;;  %1848 = vst [vmem:[%s2774_s19 + $0x70] sm:$0xff] %v1816_v17 }
 0x33a   : > { %v2534_v7 = vpop.eup %2533  ;;  %v1817_v26 = vmul.f32 %v2532_v6, %v3128_v18 }
 0x33b   : > { %v1832_v50 = vmul.f32 %v2534_v7, %v3126_v3 }
 0x33c   : > { %1849 = vst [vmem:[%s2774_s19 + $0x78] sm:$0xff] %v1817_v26 }
 0x33d   : > { %v2536_v39 = vpop.eup %2535  ;;  %1864 = vst [vmem:[%s2774_s19 + $0xf0] sm:$0xff] %v1832_v50 }
 0x33e   : > { %v1833_v10 = vmul.f32 %v2536_v39, %v3132_v21 }
 0x340   : > { %1865 = vst [vmem:[%s2774_s19 + $0xf8] sm:$0xff] %v1833_v10 }
 0x341 PF: > { %s17_s27 = sadd.s32 1, %s2591_s27   ;;  %s3236_s21 = smov %s2571_s22 }
 0x342   : > { %p14_p13 = scmp.ge.s32.totalorder %s17_s27, 6   ;;  %s3237_s22 = smov %s2680_s10 }
 0x343   : > { %s3238_s23 = smov %s2583_s25  ;;  %s3239_s24 = smov %s2587_s26 }
 0x344   : > { %s3240_s25 = smov %s3243_s28  ;;  %s3241_s26 = smov %s3247_s29 }
 0x345   :  { %16 = sbr.rel (!%p14_p13) target bundleno = 4 (0x4), region = 137 }

// kernel: ngcf_cause_forward.4
= control target key start
LH: loop header
LB: loop body
LE: loop exit
PB: predicated region body
PF: predicated region fallthrough
CT: control target
= control target key end

     0   :  { %s3428_s0 = inlined_call_operand.vmem [shape: bf16[512,512], index: 0, kind: input, shape index: {}]   ;;  %s3429_s1 = inlined_call_operand.vmem [shape: bf16[512,128], index: 1, kind: input, shape index: {}]   ;;  %s3430_s2 = inlined_call_operand.vmem [shape: f32[512,128], index: 2, kind: input, shape index: {}]   ;;  %s3431_s3 = inlined_call_operand.vmem [shape: bf16[256,128], index: 3, kind: input, shape index: {}]   ;;  %s3432_s4 = inlined_call_operand.vmem [shape: f32[1,128], index: 4, kind: input, shape index: {}]   ;;  %s3433_s5 = inlined_call_operand.hbm [shape: f32[512,128], index: 5, kind: output, shape index: {0}]   ;;  %s3434_s6 = inlined_call_operand.vmem [shape: f32[512,128], index: 6, kind: output, shape index: {1}]  }
   0x1   :  { %3439 = sst [smem:[#allocation11_spill]] %s3428_s0 }
   0x2   :  { %12 = vsyncpa [#allocation5], 0 }
   0x3   :  { %14 = vsyncpa [#allocation5 + $0x1], 0  ;;  %s2741_s21 = smov 0   ;;  %s2743_s22 = smov 0  }
   0x4   :  { %s2745_s23 = smov 0   ;;  %s2747_s24 = smov 0  }
   0x5   :  { %s2749_s25 = smov 0   ;;  %s2751_s26 = smov 0  }
   0x6   :  { %s2753_s27 = smov 0   ;;  %s2755_s28 = smov 0  }
   0x7   :  { %s2757_s29 = smov 0   ;;  %s2759_s30 = smov 0  }
   0x8 LB: > { %3440 = sst [smem:[#allocation7_spill]] %s2692_s28  ;;  %s2008_s7 = sadd.s32 4294967295, %s2700_s30   ;;  %s2700_s30 = sphi %s2759_s30, %s20_s30   ;;  %s2696_s29 = sphi %s2757_s29, %s3451_s29   ;;  %s2692_s28 = sphi %s2755_s28, %s3450_s28   ;;  %s2688_s27 = sphi %s2753_s27, %s3449_s27   ;;  %s2684_s26 = sphi %s2751_s26, %s3448_s26   ;;  %s2680_s25 = sphi %s2749_s25, %s3456_s25   ;;  %s2676_s24 = sphi %s2747_s24, %s3455_s24   ;;  %s2672_s23 = sphi %s2745_s23, %s3454_s23   ;;  %s2668_s22 = sphi %s2743_s22, %s3453_s22   ;;  %s2664_s21 = sphi %s2741_s21, %s3452_s21  }
   0x9   : > { %3441 = sst [smem:[#allocation8_spill]] %s2696_s29  ;;  %s2009_s8 = sadd.s32 4294967294, %s2700_s30  }
   0xa   : > { %s29_s9 = sadd.s32 1, %s2692_s28  ;;  %s32_s10 = sadd.s32 1, %s2696_s29 }
   0xb   : > { %p30_p0 = scmp.ge.s32.totalorder %s29_s9, 2  ;;  %s41_s11 = sadd.s32 1, %s2680_s25 }
   0xc   : > { %p48_p1 = scmp.ne.s32.totalorder %s2680_s25, %s2676_s24  ;;  %p49_p2 = scmp.eq.s32.totalorder %s2700_s30, 0 }
   0xd   : > { %s3458_s9 = smov (%p30_p0, %s29_s9), 0  ;;  %s3460_s10 = smov (!%p30_p0, %s32_s10), %s2696_s29 }
   0xe   : > { %3442 = sst [smem:[#allocation9_spill]] %s3458_s9  ;;  %s37_s12 = ssub.s32 %s2692_s28, %s3458_s9 }
   0xf   : > { %p2804_p3 = por %p49_p2, %p48_p1  ;;  %p34_p4 = scmp.ge.s32.totalorder %s3460_s10, 2 }
  0x10   : > { %s156_s14 = sadd.s32 1, %s2672_s23  ;;  %p166_p5 = scmp.ne.s32.totalorder %s2672_s23, %s2668_s22 }
  0x11   : > { %p167_p6 = scmp.eq.s32.totalorder %s2008_s7, 3  ;;  %s3462_s10 = smov (%p34_p4, %s3460_s10), 0 }
  0x12   : > { %3444 = sst [smem:[#allocation10_spill]] %s3462_s10  ;;  %p172_p8 = scmp.ne.s32.totalorder %s2668_s22, %s2664_s21 }
  0x13   : > { %p2813_p7 = por %p167_p6, %p166_p5  ;;  %s36_s16 = ssub.s32 %s2696_s29, %s3462_s10 }
  0x14   : > { %p173_p9 = scmp.eq.s32.totalorder %s2009_s8, 3  ;;  %s38_s17 = sor.u32 %s37_s12, %s36_s16 }
  0x15   : > { %p154_p10 = scmp.eq.s32.totalorder %s36_s16, 0  ;;  %p39_p11 = scmp.eq.s32.totalorder %s38_s17, 0 }
  0x16   : > { %p2821_p12 = por %p173_p9, %p172_p8  ;;  %p2011_p13 = scmp.ge.s32.totalorder %s2700_s30, 4 }
  0x17   : > { %s2826_s19 = scalar_select %p154_p10, %s2672_s23, %s156_s14  }
  0x18   : > { %s2829_s20 = scalar_select %p39_p11, %s2680_s25, %s41_s11  }
  0x19   : > { %224 = sbr.rel (%p2011_p13) target bundleno = 58 (0x3a), region = 28 }
  0x20   : > { %227 = sbr.rel (!%p2804_p3) target bundleno = 58 (0x3a), region = 32  ;;  %s229_s7 = sand.u32 (%p2804_p3), 1, %s2680_s25  }
  0x21   : > { %s2014_s8 = sshll.u32 (%p2804_p3), %s2692_s28, 1  ;;  %s2012_s12 = sshll.u32 (%p2804_p3), %s229_s7, 8 }
  0x22   : > { %s2098_s16 = sshll.u32 (%p2804_p3), %s2696_s29, 7  ;;  %s3447_s0 = sld [smem:[#allocation11_spill]] (%p2804_p3) }
  0x23   : > { %s235_s17 = sadd.s32 (%p2804_p3), %s2098_s16, %s2014_s8  ;;  %s2845_s13 = scalar_lea.vmem (%p2804_p3), [#allocation3], %s2012_s12 }
  0x24   : > { %s2016_s10 = sshll.u32 (%p2804_p3), %s235_s17, 2 }
  0x28   : > { %s2840_s11 = scalar_lea.vmem %s3447_s0, %s2016_s10 }
  0x29   : > { %v327_v0 = vld [vmem:[%s2840_s11] sm:$0xff]  ;;  %v329_v1 = vld [vmem:[%s2840_s11 + $0x10] sm:$0xff] }
  0x2a   : > { %v331_v2 = vld [vmem:[%s2840_s11 + $0x20] sm:$0xff]  ;;  %328 = vst [vmem:[%s2845_s13] sm:$0xff] %v327_v0  ;;  %330 = vst [vmem:[%s2845_s13 + $0x8] sm:$0xff] %v329_v1  ;;  %v333_v3 = vld [vmem:[%s2840_s11 + $0x30] sm:$0xff] }
  0x2b   : > { %332 = vst [vmem:[%s2845_s13 + $0x10] sm:$0xff] %v331_v2  ;;  %v335_v4 = vld [vmem:[%s2840_s11 + $0x40] sm:$0xff]  ;;  %v337_v5 = vld [vmem:[%s2840_s11 + $0x50] sm:$0xff]  ;;  %334 = vst [vmem:[%s2845_s13 + $0x18] sm:$0xff] %v333_v3 }
  0x2c   : > { %336 = vst [vmem:[%s2845_s13 + $0x20] sm:$0xff] %v335_v4  ;;  %338 = vst [vmem:[%s2845_s13 + $0x28] sm:$0xff] %v337_v5  ;;  %v339_v6 = vld [vmem:[%s2840_s11 + $0x60] sm:$0xff]  ;;  %v341_v7 = vld [vmem:[%s2840_s11 + $0x70] sm:$0xff] }
  0x2d   : > { %v343_v8 = vld [vmem:[%s2840_s11 + $0x80] sm:$0xff]  ;;  %340 = vst [vmem:[%s2845_s13 + $0x30] sm:$0xff] %v339_v6  ;;  %342 = vst [vmem:[%s2845_s13 + $0x38] sm:$0xff] %v341_v7  ;;  %v345_v9 = vld [vmem:[%s2840_s11 + $0x90] sm:$0xff] }
  0x2e   : > { %344 = vst [vmem:[%s2845_s13 + $0x40] sm:$0xff] %v343_v8  ;;  %v347_v10 = vld [vmem:[%s2840_s11 + $0xa0] sm:$0xff]  ;;  %v349_v11 = vld [vmem:[%s2840_s11 + $0xb0] sm:$0xff]  ;;  %346 = vst [vmem:[%s2845_s13 + $0x48] sm:$0xff] %v345_v9 }
  0x2f   : > { %348 = vst [vmem:[%s2845_s13 + $0x50] sm:$0xff] %v347_v10  ;;  %350 = vst [vmem:[%s2845_s13 + $0x58] sm:$0xff] %v349_v11  ;;  %v351_v12 = vld [vmem:[%s2840_s11 + $0xc0] sm:$0xff]  ;;  %v353_v13 = vld [vmem:[%s2840_s11 + $0xd0] sm:$0xff] }
  0x30   : > { %v355_v14 = vld [vmem:[%s2840_s11 + $0xe0] sm:$0xff]  ;;  %352 = vst [vmem:[%s2845_s13 + $0x60] sm:$0xff] %v351_v12  ;;  %354 = vst [vmem:[%s2845_s13 + $0x68] sm:$0xff] %v353_v13  ;;  %v357_v15 = vld [vmem:[%s2840_s11 + $0xf0] sm:$0xff] }
  0x31   : > { %356 = vst [vmem:[%s2845_s13 + $0x70] sm:$0xff] %v355_v14  ;;  %v359_v16 = vld [vmem:[%s2840_s11 + $0x100] sm:$0xff]  ;;  %v361_v17 = vld [vmem:[%s2840_s11 + $0x110] sm:$0xff]  ;;  %358 = vst [vmem:[%s2845_s13 + $0x78] sm:$0xff] %v357_v15 }
  0x32   : > { %360 = vst [vmem:[%s2845_s13 + $0x80] sm:$0xff] %v359_v16  ;;  %362 = vst [vmem:[%s2845_s13 + $0x88] sm:$0xff] %v361_v17  ;;  %v363_v18 = vld [vmem:[%s2840_s11 + $0x120] sm:$0xff]  ;;  %v365_v19 = vld [vmem:[%s2840_s11 + $0x130] sm:$0xff] }
  0x33   : > { %v367_v20 = vld [vmem:[%s2840_s11 + $0x140] sm:$0xff]  ;;  %364 = vst [vmem:[%s2845_s13 + $0x90] sm:$0xff] %v363_v18  ;;  %366 = vst [vmem:[%s2845_s13 + $0x98] sm:$0xff] %v365_v19  ;;  %v369_v21 = vld [vmem:[%s2840_s11 + $0x150] sm:$0xff] }
  0x34   : > { %368 = vst [vmem:[%s2845_s13 + $0xa0] sm:$0xff] %v367_v20  ;;  %v371_v22 = vld [vmem:[%s2840_s11 + $0x160] sm:$0xff]  ;;  %v373_v23 = vld [vmem:[%s2840_s11 + $0x170] sm:$0xff]  ;;  %370 = vst [vmem:[%s2845_s13 + $0xa8] sm:$0xff] %v369_v21 }
  0x35   : > { %372 = vst [vmem:[%s2845_s13 + $0xb0] sm:$0xff] %v371_v22  ;;  %374 = vst [vmem:[%s2845_s13 + $0xb8] sm:$0xff] %v373_v23  ;;  %v375_v24 = vld [vmem:[%s2840_s11 + $0x180] sm:$0xff]  ;;  %v377_v25 = vld [vmem:[%s2840_s11 + $0x190] sm:$0xff] }
  0x36   : > { %v379_v26 = vld [vmem:[%s2840_s11 + $0x1a0] sm:$0xff]  ;;  %376 = vst [vmem:[%s2845_s13 + $0xc0] sm:$0xff] %v375_v24  ;;  %378 = vst [vmem:[%s2845_s13 + $0xc8] sm:$0xff] %v377_v25  ;;  %v381_v27 = vld [vmem:[%s2840_s11 + $0x1b0] sm:$0xff] }
  0x37   : > { %380 = vst [vmem:[%s2845_s13 + $0xd0] sm:$0xff] %v379_v26  ;;  %v383_v28 = vld [vmem:[%s2840_s11 + $0x1c0] sm:$0xff]  ;;  %v385_v29 = vld [vmem:[%s2840_s11 + $0x1d0] sm:$0xff]  ;;  %382 = vst [vmem:[%s2845_s13 + $0xd8] sm:$0xff] %v381_v27 }
  0x38   : > { %384 = vst [vmem:[%s2845_s13 + $0xe0] sm:$0xff] %v383_v28  ;;  %386 = vst [vmem:[%s2845_s13 + $0xe8] sm:$0xff] %v385_v29  ;;  %v387_v30 = vld [vmem:[%s2840_s11 + $0x1e0] sm:$0xff]  ;;  %v389_v31 = vld [vmem:[%s2840_s11 + $0x1f0] sm:$0xff] }
  0x39   : > { %388 = vst [vmem:[%s2845_s13 + $0xf0] sm:$0xff] %v387_v30  ;;  %390 = vst [vmem:[%s2845_s13 + $0xf8] sm:$0xff] %v389_v31 }
  0x3a PF: > { %p2017_p0 = scmp.ge.s32.totalorder %s2700_s30, 1  ;;  %p404_p1 = scmp.lt.s32.totalorder %s2700_s30, 5 }
  0x3c   : > { %p405_p2 = pnand %p2017_p0, %p404_p1 }
  0x3d   : > { %s411_s9 = sand.u32 (!%p405_p2), 1, %s2676_s24   ;;  %s440_s10 = sand.u32 (!%p405_p2), 1, %s2668_s22  }
  0x3e   : > { %408 = sbr.rel (%p405_p2) target bundleno = 875 (0x36b), region = 74  ;;  %s2018_s7 = sshll.u32 (!%p405_p2), %s411_s9, 8 }
  0x3f   : > { %s2019_s8 = sshll.u32 (!%p405_p2), %s440_s10, 8  ;;  %s2020_s12 = sshll.u32 (!%p405_p2), %s2688_s27, 5 }
  0x40   : > { %p453_p3 = scmp.lt.s32.totalorder (!%p405_p2), %s2020_s12, 63  ;;  %s2925_s28 = scalar_lea.vmem (!%p405_p2), [#allocation3], %s2018_s7 }
  0x41   : > { %s2927_s24 = scalar_lea.vmem (!%p405_p2), [#allocation4], %s2019_s8  ;;  %p2024_p4 = scmp.ne.s32.totalorder (!%p405_p2), %s2684_s26, 0 }
  0x45   : > { %s3464_s12 = smov (!%p453_p3, %s2020_s12), 63  ;;  %469 = sbr.rel (%p2024_p4) target bundleno = 87 (0x57), region = 82 }
  0x46   : > { %s2021_s16 = sshll.u32 %s3464_s12, 3  ;;  %v2702_v32 = vmov (!%p2024_p4), 0.0  }
  0x47   : > { %s2918_s11 = scalar_lea.vmem %s3430_s2, %s2021_s16  ;;  %s2923_s29 = scalar_lea.vmem %s3434_s6, %s2021_s16  ;;  %470 = vst [vmem:[#allocation2] sm:$0xff] (!%p2024_p4), %v2702_v32  ;;  %471 = vst [vmem:[#allocation2 + $0x8] sm:$0xff] (!%p2024_p4), %v2702_v32 }
  0x48   : > { %472 = vst [vmem:[#allocation2 + $0x10] sm:$0xff] (!%p2024_p4), %v2702_v32  ;;  %473 = vst [vmem:[#allocation2 + $0x18] sm:$0xff] (!%p2024_p4), %v2702_v32 }
  0x49   : > { %474 = vst [vmem:[#allocation2 + $0x20] sm:$0xff] (!%p2024_p4), %v2702_v32  ;;  %475 = vst [vmem:[#allocation2 + $0x28] sm:$0xff] (!%p2024_p4), %v2702_v32 }
  0x4a   : > { %476 = vst [vmem:[#allocation2 + $0x30] sm:$0xff] (!%p2024_p4), %v2702_v32  ;;  %477 = vst [vmem:[#allocation2 + $0x38] sm:$0xff] (!%p2024_p4), %v2702_v32 }
  0x4b   : > { %478 = vst [vmem:[#allocation2 + $0x40] sm:$0xff] (!%p2024_p4), %v2702_v32  ;;  %479 = vst [vmem:[#allocation2 + $0x48] sm:$0xff] (!%p2024_p4), %v2702_v32 }
  0x4c   : > { %480 = vst [vmem:[#allocation2 + $0x50] sm:$0xff] %v2702_v32  ;;  %481 = vst [vmem:[#allocation2 + $0x58] sm:$0xff] %v2702_v32 }
  0x4d   : > { %482 = vst [vmem:[#allocation2 + $0x60] sm:$0xff] %v2702_v32  ;;  %483 = vst [vmem:[#allocation2 + $0x68] sm:$0xff] %v2702_v32 }
  0x4e   : > { %484 = vst [vmem:[#allocation2 + $0x70] sm:$0xff] %v2702_v32  ;;  %485 = vst [vmem:[#allocation2 + $0x78] sm:$0xff] %v2702_v32 }
  0x4f   : > { %486 = vst [vmem:[#allocation2 + $0x80] sm:$0xff] %v2702_v32  ;;  %487 = vst [vmem:[#allocation2 + $0x88] sm:$0xff] %v2702_v32 }
  0x50   : > { %488 = vst [vmem:[#allocation2 + $0x90] sm:$0xff] %v2702_v32  ;;  %489 = vst [vmem:[#allocation2 + $0x98] sm:$0xff] %v2702_v32 }
  0x51   : > { %490 = vst [vmem:[#allocation2 + $0xa0] sm:$0xff] %v2702_v32  ;;  %491 = vst [vmem:[#allocation2 + $0xa8] sm:$0xff] %v2702_v32 }
  0x52   : > { %492 = vst [vmem:[#allocation2 + $0xb0] sm:$0xff] %v2702_v32  ;;  %493 = vst [vmem:[#allocation2 + $0xb8] sm:$0xff] %v2702_v32 }
  0x53   : > { %494 = vst [vmem:[#allocation2 + $0xc0] sm:$0xff] %v2702_v32  ;;  %495 = vst [vmem:[#allocation2 + $0xc8] sm:$0xff] %v2702_v32 }
  0x54   : > { %496 = vst [vmem:[#allocation2 + $0xd0] sm:$0xff] %v2702_v32  ;;  %497 = vst [vmem:[#allocation2 + $0xd8] sm:$0xff] %v2702_v32 }
  0x55   : > { %498 = vst [vmem:[#allocation2 + $0xe0] sm:$0xff] %v2702_v32  ;;  %499 = vst [vmem:[#allocation2 + $0xe8] sm:$0xff] %v2702_v32 }
  0x56   : > { %500 = vst [vmem:[#allocation2 + $0xf0] sm:$0xff] %v2702_v32  ;;  %501 = vst [vmem:[#allocation2 + $0xf8] sm:$0xff] %v2702_v32 }
  0x57 PF: > { %s2025_s0 = sshll.u32 %s2684_s26, 8  ;;  %v2464_v33 = vld [vmem:[%s2925_s28 + $0x4] ss:$8 sps:$4 sm:$0xff]   ;;  %v2462_v51 = vld [vmem:[%s2925_s28] ss:$8 sps:$4 sm:$0xff]   ;;  %p2075_p5 = scmp.ne.s32.totalorder %s2684_s26, 1 }
  0x58   : > { %s503_s9 = sshra.s32 %s2025_s0, 3  ;;  %v2467_v34 = vld [vmem:[%s2925_s28 + $0x84] ss:$8 sps:$4 sm:$0xff]   ;;  %891 = vmatprep.mubr.bf16.mxu0 %v2464_v33  ;;  %v2465_v52 = vld [vmem:[%s2925_s28 + $0x80] ss:$8 sps:$4 sm:$0xff]  }
  0x59   : > { %s2026_s7 = sshll.u32 %s503_s9, 2  ;;  %955 = vmatprep.mubr.bf16.mxu1 %v2467_v34  ;;  %v2468_v53 = vld [vmem:[%s2925_s28 + $0x14] ss:$8 sps:$4 sm:$0xff]   ;;  %v2472_v55 = vld [vmem:[%s2925_s28 + $0x10] ss:$8 sps:$4 sm:$0xff]   ;;  %v539_v19 = vld [vmem:[#allocation2] sm:$0xff] }
  0x5a   : > { %s2936_s16 = scalar_lea.vmem %s3429_s1, %s2026_s7  ;;  %v2470_v54 = vld [vmem:[%s2925_s28 + $0x94] ss:$8 sps:$4 sm:$0xff]   ;;  %v2473_v56 = vld [vmem:[%s2925_s28 + $0x90] ss:$8 sps:$4 sm:$0xff]   ;;  %v2474_v57 = vld [vmem:[%s2925_s28 + $0x24] ss:$8 sps:$4 sm:$0xff]  }
  0x5b   : > { %v2446_v35 = vld [vmem:[%s2936_s16 + $0x40] sm:$0xff]   ;;  %v2448_v37 = vld [vmem:[%s2936_s16 + $0x48] sm:$0xff]   ;;  %v2450_v39 = vld [vmem:[%s2936_s16 + $0x50] sm:$0xff]  }
  0x5c   : > { %v2447_v36 = vld [vmem:[%s2936_s16] sm:$0xff]   ;;  %2100 = vmatprep.subr.bf16.mxu0 %v2446_v35  ;;  %2324 = vmatprep.subr.bf16.mxu1 %v2446_v35  ;;  %v2449_v38 = vld [vmem:[%s2936_s16 + $0x8] sm:$0xff]   ;;  %v2451_v40 = vld [vmem:[%s2936_s16 + $0x10] sm:$0xff]  }
  0x5d   : > { %2101 = vmatpush3.bf16.msra.mxu0 %v2447_v36  ;;  %2332 = vmatpush3.bf16.msra.mxu1 %v2447_v36  ;;  %v2452_v41 = vld [vmem:[%s2936_s16 + $0x58] sm:$0xff]   ;;  %v2454_v43 = vld [vmem:[%s2936_s16 + $0x60] sm:$0xff]   ;;  %v2456_v45 = vld [vmem:[%s2936_s16 + $0x68] sm:$0xff]  }
  0x5e   : > { %2102 = vmatprep.subr.bf16.mxu0 %v2448_v37  ;;  %2325 = vmatprep.subr.bf16.mxu1 %v2448_v37  ;;  %v2453_v42 = vld [vmem:[%s2936_s16 + $0x18] sm:$0xff]   ;;  %v2455_v44 = vld [vmem:[%s2936_s16 + $0x20] sm:$0xff]   ;;  %v2457_v46 = vld [vmem:[%s2936_s16 + $0x28] sm:$0xff]  }
  0x5f   : > { %v2458_v47 = vld [vmem:[%s2936_s16 + $0x70] sm:$0xff]   ;;  %v2460_v49 = vld [vmem:[%s2936_s16 + $0x78] sm:$0xff]   ;;  %v2476_v58 = vld [vmem:[%s2925_s28 + $0xa4] ss:$8 sps:$4 sm:$0xff]  }
  0x60   : > { %v2459_v48 = vld [vmem:[%s2936_s16 + $0x30] sm:$0xff]   ;;  %v2461_v50 = vld [vmem:[%s2936_s16 + $0x38] sm:$0xff]   ;;  %v2478_v59 = vld [vmem:[%s2925_s28 + $0x20] ss:$8 sps:$4 sm:$0xff]  }
  0x61   : > { %2103 = vmatpush3.bf16.msra.mxu0 %v2449_v38  ;;  %2333 = vmatpush3.bf16.msra.mxu1 %v2449_v38  ;;  %v2479_v60 = vld [vmem:[%s2925_s28 + $0xa0] ss:$8 sps:$4 sm:$0xff]   ;;  %v2480_v61 = vld [vmem:[%s2925_s28 + $0x34] ss:$8 sps:$4 sm:$0xff]   ;;  %v2484_v63 = vld [vmem:[%s2925_s28 + $0x30] ss:$8 sps:$4 sm:$0xff]  }
  0x62   : > { %2104 = vmatprep.subr.bf16.mxu0 %v2450_v39  ;;  %2326 = vmatprep.subr.bf16.mxu1 %v2450_v39  ;;  %v2482_v62 = vld [vmem:[%s2925_s28 + $0xb4] ss:$8 sps:$4 sm:$0xff]   ;;  %v2485_v0 = vld [vmem:[%s2925_s28 + $0xb0] ss:$8 sps:$4 sm:$0xff]   ;;  %v2486_v1 = vld [vmem:[%s2925_s28 + $0x44] ss:$8 sps:$4 sm:$0xff]  }
  0x63   : > { %v2488_v2 = vld [vmem:[%s2925_s28 + $0xc4] ss:$8 sps:$4 sm:$0xff]   ;;  %v2490_v3 = vld [vmem:[%s2925_s28 + $0x40] ss:$8 sps:$4 sm:$0xff]   ;;  %v2492_v5 = vld [vmem:[%s2925_s28 + $0x54] ss:$8 sps:$4 sm:$0xff]  }
  0x64   : > { %v2491_v4 = vld [vmem:[%s2925_s28 + $0xc0] ss:$8 sps:$4 sm:$0xff]   ;;  %v2494_v6 = vld [vmem:[%s2925_s28 + $0xd4] ss:$8 sps:$4 sm:$0xff]   ;;  %v2496_v7 = vld [vmem:[%s2925_s28 + $0x50] ss:$8 sps:$4 sm:$0xff]  }
  0x65   : > { %2105 = vmatpush3.bf16.msra.mxu0 %v2451_v40  ;;  %2334 = vmatpush3.bf16.msra.mxu1 %v2451_v40  ;;  %v2497_v8 = vld [vmem:[%s2925_s28 + $0xd0] ss:$8 sps:$4 sm:$0xff]   ;;  %v2498_v9 = vld [vmem:[%s2925_s28 + $0x64] ss:$8 sps:$4 sm:$0xff]   ;;  %v2502_v11 = vld [vmem:[%s2925_s28 + $0x60] ss:$8 sps:$4 sm:$0xff]  }
  0x66   : > { %2106 = vmatprep.subr.bf16.mxu0 %v2452_v41  ;;  %2327 = vmatprep.subr.bf16.mxu1 %v2452_v41  ;;  %v2500_v10 = vld [vmem:[%s2925_s28 + $0xe4] ss:$8 sps:$4 sm:$0xff]   ;;  %v2503_v12 = vld [vmem:[%s2925_s28 + $0xe0] ss:$8 sps:$4 sm:$0xff]   ;;  %v2504_v13 = vld [vmem:[%s2925_s28 + $0x74] ss:$8 sps:$4 sm:$0xff]  }
  0x67   : > { %v2506_v14 = vld [vmem:[%s2925_s28 + $0xf4] ss:$8 sps:$4 sm:$0xff]   ;;  %v2508_v15 = vld [vmem:[%s2925_s28 + $0x70] ss:$8 sps:$4 sm:$0xff]   ;;  %v555_v21 = vld [vmem:[#allocation2 + $0x80] sm:$0xff] }
  0x68   : > { %v2509_v16 = vld [vmem:[%s2925_s28 + $0xf0] ss:$8 sps:$4 sm:$0xff]   ;;  %v540_v27 = vld [vmem:[#allocation2 + $0x8] sm:$0xff] }
  0x69   : > { %2107 = vmatpush3.bf16.msra.mxu0 %v2453_v42  ;;  %2335 = vmatpush3.bf16.msra.mxu1 %v2453_v42  ;;  %v556_v29 = vld [vmem:[#allocation2 + $0x88] sm:$0xff]  ;;  %v541_v39 = vld [vmem:[#allocation2 + $0x10] sm:$0xff] }
  0x6a   : > { %2108 = vmatprep.subr.bf16.mxu0 %v2454_v43  ;;  %2328 = vmatprep.subr.bf16.mxu1 %v2454_v43  ;;  %v557_v41 = vld [vmem:[#allocation2 + $0x90] sm:$0xff] }
  0x6d   : > { %2109 = vmatpush3.bf16.msra.mxu0 %v2455_v44  ;;  %2336 = vmatpush3.bf16.msra.mxu1 %v2455_v44 }
  0x6e   : > { %2110 = vmatprep.subr.bf16.mxu0 %v2456_v45  ;;  %2329 = vmatprep.subr.bf16.mxu1 %v2456_v45 }
  0x71   : > { %2111 = vmatpush3.bf16.msra.mxu0 %v2457_v46  ;;  %2337 = vmatpush3.bf16.msra.mxu1 %v2457_v46 }
  0x72   : > { %2112 = vmatprep.subr.bf16.mxu0 %v2458_v47  ;;  %2330 = vmatprep.subr.bf16.mxu1 %v2458_v47  ;;  %v542_v47 = vld [vmem:[#allocation2 + $0x18] sm:$0xff] }
  0x75   : > { %2113 = vmatpush3.bf16.msra.mxu0 %v2459_v48  ;;  %2338 = vmatpush3.bf16.msra.mxu1 %v2459_v48 }
  0x76   : > { %2114 = vmatprep.subr.bf16.mxu0 %v2460_v49  ;;  %2331 = vmatprep.subr.bf16.mxu1 %v2460_v49  ;;  %v558_v49 = vld [vmem:[#allocation2 + $0x98] sm:$0xff] }
  0x79   : > { %2115 = vmatpush3.bf16.msra.mxu0 %v2461_v50  ;;  %2339 = vmatpush3.bf16.msra.mxu1 %v2461_v50 }
  0x7c   : > { %892 = vmatmul.mubr.bf16.vlgmr.msra.gmra.mrb[0].mxu0 %v2462_v51  ;;  %956 = vmatmul.mubr.bf16.vlgmr.msra.gmra.mrb[0].mxu1 %v2465_v52 }
  0x7d   : > { %899 = vmatprep.mubr.bf16.mxu0 %v2468_v53  ;;  %963 = vmatprep.mubr.bf16.mxu1 %v2470_v54 }
  0x84   : > { %900 = vmatmul.mubr.bf16.gmra.mrb[4].mxu0 %v2472_v55  ;;  %964 = vmatmul.mubr.bf16.gmra.mrb[4].mxu1 %v2473_v56 }
  0x85   : > { %907 = vmatprep.mubr.bf16.mxu0 %v2474_v57  ;;  %971 = vmatprep.mubr.bf16.mxu1 %v2476_v58 }
  0x8c   : > { %908 = vmatmul.mubr.bf16.gmra.mrb[8].mxu0 %v2478_v59  ;;  %972 = vmatmul.mubr.bf16.gmra.mrb[8].mxu1 %v2479_v60  ;;  %v543_v59 = vld [vmem:[#allocation2 + $0x20] sm:$0xff] }
  0x8d   : > { %915 = vmatprep.mubr.bf16.mxu0 %v2480_v61  ;;  %979 = vmatprep.mubr.bf16.mxu1 %v2482_v62  ;;  %v559_v61 = vld [vmem:[#allocation2 + $0xa0] sm:$0xff] }
  0x94   : > { %916 = vmatmul.mubr.bf16.gmra.mrb[12].mxu0 %v2484_v63  ;;  %980 = vmatmul.mubr.bf16.gmra.mrb[12].mxu1 %v2485_v0 }
  0x95   : > { %923 = vmatprep.mubr.bf16.mxu0 %v2486_v1  ;;  %987 = vmatprep.mubr.bf16.mxu1 %v2488_v2 }
  0x9c   : > { %924 = vmatmul.mubr.bf16.gmra.mrb[16].mxu0 %v2490_v3  ;;  %988 = vmatmul.mubr.bf16.gmra.mrb[16].mxu1 %v2491_v4  ;;  %v544_v3 = vld [vmem:[#allocation2 + $0x28] sm:$0xff] }
  0x9d   : > { %931 = vmatprep.mubr.bf16.mxu0 %v2492_v5  ;;  %995 = vmatprep.mubr.bf16.mxu1 %v2494_v6  ;;  %v560_v5 = vld [vmem:[#allocation2 + $0xa8] sm:$0xff] }
  0xa4   : > { %932 = vmatmul.mubr.bf16.gmra.mrb[20].mxu0 %v2496_v7  ;;  %996 = vmatmul.mubr.bf16.gmra.mrb[20].mxu1 %v2497_v8 }
  0xa5   : > { %939 = vmatprep.mubr.bf16.mxu0 %v2498_v9  ;;  %1003 = vmatprep.mubr.bf16.mxu1 %v2500_v10 }
  0xac   : > { %940 = vmatmul.mubr.bf16.gmra.mrb[24].mxu0 %v2502_v11  ;;  %1004 = vmatmul.mubr.bf16.gmra.mrb[24].mxu1 %v2503_v12 }
  0xad   : > { %947 = vmatprep.mubr.bf16.mxu0 %v2504_v13  ;;  %1011 = vmatprep.mubr.bf16.mxu1 %v2506_v14 }
  0xb4   : > { %948 = vmatmul.mubr.bf16.gmra.mrb[28].mxu0 %v2508_v15  ;;  %1012 = vmatmul.mubr.bf16.gmra.mrb[28].mxu1 %v2509_v16  ;;  %v545_v15 = vld [vmem:[#allocation2 + $0x30] sm:$0xff] }
 0x14f   : > { %v2116_v17 = vpop.f32.mrb[0].mxu0  ;;  %v2164_v18 = vpop.f32.mrb[0].mxu1 }
 0x150   : > { %v2117_v20 = vpop.f32.mrb[1].mxu0  ;;  %v2165_v22 = vpop.f32.mrb[1].mxu1 }
 0x151   : > { %v2118_v23 = vadd.f32 %v2117_v20, %v2116_v17  ;;  %v2166_v24 = vadd.f32 %v2165_v22, %v2164_v18  ;;  %v2119_v25 = vpop.f32.mrb[2].mxu0  ;;  %v2167_v26 = vpop.f32.mrb[2].mxu1  ;;  %v561_v17 = vld [vmem:[#allocation2 + $0xb0] sm:$0xff] }
 0x152   : > { %v2120_v28 = vpop.f32.mrb[3].mxu0  ;;  %v2168_v30 = vpop.f32.mrb[3].mxu1 }
 0x153   : > { %v1020_v31 = vadd.f32 %v2118_v23, %v539_v19  ;;  %v1036_v32 = vadd.f32 %v2166_v24, %v555_v21  ;;  %v2121_v33 = vadd.f32 %v2120_v28, %v2119_v25  ;;  %v2169_v34 = vadd.f32 %v2168_v30, %v2167_v26  ;;  %v546_v23 = vld [vmem:[#allocation2 + $0x38] sm:$0xff] }
 0x154   : > { %v562_v25 = vld [vmem:[#allocation2 + $0xb8] sm:$0xff] }
 0x155   : > { %1052 = vst [vmem:[#allocation2] sm:$0xff] %v1020_v31  ;;  %1068 = vst [vmem:[#allocation2 + $0x80] sm:$0xff] %v1036_v32  ;;  %v1021_v35 = vadd.f32 %v2121_v33, %v540_v27  ;;  %v1037_v36 = vadd.f32 %v2169_v34, %v556_v29 }
 0x157   : > { %1053 = vst [vmem:[#allocation2 + $0x8] sm:$0xff] %v1021_v35  ;;  %1069 = vst [vmem:[#allocation2 + $0x88] sm:$0xff] %v1037_v36  ;;  %v2122_v37 = vpop.f32.mrb[4].mxu0  ;;  %v2170_v38 = vpop.f32.mrb[4].mxu1  ;;  %v547_v35 = vld [vmem:[#allocation2 + $0x40] sm:$0xff] }
 0x158   : > { %v2123_v40 = vpop.f32.mrb[5].mxu0  ;;  %v2171_v42 = vpop.f32.mrb[5].mxu1 }
 0x159   : > { %v2124_v43 = vadd.f32 %v2123_v40, %v2122_v37  ;;  %v2172_v44 = vadd.f32 %v2171_v42, %v2170_v38  ;;  %v2125_v45 = vpop.f32.mrb[6].mxu0  ;;  %v2173_v46 = vpop.f32.mrb[6].mxu1  ;;  %v563_v37 = vld [vmem:[#allocation2 + $0xc0] sm:$0xff] }
 0x15a   : > { %v2126_v48 = vpop.f32.mrb[7].mxu0  ;;  %v2174_v50 = vpop.f32.mrb[7].mxu1 }
 0x15b   : > { %v1022_v51 = vadd.f32 %v2124_v43, %v541_v39  ;;  %v1038_v52 = vadd.f32 %v2172_v44, %v557_v41  ;;  %v2127_v53 = vadd.f32 %v2126_v48, %v2125_v45  ;;  %v2175_v54 = vadd.f32 %v2174_v50, %v2173_v46  ;;  %v548_v43 = vld [vmem:[#allocation2 + $0x48] sm:$0xff] }
 0x15c   : > { %v564_v45 = vld [vmem:[#allocation2 + $0xc8] sm:$0xff] }
 0x15d   : > { %1054 = vst [vmem:[#allocation2 + $0x10] sm:$0xff] %v1022_v51  ;;  %1070 = vst [vmem:[#allocation2 + $0x90] sm:$0xff] %v1038_v52  ;;  %v1023_v55 = vadd.f32 %v2127_v53, %v542_v47  ;;  %v1039_v56 = vadd.f32 %v2175_v54, %v558_v49 }
 0x15f   : > { %1055 = vst [vmem:[#allocation2 + $0x18] sm:$0xff] %v1023_v55  ;;  %1071 = vst [vmem:[#allocation2 + $0x98] sm:$0xff] %v1039_v56  ;;  %v2128_v57 = vpop.f32.mrb[8].mxu0  ;;  %v2176_v58 = vpop.f32.mrb[8].mxu1  ;;  %v549_v55 = vld [vmem:[#allocation2 + $0x50] sm:$0xff] }
 0x160   : > { %v2129_v60 = vpop.f32.mrb[9].mxu0  ;;  %v2177_v62 = vpop.f32.mrb[9].mxu1 }
 0x161   : > { %v2130_v63 = vadd.f32 %v2129_v60, %v2128_v57  ;;  %v2178_v0 = vadd.f32 %v2177_v62, %v2176_v58  ;;  %v2131_v1 = vpop.f32.mrb[10].mxu0  ;;  %v2179_v2 = vpop.f32.mrb[10].mxu1  ;;  %v565_v57 = vld [vmem:[#allocation2 + $0xd0] sm:$0xff] }
 0x162   : > { %v2132_v4 = vpop.f32.mrb[11].mxu0  ;;  %v2180_v6 = vpop.f32.mrb[11].mxu1 }
 0x163   : > { %v1024_v7 = vadd.f32 %v2130_v63, %v543_v59  ;;  %v1040_v8 = vadd.f32 %v2178_v0, %v559_v61  ;;  %v2133_v9 = vadd.f32 %v2132_v4, %v2131_v1  ;;  %v2181_v10 = vadd.f32 %v2180_v6, %v2179_v2  ;;  %v550_v63 = vld [vmem:[#allocation2 + $0x58] sm:$0xff] }
 0x164   : > { %v566_v1 = vld [vmem:[#allocation2 + $0xd8] sm:$0xff] }
 0x165   : > { %1056 = vst [vmem:[#allocation2 + $0x20] sm:$0xff] %v1024_v7  ;;  %1072 = vst [vmem:[#allocation2 + $0xa0] sm:$0xff] %v1040_v8  ;;  %v1025_v11 = vadd.f32 %v2133_v9, %v544_v3  ;;  %v1041_v12 = vadd.f32 %v2181_v10, %v560_v5 }
 0x167   : > { %1057 = vst [vmem:[#allocation2 + $0x28] sm:$0xff] %v1025_v11  ;;  %1073 = vst [vmem:[#allocation2 + $0xa8] sm:$0xff] %v1041_v12  ;;  %v2134_v13 = vpop.f32.mrb[12].mxu0  ;;  %v2182_v14 = vpop.f32.mrb[12].mxu1  ;;  %v551_v11 = vld [vmem:[#allocation2 + $0x60] sm:$0xff] }
 0x168   : > { %v2135_v16 = vpop.f32.mrb[13].mxu0  ;;  %v2183_v18 = vpop.f32.mrb[13].mxu1 }
 0x169   : > { %v2136_v19 = vadd.f32 %v2135_v16, %v2134_v13  ;;  %v2184_v20 = vadd.f32 %v2183_v18, %v2182_v14  ;;  %v2137_v21 = vpop.f32.mrb[14].mxu0  ;;  %v2185_v22 = vpop.f32.mrb[14].mxu1  ;;  %v567_v13 = vld [vmem:[#allocation2 + $0xe0] sm:$0xff] }
 0x16a   : > { %v2138_v24 = vpop.f32.mrb[15].mxu0  ;;  %v2186_v26 = vpop.f32.mrb[15].mxu1 }
 0x16b   : > { %v1026_v27 = vadd.f32 %v2136_v19, %v545_v15  ;;  %v1042_v28 = vadd.f32 %v2184_v20, %v561_v17  ;;  %v2139_v29 = vadd.f32 %v2138_v24, %v2137_v21  ;;  %v2187_v30 = vadd.f32 %v2186_v26, %v2185_v22  ;;  %v552_v19 = vld [vmem:[#allocation2 + $0x68] sm:$0xff] }
 0x16c   : > { %v568_v21 = vld [vmem:[#allocation2 + $0xe8] sm:$0xff] }
 0x16d   : > { %1058 = vst [vmem:[#allocation2 + $0x30] sm:$0xff] %v1026_v27  ;;  %1074 = vst [vmem:[#allocation2 + $0xb0] sm:$0xff] %v1042_v28  ;;  %v1027_v31 = vadd.f32 %v2139_v29, %v546_v23  ;;  %v1043_v32 = vadd.f32 %v2187_v30, %v562_v25 }
 0x16f   : > { %1059 = vst [vmem:[#allocation2 + $0x38] sm:$0xff] %v1027_v31  ;;  %1075 = vst [vmem:[#allocation2 + $0xb8] sm:$0xff] %v1043_v32  ;;  %v2140_v33 = vpop.f32.mrb[16].mxu0  ;;  %v2188_v34 = vpop.f32.mrb[16].mxu1  ;;  %v553_v31 = vld [vmem:[#allocation2 + $0x70] sm:$0xff] }
 0x170   : > { %v2141_v36 = vpop.f32.mrb[17].mxu0  ;;  %v2189_v38 = vpop.f32.mrb[17].mxu1 }
 0x171   : > { %v2142_v39 = vadd.f32 %v2141_v36, %v2140_v33  ;;  %v2190_v40 = vadd.f32 %v2189_v38, %v2188_v34  ;;  %v2143_v41 = vpop.f32.mrb[18].mxu0  ;;  %v2191_v42 = vpop.f32.mrb[18].mxu1  ;;  %v569_v33 = vld [vmem:[#allocation2 + $0xf0] sm:$0xff] }
 0x172   : > { %v2144_v44 = vpop.f32.mrb[19].mxu0  ;;  %v2192_v46 = vpop.f32.mrb[19].mxu1 }
 0x173   : > { %v1028_v47 = vadd.f32 %v2142_v39, %v547_v35  ;;  %v1044_v48 = vadd.f32 %v2190_v40, %v563_v37  ;;  %v2145_v49 = vadd.f32 %v2144_v44, %v2143_v41  ;;  %v2193_v50 = vadd.f32 %v2192_v46, %v2191_v42  ;;  %v554_v39 = vld [vmem:[#allocation2 + $0x78] sm:$0xff] }
 0x174   : > { %v570_v41 = vld [vmem:[#allocation2 + $0xf8] sm:$0xff] }
 0x175   : > { %1060 = vst [vmem:[#allocation2 + $0x40] sm:$0xff] %v1028_v47  ;;  %1076 = vst [vmem:[#allocation2 + $0xc0] sm:$0xff] %v1044_v48  ;;  %v1029_v51 = vadd.f32 %v2145_v49, %v548_v43  ;;  %v1045_v52 = vadd.f32 %v2193_v50, %v564_v45  ;;  %v2510_v49 = vld [vmem:[%s3431_s3 + $0x40] sm:$0xff] (!%p2075_p5)  }
 0x176   : > { %v2511_v50 = vld [vmem:[%s3431_s3] sm:$0xff] (!%p2075_p5)   ;;  %2212 = vmatprep.subr.bf16.mxu0 (!%p2075_p5), %v2510_v49  ;;  %2340 = vmatprep.subr.bf16.mxu1 (!%p2075_p5), %v2510_v49  ;;  %v1126_v49 = vld [vmem:[%s2918_s11 + $0x30] sm:$0xff] (!%p2075_p5) }
 0x177   : > { %1061 = vst [vmem:[#allocation2 + $0x48] sm:$0xff] %v1029_v51  ;;  %1077 = vst [vmem:[#allocation2 + $0xc8] sm:$0xff] %v1045_v52  ;;  %v2146_v53 = vpop.f32.mrb[20].mxu0  ;;  %v2194_v54 = vpop.f32.mrb[20].mxu1  ;;  %v2512_v51 = vld [vmem:[%s3431_s3 + $0x48] sm:$0xff] (!%p2075_p5)   ;;  %2213 = vmatpush3.bf16.msra.mxu0 (!%p2075_p5), %v2511_v50  ;;  %2348 = vmatpush3.bf16.msra.mxu1 (!%p2075_p5), %v2511_v50  ;;  %v1127_v50 = vld [vmem:[%s2918_s11 + $0x38] sm:$0xff] (!%p2075_p5) }
 0x178   : > { %v2147_v56 = vpop.f32.mrb[21].mxu0  ;;  %v2195_v58 = vpop.f32.mrb[21].mxu1  ;;  %v2513_v52 = vld [vmem:[%s3431_s3 + $0x8] sm:$0xff] (!%p2075_p5)   ;;  %2214 = vmatprep.subr.bf16.mxu0 (!%p2075_p5), %v2512_v51  ;;  %2341 = vmatprep.subr.bf16.mxu1 (!%p2075_p5), %v2512_v51  ;;  %v1110_v51 = vld [vmem:[#allocation2 + $0xb0] sm:$0xff] (!%p2075_p5) }
 0x179   : > { %v2148_v59 = vadd.f32 %v2147_v56, %v2146_v53  ;;  %v2196_v60 = vadd.f32 %v2195_v58, %v2194_v54  ;;  %v2149_v61 = vpop.f32.mrb[22].mxu0  ;;  %v2197_v62 = vpop.f32.mrb[22].mxu1  ;;  %v2514_v53 = vld [vmem:[%s3431_s3 + $0x50] sm:$0xff] (!%p2075_p5)   ;;  %v2517_v56 = vld [vmem:[%s3431_s3 + $0x18] sm:$0xff] (!%p2075_p5)   ;;  %v2519_v58 = vld [vmem:[%s3431_s3 + $0x20] sm:$0xff] (!%p2075_p5)  }
 0x17a   : > { %v2150_v0 = vpop.f32.mrb[23].mxu0  ;;  %v2198_v2 = vpop.f32.mrb[23].mxu1  ;;  %v2515_v54 = vld [vmem:[%s3431_s3 + $0x10] sm:$0xff] (!%p2075_p5)  }
 0x17b   : > { %v1030_v3 = vadd.f32 %v2148_v59, %v549_v55  ;;  %v1046_v4 = vadd.f32 %v2196_v60, %v565_v57  ;;  %v2151_v5 = vadd.f32 %v2150_v0, %v2149_v61  ;;  %v2199_v6 = vadd.f32 %v2198_v2, %v2197_v62  ;;  %2215 = vmatpush3.bf16.msra.mxu0 (!%p2075_p5), %v2513_v52  ;;  %v2516_v55 = vld [vmem:[%s3431_s3 + $0x58] sm:$0xff] (!%p2075_p5)   ;;  %v2518_v57 = vld [vmem:[%s3431_s3 + $0x60] sm:$0xff] (!%p2075_p5)   ;;  %v2520_v59 = vld [vmem:[%s3431_s3 + $0x68] sm:$0xff] (!%p2075_p5)  }
 0x17c   : > { %2349 = vmatpush3.bf16.msra.mxu1 (!%p2075_p5), %v2513_v52  ;;  %2216 = vmatprep.subr.bf16.mxu0 (!%p2075_p5), %v2514_v53  ;;  %v1088_v60 = vld [vmem:[#allocation2] sm:$0xff] (!%p2075_p5)  ;;  %v1089_v61 = vld [vmem:[#allocation2 + $0x8] sm:$0xff] (!%p2075_p5)  ;;  %v1111_v52 = vld [vmem:[#allocation2 + $0xb8] sm:$0xff] (!%p2075_p5) }
 0x17d   : > { %1062 = vst [vmem:[#allocation2 + $0x50] sm:$0xff] %v1030_v3  ;;  %1078 = vst [vmem:[#allocation2 + $0xd0] sm:$0xff] %v1046_v4  ;;  %v1031_v7 = vadd.f32 %v2151_v5, %v550_v63  ;;  %v1047_v8 = vadd.f32 %v2199_v6, %v566_v1  ;;  %2342 = vmatprep.subr.bf16.mxu1 (!%p2075_p5), %v2514_v53  ;;  %v1120_v62 = vld [vmem:[%s2918_s11] sm:$0xff] (!%p2075_p5)  ;;  %v1121_v63 = vld [vmem:[%s2918_s11 + $0x8] sm:$0xff] (!%p2075_p5) }
 0x17e   : > { %v1168_v0 = vmul.f32 (!%p2075_p5), %v1120_v62, %v1088_v60  ;;  %v1104_v1 = vld [vmem:[#allocation2 + $0x80] sm:$0xff] (!%p2075_p5)  ;;  %v1105_v2 = vld [vmem:[#allocation2 + $0x88] sm:$0xff] (!%p2075_p5)  ;;  %v1169_v3 = vmul.f32 (!%p2075_p5), %v1121_v63, %v1089_v61  ;;  %v1142_v53 = vld [vmem:[%s2918_s11 + $0xb0] sm:$0xff] (!%p2075_p5) }
 0x17f   : > { %1063 = vst [vmem:[#allocation2 + $0x58] sm:$0xff] %v1031_v7  ;;  %1079 = vst [vmem:[#allocation2 + $0xd8] sm:$0xff] %v1047_v8  ;;  %v2152_v9 = vpop.f32.mrb[24].mxu0  ;;  %v2200_v10 = vpop.f32.mrb[24].mxu1  ;;  %2217 = vmatpush3.bf16.msra.mxu0 (!%p2075_p5), %v2515_v54  ;;  %v1136_v4 = vld [vmem:[%s2918_s11 + $0x80] sm:$0xff] (!%p2075_p5)  ;;  %v1137_v5 = vld [vmem:[%s2918_s11 + $0x88] sm:$0xff] (!%p2075_p5) }
 0x180   : > { %v2153_v12 = vpop.f32.mrb[25].mxu0  ;;  %v2201_v14 = vpop.f32.mrb[25].mxu1  ;;  %2350 = vmatpush3.bf16.msra.mxu1 (!%p2075_p5), %v2515_v54  ;;  %2218 = vmatprep.subr.bf16.mxu0 (!%p2075_p5), %v2516_v55  ;;  %v2521_v6 = vld [vmem:[%s3431_s3 + $0x28] sm:$0xff] (!%p2075_p5)   ;;  %v1184_v7 = vmul.f32 (!%p2075_p5), %v1136_v4, %v1104_v1  ;;  %v1185_v8 = vmul.f32 (!%p2075_p5), %v1137_v5, %v1105_v2  ;;  %v1143_v54 = vld [vmem:[%s2918_s11 + $0xb8] sm:$0xff] (!%p2075_p5)  ;;  %v1144_v5 = vld [vmem:[%s2918_s11 + $0xc0] sm:$0xff] (!%p2075_p5) }
 0x181   : > { %v2154_v15 = vadd.f32 %v2153_v12, %v2152_v9  ;;  %v2202_v16 = vadd.f32 %v2201_v14, %v2200_v10  ;;  %v2155_v17 = vpop.f32.mrb[26].mxu0  ;;  %v2203_v18 = vpop.f32.mrb[26].mxu1  ;;  %2343 = vmatprep.subr.bf16.mxu1 (!%p2075_p5), %v2516_v55  ;;  %v2522_v9 = vld [vmem:[%s3431_s3 + $0x70] sm:$0xff] (!%p2075_p5)   ;;  %v1200_v10 = vpack.c.bf16 (!%p2075_p5), %v1169_v3, %v1168_v0  ;;  %v1097_v62 = vld [vmem:[#allocation2 + $0x48] sm:$0xff] (!%p2075_p5)  ;;  %v1112_v3 = vld [vmem:[#allocation2 + $0xc0] sm:$0xff] (!%p2075_p5) }
 0x182   : > { %v2156_v20 = vpop.f32.mrb[27].mxu0  ;;  %v2204_v22 = vpop.f32.mrb[27].mxu1  ;;  %v1208_v12 = vpack.c.bf16 (!%p2075_p5), %v1185_v8, %v1184_v7  ;;  %v1090_v14 = vld [vmem:[#allocation2 + $0x10] sm:$0xff] (!%p2075_p5)  ;;  %v1113_v4 = vld [vmem:[#allocation2 + $0xc8] sm:$0xff] (!%p2075_p5) }
 0x183   : > { %v1032_v23 = vadd.f32 %v2154_v15, %v551_v11  ;;  %v1048_v24 = vadd.f32 %v2202_v16, %v567_v13  ;;  %v2157_v25 = vadd.f32 %v2156_v20, %v2155_v17  ;;  %v2205_v26 = vadd.f32 %v2204_v22, %v2203_v18  ;;  %2219 = vmatpush3.bf16.msra.mxu0 (!%p2075_p5), %v2517_v56  ;;  %v2523_v11 = vld [vmem:[%s3431_s3 + $0x30] sm:$0xff] (!%p2075_p5)   ;;  %v2524_v13 = vld [vmem:[%s3431_s3 + $0x78] sm:$0xff] (!%p2075_p5)  }
 0x184   : > { %2351 = vmatpush3.bf16.msra.mxu1 (!%p2075_p5), %v2517_v56  ;;  %2220 = vmatprep.subr.bf16.mxu0 (!%p2075_p5), %v2518_v57  ;;  %v1091_v15 = vld [vmem:[#allocation2 + $0x18] sm:$0xff] (!%p2075_p5)  ;;  %v1122_v16 = vld [vmem:[%s2918_s11 + $0x10] sm:$0xff] (!%p2075_p5) }
 0x185   : > { %1064 = vst [vmem:[#allocation2 + $0x60] sm:$0xff] %v1032_v23  ;;  %1080 = vst [vmem:[#allocation2 + $0xe0] sm:$0xff] %v1048_v24  ;;  %v1033_v27 = vadd.f32 %v2157_v25, %v552_v19  ;;  %v1049_v28 = vadd.f32 %v2205_v26, %v568_v21  ;;  %2344 = vmatprep.subr.bf16.mxu1 (!%p2075_p5), %v2518_v57  ;;  %1383 = vmatprep.mubr.bf16.mxu0 (!%p2075_p5), %v1200_v10  ;;  %v1123_v17 = vld [vmem:[%s2918_s11 + $0x18] sm:$0xff] (!%p2075_p5)  ;;  %v1106_v18 = vld [vmem:[#allocation2 + $0x90] sm:$0xff] (!%p2075_p5) }
 0x186   : > { %v1107_v19 = vld [vmem:[#allocation2 + $0x98] sm:$0xff] (!%p2075_p5)  ;;  %v1138_v20 = vld [vmem:[%s2918_s11 + $0x90] sm:$0xff] (!%p2075_p5)  ;;  %1447 = vmatprep.mubr.bf16.mxu1 (!%p2075_p5), %v1208_v12  ;;  %v1170_v22 = vmul.f32 (!%p2075_p5), %v1122_v16, %v1090_v14  ;;  %v1171_v24 = vmul.f32 (!%p2075_p5), %v1123_v17, %v1091_v15  ;;  %v1190_v57 = vmul.f32 (!%p2075_p5), %v1142_v53, %v1110_v51  ;;  %v1163_v12 = vpack.c.bf16 (!%p2075_p5), %v1111_v52, %v1110_v51 }
 0x187   : > { %1065 = vst [vmem:[#allocation2 + $0x68] sm:$0xff] %v1033_v27  ;;  %1081 = vst [vmem:[#allocation2 + $0xe8] sm:$0xff] %v1049_v28  ;;  %v2158_v29 = vpop.f32.mrb[28].mxu0  ;;  %v2206_v30 = vpop.f32.mrb[28].mxu1  ;;  %2221 = vmatpush3.bf16.msra.mxu0 (!%p2075_p5), %v2519_v58  ;;  %v1139_v21 = vld [vmem:[%s2918_s11 + $0x98] sm:$0xff] (!%p2075_p5)  ;;  %v1186_v25 = vmul.f32 (!%p2075_p5), %v1138_v20, %v1106_v18  ;;  %v1152_v27 = vpack.c.bf16 (!%p2075_p5), %v1089_v61, %v1088_v60  ;;  %v1160_v28 = vpack.c.bf16 (!%p2075_p5), %v1105_v2, %v1104_v1  ;;  %v1096_v61 = vld [vmem:[#allocation2 + $0x40] sm:$0xff] (!%p2075_p5) }
 0x188   : > { %v2159_v32 = vpop.f32.mrb[29].mxu0  ;;  %v2207_v34 = vpop.f32.mrb[29].mxu1  ;;  %2352 = vmatpush3.bf16.msra.mxu1 (!%p2075_p5), %v2519_v58  ;;  %2222 = vmatprep.subr.bf16.mxu0 (!%p2075_p5), %v2520_v59  ;;  %v2525_v23 = vld [vmem:[%s3431_s3 + $0x38] sm:$0xff] (!%p2075_p5)   ;;  %v1187_v26 = vmul.f32 (!%p2075_p5), %v1139_v21, %v1107_v19  ;;  %v1191_v58 = vmul.f32 (!%p2075_p5), %v1143_v54, %v1111_v52  ;;  %v1128_v1 = vld [vmem:[%s2918_s11 + $0x40] sm:$0xff] (!%p2075_p5)  ;;  %v1129_v2 = vld [vmem:[%s2918_s11 + $0x48] sm:$0xff] (!%p2075_p5) }
 0x189   : > { %v2160_v35 = vadd.f32 %v2159_v32, %v2158_v29  ;;  %v2208_v36 = vadd.f32 %v2207_v34, %v2206_v30  ;;  %v2161_v37 = vpop.f32.mrb[30].mxu0  ;;  %v2209_v38 = vpop.f32.mrb[30].mxu1  ;;  %1087 = sbr.rel (%p2075_p5) target bundleno = 850 (0x352), region = 86  ;;  %2345 = vmatprep.subr.bf16.mxu1 (!%p2075_p5), %v2520_v59  ;;  %v1092_v29 = vld [vmem:[#allocation2 + $0x20] sm:$0xff] (!%p2075_p5)  ;;  %v1093_v30 = vld [vmem:[#allocation2 + $0x28] sm:$0xff] (!%p2075_p5)  ;;  %v1176_v7 = vmul.f32 (!%p2075_p5), %v1128_v1, %v1096_v61  ;;  %v1177_v8 = vmul.f32 (!%p2075_p5), %v1129_v2, %v1097_v62  ;;  %v1130_v17 = vld [vmem:[%s2918_s11 + $0x50] sm:$0xff] (!%p2075_p5) }
 0x18a   : > { %v2162_v40 = vpop.f32.mrb[31].mxu0  ;;  %v2210_v42 = vpop.f32.mrb[31].mxu1  ;;  %v1209_v32 = vpack.c.bf16 (!%p2075_p5), %v1187_v26, %v1186_v25  ;;  %v1125_v34 = vld [vmem:[%s2918_s11 + $0x28] sm:$0xff] (!%p2075_p5)  ;;  %v1154_v59 = vpack.c.bf16 (!%p2075_p5), %v1093_v30, %v1092_v29  ;;  %v1211_v0 = vpack.c.bf16 (!%p2075_p5), %v1191_v58, %v1190_v57  ;;  %v1115_v20 = vld [vmem:[#allocation2 + $0xd8] sm:$0xff] (!%p2075_p5)  ;;  %v1146_v21 = vld [vmem:[%s2918_s11 + $0xd0] sm:$0xff] (!%p2075_p5) }
 0x18b   : > { %v1034_v43 = vadd.f32 %v2160_v35, %v553_v31  ;;  %v1050_v44 = vadd.f32 %v2208_v36, %v569_v33  ;;  %v2163_v45 = vadd.f32 %v2162_v40, %v2161_v37  ;;  %v2211_v46 = vadd.f32 %v2210_v42, %v2209_v38  ;;  %2223 = vmatpush3.bf16.msra.mxu0 (!%p2075_p5), %v2521_v6  ;;  %v1124_v33 = vld [vmem:[%s2918_s11 + $0x20] sm:$0xff] (!%p2075_p5)  ;;  %v1109_v36 = vld [vmem:[#allocation2 + $0xa8] sm:$0xff] (!%p2075_p5)  ;;  %v1150_v53 = vld [vmem:[%s2918_s11 + $0xf0] sm:$0xff] (!%p2075_p5) }
 0x18c   : > { %2353 = vmatpush3.bf16.msra.mxu1 (!%p2075_p5), %v2521_v6  ;;  %2224 = vmatprep.subr.bf16.mxu0 (!%p2075_p5), %v2522_v9  ;;  %v1201_v31 = vpack.c.bf16 (!%p2075_p5), %v1171_v24, %v1170_v22  ;;  %v1108_v35 = vld [vmem:[#allocation2 + $0xa0] sm:$0xff] (!%p2075_p5)  ;;  %v1141_v38 = vld [vmem:[%s2918_s11 + $0xa8] sm:$0xff] (!%p2075_p5)  ;;  %v1173_v40 = vmul.f32 (!%p2075_p5), %v1125_v34, %v1093_v30  ;;  %v1147_v22 = vld [vmem:[%s2918_s11 + $0xd8] sm:$0xff] (!%p2075_p5) }
 0x18d   : > { %1066 = vst [vmem:[#allocation2 + $0x70] sm:$0xff] %v1034_v43  ;;  %1082 = vst [vmem:[#allocation2 + $0xf0] sm:$0xff] %v1050_v44  ;;  %v1035_v47 = vadd.f32 %v2163_v45, %v554_v39  ;;  %v1051_v48 = vadd.f32 %v2211_v46, %v570_v41  ;;  %2346 = vmatprep.subr.bf16.mxu1 (!%p2075_p5), %v2522_v9  ;;  %v1140_v37 = vld [vmem:[%s2918_s11 + $0xa0] sm:$0xff] (!%p2075_p5)  ;;  %v1172_v39 = vmul.f32 (!%p2075_p5), %v1124_v33, %v1092_v29  ;;  %v1094_v45 = vld [vmem:[#allocation2 + $0x30] sm:$0xff] (!%p2075_p5) }
 0x18e   : > { %v1188_v41 = vmul.f32 (!%p2075_p5), %v1140_v37, %v1108_v35  ;;  %v1189_v42 = vmul.f32 (!%p2075_p5), %v1141_v38, %v1109_v36  ;;  %v1153_v43 = vpack.c.bf16 (!%p2075_p5), %v1091_v15, %v1090_v14  ;;  %v1161_v44 = vpack.c.bf16 (!%p2075_p5), %v1107_v19, %v1106_v18  ;;  %v1095_v46 = vld [vmem:[#allocation2 + $0x38] sm:$0xff] (!%p2075_p5)  ;;  %v1145_v6 = vld [vmem:[%s2918_s11 + $0xc8] sm:$0xff] (!%p2075_p5)  ;;  %v1114_v19 = vld [vmem:[#allocation2 + $0xd0] sm:$0xff] (!%p2075_p5) }
 0x18f   : > { %1067 = vst [vmem:[#allocation2 + $0x78] sm:$0xff] %v1035_v47  ;;  %1083 = vst [vmem:[#allocation2 + $0xf8] sm:$0xff] %v1051_v48  ;;  %2225 = vmatpush3.bf16.msra.mxu0 (!%p2075_p5), %v2523_v11  ;;  %v1202_v47 = vpack.c.bf16 (!%p2075_p5), %v1173_v40, %v1172_v39  ;;  %v1174_v55 = vmul.f32 (!%p2075_p5), %v1126_v49, %v1094_v45  ;;  %v1175_v56 = vmul.f32 (!%p2075_p5), %v1127_v50, %v1095_v46  ;;  %v1099_v14 = vld [vmem:[#allocation2 + $0x58] sm:$0xff] (!%p2075_p5)  ;;  %v1100_v29 = vld [vmem:[#allocation2 + $0x60] sm:$0xff] (!%p2075_p5) }
 0x190   : > { %2354 = vmatpush3.bf16.msra.mxu1 %v2523_v11  ;;  %2226 = vmatprep.subr.bf16.mxu0 %v2524_v13  ;;  %v1210_v48 = vpack.c.bf16 %v1189_v42, %v1188_v41  ;;  %v1162_v60 = vpack.c.bf16 %v1109_v36, %v1108_v35  ;;  %v1192_v9 = vmul.f32 %v1144_v5, %v1112_v3  ;;  %v1131_v18 = vld [vmem:[%s2918_s11 + $0x58] sm:$0xff]  ;;  %v1101_v30 = vld [vmem:[#allocation2 + $0x68] sm:$0xff]  ;;  %v1132_v33 = vld [vmem:[%s2918_s11 + $0x60] sm:$0xff] }
 0x191   : > { %2347 = vmatprep.subr.bf16.mxu1 %v2524_v13  ;;  %v1203_v63 = vpack.c.bf16 %v1175_v56, %v1174_v55  ;;  %v1193_v10 = vmul.f32 %v1145_v6, %v1113_v4  ;;  %v1155_v11 = vpack.c.bf16 %v1095_v46, %v1094_v45  ;;  %v1098_v13 = vld [vmem:[#allocation2 + $0x50] sm:$0xff]  ;;  %v1204_v15 = vpack.c.bf16 %v1177_v8, %v1176_v7  ;;  %v1133_v34 = vld [vmem:[%s2918_s11 + $0x68] sm:$0xff]  ;;  %v1116_v35 = vld [vmem:[#allocation2 + $0xe0] sm:$0xff] }
 0x192   : > { %v1179_v24 = vmul.f32 %v1131_v18, %v1099_v14  ;;  %v1194_v25 = vmul.f32 %v1146_v21, %v1114_v19  ;;  %v1195_v26 = vmul.f32 %v1147_v22, %v1115_v20  ;;  %v1117_v36 = vld [vmem:[#allocation2 + $0xe8] sm:$0xff]  ;;  %v1148_v37 = vld [vmem:[%s2918_s11 + $0xe0] sm:$0xff]  ;;  %v1180_v39 = vmul.f32 %v1132_v33, %v1100_v29  ;;  %v1134_v49 = vld [vmem:[%s2918_s11 + $0x70] sm:$0xff] }
 0x193   : > { %2227 = vmatpush3.bf16.msra.mxu0 %v2525_v23  ;;  %v1212_v16 = vpack.c.bf16 %v1193_v10, %v1192_v9  ;;  %v1149_v38 = vld [vmem:[%s2918_s11 + $0xe8] sm:$0xff]  ;;  %v1181_v40 = vmul.f32 %v1133_v34, %v1101_v30  ;;  %v1196_v41 = vmul.f32 %v1148_v37, %v1116_v35  ;;  %v1135_v50 = vld [vmem:[%s2918_s11 + $0x78] sm:$0xff] }
 0x194   : > { %2355 = vmatpush3.bf16.msra.mxu1 %v2525_v23  ;;  %v1178_v23 = vmul.f32 %v1130_v17, %v1098_v13  ;;  %v1197_v42 = vmul.f32 %v1149_v38, %v1117_v36  ;;  %v1102_v45 = vld [vmem:[#allocation2 + $0x70] sm:$0xff]  ;;  %v1151_v54 = vld [vmem:[%s2918_s11 + $0xf8] sm:$0xff] }
 0x195   : > { %v1118_v51 = vld [vmem:[#allocation2 + $0xf0] sm:$0xff]  ;;  %v1182_v55 = vmul.f32 %v1134_v49, %v1102_v45 }
 0x196   : > { %1384 = vmatmul.mubr.bf16.vlgmr.msra.gmra.mrb[0].mxu0 %v1152_v27  ;;  %v1156_v27 = vpack.c.bf16 %v1097_v62, %v1096_v61  ;;  %v1103_v46 = vld [vmem:[#allocation2 + $0x78] sm:$0xff]  ;;  %v1198_v57 = vmul.f32 %v1150_v53, %v1118_v51 }
 0x197   : > { %1448 = vmatmul.mubr.bf16.vlgmr.msra.gmra.mrb[0].mxu1 %v1160_v28  ;;  %1391 = vmatprep.mubr.bf16.mxu0 %v1201_v31  ;;  %v1164_v28 = vpack.c.bf16 %v1113_v4, %v1112_v3  ;;  %v1205_v31 = vpack.c.bf16 %v1179_v24, %v1178_v23  ;;  %v1119_v52 = vld [vmem:[#allocation2 + $0xf8] sm:$0xff]  ;;  %v1183_v56 = vmul.f32 %v1135_v50, %v1103_v46  ;;  %v3068_v3 = vld [vmem:[%s3432_s4] ss:$0 sm:$0xff] }
 0x198   : > { %1455 = vmatprep.mubr.bf16.mxu1 %v1209_v32  ;;  %v1213_v32 = vpack.c.bf16 %v1195_v26, %v1194_v25  ;;  %v1199_v58 = vmul.f32 %v1151_v54, %v1119_v52 }
 0x199   : > { %v1207_v61 = vpack.c.bf16 %v1183_v56, %v1182_v55 }
 0x19a   : > { %v1215_v62 = vpack.c.bf16 %v1199_v58, %v1198_v57 }
 0x19e   : > { %1392 = vmatmul.mubr.bf16.gmra.mrb[4].mxu0 %v1153_v43  ;;  %v1157_v43 = vpack.c.bf16 %v1099_v14, %v1098_v13 }
 0x19f   : > { %1456 = vmatmul.mubr.bf16.gmra.mrb[4].mxu1 %v1161_v44  ;;  %1399 = vmatprep.mubr.bf16.mxu0 %v1202_v47  ;;  %v1165_v44 = vpack.c.bf16 %v1115_v20, %v1114_v19  ;;  %v1206_v47 = vpack.c.bf16 %v1181_v40, %v1180_v39 }
 0x1a0   : > { %1463 = vmatprep.mubr.bf16.mxu1 %v1210_v48  ;;  %v1214_v48 = vpack.c.bf16 %v1197_v42, %v1196_v41 }
 0x1a6   : > { %1400 = vmatmul.mubr.bf16.gmra.mrb[8].mxu0 %v1154_v59  ;;  %v1158_v59 = vpack.c.bf16 %v1101_v30, %v1100_v29 }
 0x1a7   : > { %1464 = vmatmul.mubr.bf16.gmra.mrb[8].mxu1 %v1162_v60  ;;  %1407 = vmatprep.mubr.bf16.mxu0 %v1203_v63  ;;  %v1166_v60 = vpack.c.bf16 %v1117_v36, %v1116_v35  ;;  %v1159_v63 = vpack.c.bf16 %v1103_v46, %v1102_v45 }
 0x1a8   : > { %1471 = vmatprep.mubr.bf16.mxu1 %v1211_v0  ;;  %v1167_v0 = vpack.c.bf16 %v1119_v52, %v1118_v51 }
 0x1ae   : > { %1408 = vmatmul.mubr.bf16.gmra.mrb[12].mxu0 %v1155_v11 }
 0x1af   : > { %1472 = vmatmul.mubr.bf16.gmra.mrb[12].mxu1 %v1163_v12  ;;  %1415 = vmatprep.mubr.bf16.mxu0 %v1204_v15 }
 0x1b0   : > { %1479 = vmatprep.mubr.bf16.mxu1 %v1212_v16 }
 0x1b6   : > { %1416 = vmatmul.mubr.bf16.gmra.mrb[16].mxu0 %v1156_v27 }
 0x1b7   : > { %1480 = vmatmul.mubr.bf16.gmra.mrb[16].mxu1 %v1164_v28  ;;  %1423 = vmatprep.mubr.bf16.mxu0 %v1205_v31 }
 0x1b8   : > { %1487 = vmatprep.mubr.bf16.mxu1 %v1213_v32 }
 0x1be   : > { %1424 = vmatmul.mubr.bf16.gmra.mrb[20].mxu0 %v1157_v43 }
 0x1bf   : > { %1488 = vmatmul.mubr.bf16.gmra.mrb[20].mxu1 %v1165_v44  ;;  %1431 = vmatprep.mubr.bf16.mxu0 %v1206_v47 }
 0x1c0   : > { %1495 = vmatprep.mubr.bf16.mxu1 %v1214_v48 }
 0x1c6   : > { %1432 = vmatmul.mubr.bf16.gmra.mrb[24].mxu0 %v1158_v59 }
 0x1c7   : > { %1496 = vmatmul.mubr.bf16.gmra.mrb[24].mxu1 %v1166_v60  ;;  %1439 = vmatprep.mubr.bf16.mxu0 %v1207_v61 }
 0x1c8   : > { %1503 = vmatprep.mubr.bf16.mxu1 %v1215_v62 }
 0x1ce   : > { %1440 = vmatmul.mubr.bf16.gmra.mrb[28].mxu0 %v1159_v63 }
 0x1cf   : > { %1504 = vmatmul.mubr.bf16.gmra.mrb[28].mxu1 %v1167_v0 }
 0x269   : > { %v2228_v1 = vpop.f32.mrb[0].mxu0 }
 0x26a   : > { %v2276_v2 = vpop.f32.mrb[0].mxu1  ;;  %v2229_v4 = vpop.f32.mrb[1].mxu0 }
 0x26b   : > { %v2277_v5 = vpop.f32.mrb[1].mxu1  ;;  %v2230_v6 = vadd.f32 %v2229_v4, %v2228_v1  ;;  %v2231_v8 = vpop.f32.mrb[2].mxu0 }
 0x26c   : > { %v2278_v7 = vadd.f32 %v2277_v5, %v2276_v2  ;;  %v2279_v9 = vpop.f32.mrb[2].mxu1  ;;  %v2232_v10 = vpop.f32.mrb[3].mxu0 }
 0x26d   : > { %v2280_v11 = vpop.f32.mrb[3].mxu1  ;;  %v1386_v12 = vadd.f32 %v2230_v6, %v3068_v3  ;;  %v2233_v14 = vadd.f32 %v2232_v10, %v2231_v8 }
 0x26e   : > { %v1450_v13 = vadd.f32 %v2278_v7, %v3068_v3  ;;  %v2281_v15 = vadd.f32 %v2280_v11, %v2279_v9 }
 0x26f   : > { %v1389_v17 = vadd.f32 %v2233_v14, %v3068_v3  ;;  %vm1512_vm0 = vcmp.gt.f32.partialorder %v1386_v12, 0.0  ;;  %v1544_v19 = vmul.f32 0.2, %v1386_v12 }
 0x270   : > { %v1560_v16 = vmul.f32 0.2, %v1450_v13  ;;  %v1453_v18 = vadd.f32 %v2281_v15, %v3068_v3  ;;  %vm1528_vm1 = vcmp.gt.f32.partialorder %v1450_v13, 0.0 }
 0x271   : > { %v1545_v20 = vmul.f32 0.2, %v1389_v17  ;;  %v2234_v21 = vpop.f32.mrb[4].mxu0  ;;  %vm1513_vm3 = vcmp.gt.f32.partialorder %v1389_v17, 0.0  ;;  %v3076_v26 = vsel %vm1512_vm0, %v1386_v12, %v1544_v19 }
 0x272   : > { %v2282_v22 = vpop.f32.mrb[4].mxu1  ;;  %vm1529_vm2 = vcmp.gt.f32.partialorder %v1453_v18, 0.0  ;;  %v3074_v23 = vsel %vm1528_vm1, %v1450_v13, %v1560_v16  ;;  %v2235_v24 = vpop.f32.mrb[5].mxu0  ;;  %v1561_v27 = vmul.f32 0.2, %v1453_v18  ;;  %v1608_v32 = vmul.f32 %v3076_v26, %v3076_v26  ;;  %1768 = vst [vmem:[%s2927_s24] sm:$0xff] %v3076_v26 }
 0x273   : > { %v2283_v25 = vpop.f32.mrb[5].mxu1  ;;  %1784 = vst [vmem:[%s2927_s24 + $0x80] sm:$0xff] %v3074_v23  ;;  %v2236_v28 = vadd.f32 %v2235_v24, %v2234_v21  ;;  %v2237_v29 = vpop.f32.mrb[6].mxu0  ;;  %v3084_v33 = vsel %vm1513_vm3, %v1389_v17, %v1545_v20  ;;  %v1624_v42 = vmul.f32 %v3074_v23, %v3074_v23 }
 0x274   : > { %v2284_v30 = vadd.f32 %v2283_v25, %v2282_v22  ;;  %v2285_v31 = vpop.f32.mrb[6].mxu1  ;;  %v2238_v34 = vpop.f32.mrb[7].mxu0  ;;  %v3087_v36 = vsel %vm1529_vm2, %v1453_v18, %v1561_v27  ;;  %1769 = vst [vmem:[%s2927_s24 + $0x8] sm:$0xff] %v3084_v33  ;;  %1640 = vadd.xlane.f32.xlu0 %v1608_v32  ;;  %v1609_v56 = vmul.f32 %v3084_v33, %v3084_v33 }
 0x275   : > { %v2286_v35 = vpop.f32.mrb[7].mxu1  ;;  %v1394_v37 = vadd.f32 %v2236_v28, %v3068_v3  ;;  %v2239_v39 = vadd.f32 %v2238_v34, %v2237_v29  ;;  %1785 = vst [vmem:[%s2927_s24 + $0x88] sm:$0xff] %v3087_v36  ;;  %v1625_v41 = vmul.f32 %v3087_v36, %v3087_v36 }
 0x276   : > { %v1458_v38 = vadd.f32 %v2284_v30, %v3068_v3  ;;  %v2287_v40 = vadd.f32 %v2286_v35, %v2285_v31 }
 0x277   : > { %v1546_v43 = vmul.f32 0.2, %v1394_v37  ;;  %v1397_v45 = vadd.f32 %v2239_v39, %v3068_v3  ;;  %1674 = vadd.xlane.f32.xlu1 %v1625_v41  ;;  %vm1514_vm4 = vcmp.gt.f32.partialorder %v1394_v37, 0.0 }
 0x278   : > { %v1562_v44 = vmul.f32 0.2, %v1458_v38  ;;  %v1461_v46 = vadd.f32 %v2287_v40, %v3068_v3  ;;  %vm1530_vm5 = vcmp.gt.f32.partialorder %v1458_v38, 0.0  ;;  %1672 = vadd.xlane.f32.xlu0 %v1624_v42 }
 0x279   : > { %v1547_v47 = vmul.f32 0.2, %v1397_v45  ;;  %v2240_v49 = vpop.f32.mrb[8].mxu0  ;;  %v3101_v51 = vsel %vm1514_vm4, %v1394_v37, %v1546_v43  ;;  %vm1515_vm6 = vcmp.gt.f32.partialorder %v1397_v45, 0.0 }
 0x27a   : > { %v1563_v48 = vmul.f32 0.2, %v1461_v46  ;;  %v2288_v50 = vpop.f32.mrb[8].mxu1  ;;  %v3103_v52 = vsel %vm1530_vm5, %v1458_v38, %v1562_v44  ;;  %v2241_v53 = vpop.f32.mrb[9].mxu0  ;;  %v1610_v55 = vmul.f32 %v3101_v51, %v3101_v51  ;;  %1770 = vst [vmem:[%s2927_s24 + $0x10] sm:$0xff] %v3101_v51  ;;  %vm1531_vm7 = vcmp.gt.f32.partialorder %v1461_v46, 0.0 }
 0x27b   : > { %v2289_v54 = vpop.f32.mrb[9].mxu1  ;;  %1786 = vst [vmem:[%s2927_s24 + $0x90] sm:$0xff] %v3103_v52  ;;  %v2242_v57 = vadd.f32 %v2241_v53, %v2240_v49  ;;  %v2243_v58 = vpop.f32.mrb[10].mxu0  ;;  %v3113_v61 = vsel %vm1515_vm6, %v1397_v45, %v1547_v47  ;;  %v1626_v1 = vmul.f32 %v3103_v52, %v3103_v52 }
 0x27c   : > { %v2290_v59 = vadd.f32 %v2289_v54, %v2288_v50  ;;  %v2291_v60 = vpop.f32.mrb[10].mxu1  ;;  %v3115_v62 = vsel %vm1531_vm7, %v1461_v46, %v1563_v48  ;;  %v2244_v63 = vpop.f32.mrb[11].mxu0  ;;  %1644 = vadd.xlane.f32.xlu1 %v1610_v55  ;;  %1771 = vst [vmem:[%s2927_s24 + $0x18] sm:$0xff] %v3113_v61  ;;  %1642 = vadd.xlane.f32.xlu0 %v1609_v56 }
 0x27d   : > { %v2292_v0 = vpop.f32.mrb[11].mxu1  ;;  %1787 = vst [vmem:[%s2927_s24 + $0x98] sm:$0xff] %v3115_v62  ;;  %v1402_v2 = vadd.f32 %v2242_v57, %v3068_v3  ;;  %v2245_v5 = vadd.f32 %v2244_v63, %v2243_v58  ;;  %v1611_v7 = vmul.f32 %v3113_v61, %v3113_v61  ;;  %v1627_v20 = vmul.f32 %v3115_v62, %v3115_v62 }
 0x27e   : > { %v1466_v4 = vadd.f32 %v2290_v59, %v3068_v3  ;;  %v2293_v6 = vadd.f32 %v2292_v0, %v2291_v60 }
 0x27f   : > { %v1548_v8 = vmul.f32 0.2, %v1402_v2  ;;  %v1405_v10 = vadd.f32 %v2245_v5, %v3068_v3  ;;  %vm1516_vm8 = vcmp.gt.f32.partialorder %v1402_v2, 0.0 }
 0x280   : > { %v1564_v9 = vmul.f32 0.2, %v1466_v4  ;;  %v1469_v11 = vadd.f32 %v2293_v6, %v3068_v3  ;;  %1646 = vadd.xlane.f32.xlu1 %v1611_v7  ;;  %vm1532_vm9 = vcmp.gt.f32.partialorder %v1466_v4, 0.0  ;;  %1676 = vadd.xlane.f32.xlu0 %v1626_v1 }
 0x281   : > { %v1549_v12 = vmul.f32 0.2, %v1405_v10  ;;  %v2246_v14 = vpop.f32.mrb[12].mxu0  ;;  %v3129_v16 = vsel %vm1516_vm8, %v1402_v2, %v1548_v8  ;;  %vm1517_vm10 = vcmp.gt.f32.partialorder %v1405_v10, 0.0 }
 0x282   : > { %v1565_v13 = vmul.f32 0.2, %v1469_v11  ;;  %v2294_v15 = vpop.f32.mrb[12].mxu1  ;;  %v3131_v17 = vsel %vm1532_vm9, %v1466_v4, %v1564_v9  ;;  %v2247_v18 = vpop.f32.mrb[13].mxu0  ;;  %v1612_v21 = vmul.f32 %v3129_v16, %v3129_v16  ;;  %1772 = vst [vmem:[%s2927_s24 + $0x20] sm:$0xff] %v3129_v16  ;;  %vm1533_vm11 = vcmp.gt.f32.partialorder %v1469_v11, 0.0 }
 0x283   : > { %v2295_v19 = vpop.f32.mrb[13].mxu1  ;;  %1788 = vst [vmem:[%s2927_s24 + $0xa0] sm:$0xff] %v3131_v17  ;;  %v2248_v22 = vadd.f32 %v2247_v18, %v2246_v14  ;;  %v2249_v24 = vpop.f32.mrb[14].mxu0  ;;  %v3141_v28 = vsel %vm1517_vm10, %v1405_v10, %v1549_v12  ;;  %v1628_v32 = vmul.f32 %v3131_v17, %v3131_v17 }
 0x284   : > { %v2296_v25 = vadd.f32 %v2295_v19, %v2294_v15  ;;  %v2297_v27 = vpop.f32.mrb[14].mxu1  ;;  %v3143_v29 = vsel %vm1533_vm11, %v1469_v11, %v1565_v13  ;;  %v2250_v30 = vpop.f32.mrb[15].mxu0  ;;  %1678 = vadd.xlane.f32.xlu1 %v1627_v20  ;;  %1773 = vst [vmem:[%s2927_s24 + $0x28] sm:$0xff] %v3141_v28  ;;  %1648 = vadd.xlane.f32.xlu0 %v1612_v21 }
 0x285   : > { %v2298_v31 = vpop.f32.mrb[15].mxu1  ;;  %1789 = vst [vmem:[%s2927_s24 + $0xa8] sm:$0xff] %v3143_v29  ;;  %v1410_v34 = vadd.f32 %v2248_v22, %v3068_v3  ;;  %v2251_v37 = vadd.f32 %v2250_v30, %v2249_v24  ;;  %v1613_v39 = vmul.f32 %v3141_v28, %v3141_v28  ;;  %v1629_v54 = vmul.f32 %v3143_v29, %v3143_v29 }
 0x286   : > { %v1474_v35 = vadd.f32 %v2296_v25, %v3068_v3  ;;  %v2299_v38 = vadd.f32 %v2298_v31, %v2297_v27 }
 0x287   : > { %v1550_v40 = vmul.f32 0.2, %v1410_v34  ;;  %v1413_v42 = vadd.f32 %v2251_v37, %v3068_v3  ;;  %vm1518_vm12 = vcmp.gt.f32.partialorder %v1410_v34, 0.0 }
 0x288   : > { %v1566_v41 = vmul.f32 0.2, %v1474_v35  ;;  %v1477_v43 = vadd.f32 %v2299_v38, %v3068_v3  ;;  %1650 = vadd.xlane.f32.xlu1 %v1613_v39  ;;  %vm1534_vm13 = vcmp.gt.f32.partialorder %v1474_v35, 0.0  ;;  %1680 = vadd.xlane.f32.xlu0 %v1628_v32 }
 0x289   : > { %v1551_v44 = vmul.f32 0.2, %v1413_v42  ;;  %v2252_v46 = vpop.f32.mrb[16].mxu0  ;;  %v3157_v48 = vsel %vm1518_vm12, %v1410_v34, %v1550_v40  ;;  %vm1519_vm14 = vcmp.gt.f32.partialorder %v1413_v42, 0.0 }
 0x28a   : > { %v1567_v45 = vmul.f32 0.2, %v1477_v43  ;;  %v2300_v47 = vpop.f32.mrb[16].mxu1  ;;  %v3159_v49 = vsel %vm1534_vm13, %v1474_v35, %v1566_v41  ;;  %v2253_v50 = vpop.f32.mrb[17].mxu0  ;;  %v1614_v55 = vmul.f32 %v3157_v48, %v3157_v48  ;;  %1774 = vst [vmem:[%s2927_s24 + $0x30] sm:$0xff] %v3157_v48  ;;  %vm1535_vm15 = vcmp.gt.f32.partialorder %v1477_v43, 0.0 }
 0x28b   : > { %v2301_v53 = vpop.f32.mrb[17].mxu1  ;;  %1790 = vst [vmem:[%s2927_s24 + $0xb0] sm:$0xff] %v3159_v49  ;;  %v2254_v56 = vadd.f32 %v2253_v50, %v2252_v46  ;;  %v2255_v57 = vpop.f32.mrb[18].mxu0  ;;  %v3169_v60 = vsel %vm1519_vm14, %v1413_v42, %v1551_v44  ;;  %v1630_v2 = vmul.f32 %v3159_v49, %v3159_v49 }
 0x28c   : > { %v2302_v58 = vadd.f32 %v2301_v53, %v2300_v47  ;;  %v2303_v59 = vpop.f32.mrb[18].mxu1  ;;  %v3171_v63 = vsel %vm1535_vm15, %v1477_v43, %v1567_v45  ;;  %v2256_v0 = vpop.f32.mrb[19].mxu0  ;;  %1682 = vadd.xlane.f32.xlu1 %v1629_v54  ;;  %1775 = vst [vmem:[%s2927_s24 + $0x38] sm:$0xff] %v3169_v60  ;;  %1652 = vadd.xlane.f32.xlu0 %v1614_v55 }
 0x28d   : > { %v2304_v1 = vpop.f32.mrb[19].mxu1  ;;  %1791 = vst [vmem:[%s2927_s24 + $0xb8] sm:$0xff] %v3171_v63  ;;  %v1418_v4 = vadd.f32 %v2254_v56, %v3068_v3  ;;  %v2257_v6 = vadd.f32 %v2256_v0, %v2255_v57  ;;  %v1615_v8 = vmul.f32 %v3169_v60, %v3169_v60  ;;  %v1631_v24 = vmul.f32 %v3171_v63, %v3171_v63 }
 0x28e   : > { %v1482_v5 = vadd.f32 %v2302_v58, %v3068_v3  ;;  %v2305_v7 = vadd.f32 %v2304_v1, %v2303_v59 }
 0x28f   : > { %v1552_v9 = vmul.f32 0.2, %v1418_v4  ;;  %v1421_v11 = vadd.f32 %v2257_v6, %v3068_v3  ;;  %vm1520_vm0 = vcmp.gt.f32.partialorder %v1418_v4, 0.0 }
 0x290   : > { %v1568_v10 = vmul.f32 0.2, %v1482_v5  ;;  %v1485_v12 = vadd.f32 %v2305_v7, %v3068_v3  ;;  %1654 = vadd.xlane.f32.xlu1 %v1615_v8  ;;  %vm1536_vm1 = vcmp.gt.f32.partialorder %v1482_v5, 0.0  ;;  %1684 = vadd.xlane.f32.xlu0 %v1630_v2 }
 0x291   : > { %v1553_v13 = vmul.f32 0.2, %v1421_v11  ;;  %v2258_v15 = vpop.f32.mrb[20].mxu0  ;;  %v3185_v19 = vsel %vm1520_vm0, %v1418_v4, %v1552_v9  ;;  %vm1521_vm2 = vcmp.gt.f32.partialorder %v1421_v11, 0.0 }
 0x292   : > { %v1569_v14 = vmul.f32 0.2, %v1485_v12  ;;  %v2306_v18 = vpop.f32.mrb[20].mxu1  ;;  %v3187_v20 = vsel %vm1536_vm1, %v1482_v5, %v1568_v10  ;;  %v2259_v21 = vpop.f32.mrb[21].mxu0  ;;  %v1616_v25 = vmul.f32 %v3185_v19, %v3185_v19  ;;  %1776 = vst [vmem:[%s2927_s24 + $0x40] sm:$0xff] %v3185_v19  ;;  %vm1537_vm3 = vcmp.gt.f32.partialorder %v1485_v12, 0.0 }
 0x293   : > { %v2307_v22 = vpop.f32.mrb[21].mxu1  ;;  %1792 = vst [vmem:[%s2927_s24 + $0xc0] sm:$0xff] %v3187_v20  ;;  %v2260_v27 = vadd.f32 %v2259_v21, %v2258_v15  ;;  %v2261_v30 = vpop.f32.mrb[22].mxu0  ;;  %v3197_v34 = vsel %vm1521_vm2, %v1421_v11, %v1553_v13  ;;  %v1632_v39 = vmul.f32 %v3187_v20, %v3187_v20 }
 0x294   : > { %v2308_v31 = vadd.f32 %v2307_v22, %v2306_v18  ;;  %v2309_v32 = vpop.f32.mrb[22].mxu1  ;;  %v3199_v35 = vsel %vm1537_vm3, %v1485_v12, %v1569_v14  ;;  %v2262_v37 = vpop.f32.mrb[23].mxu0  ;;  %1686 = vadd.xlane.f32.xlu1 %v1631_v24  ;;  %1777 = vst [vmem:[%s2927_s24 + $0x48] sm:$0xff] %v3197_v34  ;;  %1656 = vadd.xlane.f32.xlu0 %v1616_v25 }
 0x295   : > { %v2310_v38 = vpop.f32.mrb[23].mxu1  ;;  %1793 = vst [vmem:[%s2927_s24 + $0xc8] sm:$0xff] %v3199_v35  ;;  %v1426_v40 = vadd.f32 %v2260_v27, %v3068_v3  ;;  %v2263_v42 = vadd.f32 %v2262_v37, %v2261_v30  ;;  %v1617_v44 = vmul.f32 %v3197_v34, %v3197_v34  ;;  %v1633_v1 = vmul.f32 %v3199_v35, %v3199_v35 }
 0x296   : > { %v1490_v41 = vadd.f32 %v2308_v31, %v3068_v3  ;;  %v2311_v43 = vadd.f32 %v2310_v38, %v2309_v32 }
 0x297   : > { %v1554_v45 = vmul.f32 0.2, %v1426_v40  ;;  %v1429_v47 = vadd.f32 %v2263_v42, %v3068_v3  ;;  %vm1522_vm4 = vcmp.gt.f32.partialorder %v1426_v40, 0.0 }
 0x298   : > { %v1570_v46 = vmul.f32 0.2, %v1490_v41  ;;  %v1493_v50 = vadd.f32 %v2311_v43, %v3068_v3  ;;  %1658 = vadd.xlane.f32.xlu1 %v1617_v44  ;;  %vm1538_vm5 = vcmp.gt.f32.partialorder %v1490_v41, 0.0  ;;  %1688 = vadd.xlane.f32.xlu0 %v1632_v39 }
 0x299   : > { %v1555_v53 = vmul.f32 0.2, %v1429_v47  ;;  %v2264_v55 = vpop.f32.mrb[24].mxu0  ;;  %v3213_v57 = vsel %vm1522_vm4, %v1426_v40, %v1554_v45  ;;  %vm1523_vm6 = vcmp.gt.f32.partialorder %v1429_v47, 0.0 }
 0x29a   : > { %v1571_v54 = vmul.f32 0.2, %v1493_v50  ;;  %v2312_v56 = vpop.f32.mrb[24].mxu1  ;;  %v3215_v58 = vsel %vm1538_vm5, %v1490_v41, %v1570_v46  ;;  %v2265_v59 = vpop.f32.mrb[25].mxu0  ;;  %v1618_v2 = vmul.f32 %v3213_v57, %v3213_v57  ;;  %1778 = vst [vmem:[%s2927_s24 + $0x50] sm:$0xff] %v3213_v57  ;;  %vm1539_vm7 = vcmp.gt.f32.partialorder %v1493_v50, 0.0 }
 0x29b   : > { %v2313_v0 = vpop.f32.mrb[25].mxu1  ;;  %1794 = vst [vmem:[%s2927_s24 + $0xd0] sm:$0xff] %v3215_v58  ;;  %v2266_v4 = vadd.f32 %v2265_v59, %v2264_v55  ;;  %v2267_v5 = vpop.f32.mrb[26].mxu0  ;;  %v3225_v8 = vsel %vm1523_vm6, %v1429_v47, %v1555_v53  ;;  %v1634_v12 = vmul.f32 %v3215_v58, %v3215_v58 }
 0x29c   : > { %v2314_v6 = vadd.f32 %v2313_v0, %v2312_v56  ;;  %v2315_v7 = vpop.f32.mrb[26].mxu1  ;;  %v3227_v9 = vsel %vm1539_vm7, %v1493_v50, %v1571_v54  ;;  %v2268_v10 = vpop.f32.mrb[27].mxu0  ;;  %1690 = vadd.xlane.f32.xlu1 %v1633_v1  ;;  %1779 = vst [vmem:[%s2927_s24 + $0x58] sm:$0xff] %v3225_v8  ;;  %1660 = vadd.xlane.f32.xlu0 %v1618_v2 }
 0x29d   : > { %v2316_v11 = vpop.f32.mrb[27].mxu1  ;;  %1795 = vst [vmem:[%s2927_s24 + $0xd8] sm:$0xff] %v3227_v9  ;;  %v1434_v13 = vadd.f32 %v2266_v4, %v3068_v3  ;;  %v2269_v15 = vadd.f32 %v2268_v10, %v2267_v5  ;;  %v1619_v21 = vmul.f32 %v3225_v8, %v3225_v8  ;;  %v1635_v42 = vmul.f32 %v3227_v9, %v3227_v9 }
 0x29e   : > { %v1498_v14 = vadd.f32 %v2314_v6, %v3068_v3  ;;  %v2317_v18 = vadd.f32 %v2316_v11, %v2315_v7 }
 0x29f   : > { %v1556_v22 = vmul.f32 0.2, %v1434_v13  ;;  %v1437_v25 = vadd.f32 %v2269_v15, %v3068_v3  ;;  %vm1524_vm8 = vcmp.gt.f32.partialorder %v1434_v13, 0.0 }
 0x2a0   : > { %v1572_v24 = vmul.f32 0.2, %v1498_v14  ;;  %v1501_v27 = vadd.f32 %v2317_v18, %v3068_v3  ;;  %1662 = vadd.xlane.f32.xlu1 %v1619_v21  ;;  %vm1540_vm9 = vcmp.gt.f32.partialorder %v1498_v14, 0.0  ;;  %1692 = vadd.xlane.f32.xlu0 %v1634_v12 }
 0x2a1   : > { %v1557_v30 = vmul.f32 0.2, %v1437_v25  ;;  %v2270_v32 = vpop.f32.mrb[28].mxu0  ;;  %v3241_v38 = vsel %vm1524_vm8, %v1434_v13, %v1556_v22  ;;  %vm1525_vm10 = vcmp.gt.f32.partialorder %v1437_v25, 0.0 }
 0x2a2   : > { %v1573_v31 = vmul.f32 0.2, %v1501_v27  ;;  %v2318_v37 = vpop.f32.mrb[28].mxu1  ;;  %v3243_v39 = vsel %vm1540_vm9, %v1498_v14, %v1572_v24  ;;  %v2271_v40 = vpop.f32.mrb[29].mxu0  ;;  %v1620_v43 = vmul.f32 %v3241_v38, %v3241_v38  ;;  %1780 = vst [vmem:[%s2927_s24 + $0x60] sm:$0xff] %v3241_v38  ;;  %vm1541_vm11 = vcmp.gt.f32.partialorder %v1501_v27, 0.0 }
 0x2a3   : > { %v2319_v41 = vpop.f32.mrb[29].mxu1  ;;  %1796 = vst [vmem:[%s2927_s24 + $0xe0] sm:$0xff] %v3243_v39  ;;  %v2272_v44 = vadd.f32 %v2271_v40, %v2270_v32  ;;  %v2273_v45 = vpop.f32.mrb[30].mxu0  ;;  %v3253_v50 = vsel %vm1525_vm10, %v1437_v25, %v1557_v30  ;;  %v1636_v56 = vmul.f32 %v3243_v39, %v3243_v39 }
 0x2a4   : > { %v2320_v46 = vadd.f32 %v2319_v41, %v2318_v37  ;;  %v2321_v47 = vpop.f32.mrb[30].mxu1  ;;  %v3255_v53 = vsel %vm1541_vm11, %v1501_v27, %v1573_v31  ;;  %v2274_v54 = vpop.f32.mrb[31].mxu0  ;;  %1694 = vadd.xlane.f32.xlu1 %v1635_v42  ;;  %1781 = vst [vmem:[%s2927_s24 + $0x68] sm:$0xff] %v3253_v50  ;;  %1664 = vadd.xlane.f32.xlu0 %v1620_v43 }
 0x2a5   : > { %v2322_v55 = vpop.f32.mrb[31].mxu1  ;;  %1797 = vst [vmem:[%s2927_s24 + $0xe8] sm:$0xff] %v3255_v53  ;;  %v1442_v59 = vadd.f32 %v2272_v44, %v3068_v3  ;;  %v2275_v1 = vadd.f32 %v2274_v54, %v2273_v45  ;;  %v1621_v4 = vmul.f32 %v3253_v50, %v3253_v50  ;;  %v1637_v14 = vmul.f32 %v3255_v53, %v3255_v53 }
 0x2a6   : > { %v1506_v0 = vadd.f32 %v2320_v46, %v3068_v3  ;;  %v2323_v2 = vadd.f32 %v2322_v55, %v2321_v47 }
 0x2a7   : > { %v1558_v5 = vmul.f32 0.2, %v1442_v59  ;;  %v1445_v7 = vadd.f32 %v2275_v1, %v3068_v3  ;;  %vm1526_vm12 = vcmp.gt.f32.partialorder %v1442_v59, 0.0 }
 0x2a8   : > { %v1574_v6 = vmul.f32 0.2, %v1506_v0  ;;  %v1509_v10 = vadd.f32 %v2323_v2, %v3068_v3  ;;  %1666 = vadd.xlane.f32.xlu1 %v1621_v4  ;;  %vm1542_vm13 = vcmp.gt.f32.partialorder %v1506_v0, 0.0  ;;  %1696 = vadd.xlane.f32.xlu0 %v1636_v56 }
 0x2a9   : > { %v1559_v11 = vmul.f32 0.2, %v1445_v7  ;;  %v3269_v13 = vsel %vm1526_vm12, %v1442_v59, %v1558_v5  ;;  %vm1527_vm14 = vcmp.gt.f32.partialorder %v1445_v7, 0.0 }
 0x2aa   : > { %v1575_v12 = vmul.f32 0.2, %v1509_v10  ;;  %v1622_v15 = vmul.f32 %v3269_v13, %v3269_v13  ;;  %1782 = vst [vmem:[%s2927_s24 + $0x70] sm:$0xff] %v3269_v13  ;;  %v3277_v3 = vsel %vm1542_vm13, %v1506_v0, %v1574_v6  ;;  %vm1543_vm15 = vcmp.gt.f32.partialorder %v1509_v10, 0.0 }
 0x2ab   : > { %v3279_v18 = vsel %vm1527_vm14, %v1445_v7, %v1559_v11  ;;  %1798 = vst [vmem:[%s2927_s24 + $0xf0] sm:$0xff] %v3277_v3  ;;  %v1638_v22 = vmul.f32 %v3277_v3, %v3277_v3 }
 0x2ac   : > { %v3283_v21 = vsel %vm1543_vm15, %v1509_v10, %v1575_v12  ;;  %1698 = vadd.xlane.f32.xlu1 %v1637_v14  ;;  %1783 = vst [vmem:[%s2927_s24 + $0x78] sm:$0xff] %v3279_v18  ;;  %1668 = vadd.xlane.f32.xlu0 %v1622_v15  ;;  %v1623_v24 = vmul.f32 %v3279_v18, %v3279_v18 }
 0x2ad   : > { %1799 = vst [vmem:[%s2927_s24 + $0xf8] sm:$0xff] %v3283_v21  ;;  %v1639_v25 = vmul.f32 %v3283_v21, %v3283_v21 }
 0x2b0   : > { %1670 = vadd.xlane.f32.xlu1 %v1623_v24  ;;  %1700 = vadd.xlane.f32.xlu0 %v1638_v22 }
 0x2b4   : > { %1702 = vadd.xlane.f32.xlu1 %v1639_v25 }
 0x301   : > { %v1641_v27 = vpop.xlane.xlu0 %1640 }
 0x302   : > { %v1704_v30 = vmax.f32 %v1641_v27, 1e-24 }
 0x304   : > { %2526 = vrsqrt.f32 %v1704_v30  ;;  %v1675_v31 = vpop.xlane.xlu1 %1674 }
 0x305   : > { %v1721_v32 = vmax.f32 %v1675_v31, 1e-24  ;;  %v1673_v37 = vpop.xlane.xlu0 %1672 }
 0x306   : > { %v1720_v40 = vmax.f32 %v1673_v37, 1e-24 }
 0x307   : > { %2528 = vrsqrt.f32 %v1721_v32 }
 0x308   : > { %2530 = vrsqrt.f32 %v1720_v40 }
 0x309   : > { %v1645_v41 = vpop.xlane.xlu1 %1644  ;;  %v1643_v43 = vpop.xlane.xlu0 %1642 }
 0x30a   : > { %v1706_v42 = vmax.f32 %v1645_v41, 1e-24  ;;  %v1705_v44 = vmax.f32 %v1643_v43, 1e-24 }
 0x30c   : > { %2532 = vrsqrt.f32 %v1706_v42 }
 0x30d   : > { %2534 = vrsqrt.f32 %v1705_v44  ;;  %v1647_v45 = vpop.xlane.xlu1 %1646  ;;  %v1677_v47 = vpop.xlane.xlu0 %1676 }
 0x30e   : > { %v1707_v46 = vmax.f32 %v1647_v45, 1e-24  ;;  %v2527_v54 = vpop.eup %2526  ;;  %v1722_v55 = vmax.f32 %v1677_v47, 1e-24 }
 0x30f   : > { %v1800_v56 = vmul.f32 %v2527_v54, %v3076_v26 }
 0x310   : > { %2536 = vrsqrt.f32 %v1707_v46 }
 0x311   : > { %2538 = vrsqrt.f32 %v1722_v55  ;;  %v1679_v59 = vpop.xlane.xlu1 %1678  ;;  %v2529_v0 = vpop.eup %2528  ;;  %1832 = vst [vmem:[%s2923_s29] sm:$0xff] %v1800_v56 }
 0x312   : > { %v1723_v1 = vmax.f32 %v1679_v59, 1e-24  ;;  %v1649_v2 = vpop.xlane.xlu0 %1648  ;;  %v2531_v4 = vpop.eup %2530  ;;  %v1817_v5 = vmul.f32 %v2529_v0, %v3087_v36 }
 0x313   : > { %v1708_v6 = vmax.f32 %v1649_v2, 1e-24  ;;  %v1816_v7 = vmul.f32 %v2531_v4, %v3074_v23 }
 0x314   : > { %2540 = vrsqrt.f32 %v1723_v1  ;;  %1849 = vst [vmem:[%s2923_s29 + $0x88] sm:$0xff] %v1817_v5 }
 0x315   : > { %2542 = vrsqrt.f32 %v1708_v6  ;;  %v1651_v26 = vpop.xlane.xlu1 %1650  ;;  %1848 = vst [vmem:[%s2923_s29 + $0x80] sm:$0xff] %v1816_v7 }
 0x316   : > { %v2533_v10 = vpop.eup %2532  ;;  %v1709_v11 = vmax.f32 %v1651_v26, 1e-24  ;;  %v1681_v12 = vpop.xlane.xlu0 %1680 }
 0x317   : > { %v2535_v14 = vpop.eup %2534  ;;  %v1802_v15 = vmul.f32 %v2533_v10, %v3101_v51  ;;  %v1724_v22 = vmax.f32 %v1681_v12, 1e-24 }
 0x318   : > { %v1801_v36 = vmul.f32 %v2535_v14, %v3084_v33  ;;  %2544 = vrsqrt.f32 %v1709_v11 }
 0x319   : > { %1834 = vst [vmem:[%s2923_s29 + $0x10] sm:$0xff] %v1802_v15  ;;  %2546 = vrsqrt.f32 %v1724_v22  ;;  %v1683_v23 = vpop.xlane.xlu1 %1682 }
 0x31a   : > { %v2537_v24 = vpop.eup %2536  ;;  %1833 = vst [vmem:[%s2923_s29 + $0x8] sm:$0xff] %v1801_v36  ;;  %v1725_v25 = vmax.f32 %v1683_v23, 1e-24  ;;  %v1653_v27 = vpop.xlane.xlu0 %1652 }
 0x31b   : > { %v2539_v30 = vpop.eup %2538  ;;  %v1803_v31 = vmul.f32 %v2537_v24, %v3113_v61  ;;  %v1710_v32 = vmax.f32 %v1653_v27, 1e-24 }
 0x31c   : > { %v1818_v51 = vmul.f32 %v2539_v30, %v3103_v52  ;;  %2548 = vrsqrt.f32 %v1725_v25 }
 0x31d   : > { %1835 = vst [vmem:[%s2923_s29 + $0x18] sm:$0xff] %v1803_v31  ;;  %2550 = vrsqrt.f32 %v1710_v32  ;;  %v1655_v33 = vpop.xlane.xlu1 %1654 }
 0x31e   : > { %v2541_v37 = vpop.eup %2540  ;;  %1850 = vst [vmem:[%s2923_s29 + $0x90] sm:$0xff] %v1818_v51  ;;  %v1711_v40 = vmax.f32 %v1655_v33, 1e-24  ;;  %v1685_v41 = vpop.xlane.xlu0 %1684 }
 0x31f   : > { %v2543_v42 = vpop.eup %2542  ;;  %v1819_v43 = vmul.f32 %v2541_v37, %v3115_v62  ;;  %v1726_v44 = vmax.f32 %v1685_v41, 1e-24 }
 0x320   : > { %v1804_v61 = vmul.f32 %v2543_v42, %v3129_v16  ;;  %2552 = vrsqrt.f32 %v1711_v40 }
 0x321   : > { %1851 = vst [vmem:[%s2923_s29 + $0x98] sm:$0xff] %v1819_v43  ;;  %2554 = vrsqrt.f32 %v1726_v44  ;;  %v1687_v52 = vpop.xlane.xlu1 %1686 }
 0x322   : > { %v2545_v45 = vpop.eup %2544  ;;  %1836 = vst [vmem:[%s2923_s29 + $0x20] sm:$0xff] %v1804_v61  ;;  %v1727_v46 = vmax.f32 %v1687_v52, 1e-24  ;;  %v1657_v47 = vpop.xlane.xlu0 %1656 }
 0x323   : > { %v2547_v54 = vpop.eup %2546  ;;  %v1805_v55 = vmul.f32 %v2545_v45, %v3141_v28  ;;  %v1712_v56 = vmax.f32 %v1657_v47, 1e-24 }
 0x324   : > { %v1820_v62 = vmul.f32 %v2547_v54, %v3131_v17  ;;  %2556 = vrsqrt.f32 %v1727_v46 }
 0x325   : > { %1837 = vst [vmem:[%s2923_s29 + $0x28] sm:$0xff] %v1805_v55  ;;  %2558 = vrsqrt.f32 %v1712_v56  ;;  %v1659_v16 = vpop.xlane.xlu1 %1658 }
 0x326   : > { %v2549_v59 = vpop.eup %2548  ;;  %1852 = vst [vmem:[%s2923_s29 + $0xa0] sm:$0xff] %v1820_v62  ;;  %v1713_v0 = vmax.f32 %v1659_v16, 1e-24  ;;  %v1689_v1 = vpop.xlane.xlu0 %1688 }
 0x327   : > { %v2551_v2 = vpop.eup %2550  ;;  %v1821_v4 = vmul.f32 %v2549_v59, %v3143_v29  ;;  %v1728_v5 = vmax.f32 %v1689_v1, 1e-24 }
 0x328   : > { %v1806_v28 = vmul.f32 %v2551_v2, %v3157_v48  ;;  %2560 = vrsqrt.f32 %v1713_v0 }
 0x329   : > { %1853 = vst [vmem:[%s2923_s29 + $0xa8] sm:$0xff] %v1821_v4  ;;  %2562 = vrsqrt.f32 %v1728_v5  ;;  %v1691_v17 = vpop.xlane.xlu1 %1690 }
 0x32a   : > { %v2553_v6 = vpop.eup %2552  ;;  %1838 = vst [vmem:[%s2923_s29 + $0x30] sm:$0xff] %v1806_v28  ;;  %v1729_v7 = vmax.f32 %v1691_v17, 1e-24  ;;  %v1661_v26 = vpop.xlane.xlu0 %1660 }
 0x32b   : > { %v2555_v10 = vpop.eup %2554  ;;  %v1807_v11 = vmul.f32 %v2553_v6, %v3169_v60  ;;  %v1714_v12 = vmax.f32 %v1661_v26, 1e-24 }
 0x32c   : > { %v1822_v29 = vmul.f32 %v2555_v10, %v3159_v49  ;;  %2564 = vrsqrt.f32 %v1729_v7 }
 0x32d   : > { %1839 = vst [vmem:[%s2923_s29 + $0x38] sm:$0xff] %v1807_v11  ;;  %2566 = vrsqrt.f32 %v1714_v12  ;;  %v1663_v48 = vpop.xlane.xlu1 %1662 }
 0x32e   : > { %v2557_v14 = vpop.eup %2556  ;;  %1854 = vst [vmem:[%s2923_s29 + $0xb0] sm:$0xff] %v1822_v29  ;;  %v1715_v15 = vmax.f32 %v1663_v48, 1e-24  ;;  %v1693_v22 = vpop.xlane.xlu0 %1692 }
 0x32f   : > { %v2559_v36 = vpop.eup %2558  ;;  %v1823_v23 = vmul.f32 %v2557_v14, %v3171_v63  ;;  %v1730_v24 = vmax.f32 %v1693_v22, 1e-24 }
 0x330   : > { %v1808_v60 = vmul.f32 %v2559_v36, %v3185_v19  ;;  %2568 = vrsqrt.f32 %v1715_v15 }
 0x331   : > { %1855 = vst [vmem:[%s2923_s29 + $0xb8] sm:$0xff] %v1823_v23  ;;  %2570 = vrsqrt.f32 %v1730_v24  ;;  %v1695_v49 = vpop.xlane.xlu1 %1694 }
 0x332   : > { %v2561_v25 = vpop.eup %2560  ;;  %1840 = vst [vmem:[%s2923_s29 + $0x40] sm:$0xff] %v1808_v60  ;;  %v1731_v27 = vmax.f32 %v1695_v49, 1e-24  ;;  %v1665_v30 = vpop.xlane.xlu0 %1664 }
 0x333   : > { %v2563_v31 = vpop.eup %2562  ;;  %v1809_v32 = vmul.f32 %v2561_v25, %v3197_v34  ;;  %v1716_v51 = vmax.f32 %v1665_v30, 1e-24 }
 0x334   : > { %v1824_v63 = vmul.f32 %v2563_v31, %v3187_v20  ;;  %2572 = vrsqrt.f32 %v1731_v27 }
 0x335   : > { %1841 = vst [vmem:[%s2923_s29 + $0x48] sm:$0xff] %v1809_v32  ;;  %2574 = vrsqrt.f32 %v1716_v51  ;;  %v1667_v19 = vpop.xlane.xlu1 %1666 }
 0x336   : > { %v2565_v33 = vpop.eup %2564  ;;  %1856 = vst [vmem:[%s2923_s29 + $0xc0] sm:$0xff] %v1824_v63  ;;  %v1717_v37 = vmax.f32 %v1667_v19, 1e-24  ;;  %v1697_v40 = vpop.xlane.xlu0 %1696 }
 0x337   : > { %v2567_v41 = vpop.eup %2566  ;;  %v1825_v42 = vmul.f32 %v2565_v33, %v3199_v35  ;;  %v1732_v43 = vmax.f32 %v1697_v40, 1e-24 }
 0x338   : > { %v1810_v34 = vmul.f32 %v2567_v41, %v3213_v57  ;;  %2576 = vrsqrt.f32 %v1717_v37 }
 0x339   : > { %1857 = vst [vmem:[%s2923_s29 + $0xc8] sm:$0xff] %v1825_v42  ;;  %2578 = vrsqrt.f32 %v1732_v43  ;;  %v1699_v20 = vpop.xlane.xlu1 %1698 }
 0x33a   : > { %v2569_v44 = vpop.eup %2568  ;;  %1842 = vst [vmem:[%s2923_s29 + $0x50] sm:$0xff] %v1810_v34  ;;  %v1733_v61 = vmax.f32 %v1699_v20, 1e-24  ;;  %v1669_v52 = vpop.xlane.xlu0 %1668 }
 0x33b   : > { %v2571_v45 = vpop.eup %2570  ;;  %v1811_v46 = vmul.f32 %v2569_v44, %v3225_v8  ;;  %v1718_v47 = vmax.f32 %v1669_v52, 1e-24 }
 0x33c   : > { %v1826_v35 = vmul.f32 %v2571_v45, %v3215_v58  ;;  %2580 = vrsqrt.f32 %v1733_v61 }
 0x33d   : > { %1843 = vst [vmem:[%s2923_s29 + $0x58] sm:$0xff] %v1811_v46  ;;  %2582 = vrsqrt.f32 %v1718_v47  ;;  %v1671_v57 = vpop.xlane.xlu1 %1670 }
 0x33e   : > { %v2573_v54 = vpop.eup %2572  ;;  %1858 = vst [vmem:[%s2923_s29 + $0xd0] sm:$0xff] %v1826_v35  ;;  %v1719_v55 = vmax.f32 %v1671_v57, 1e-24  ;;  %v1701_v56 = vpop.xlane.xlu0 %1700 }
 0x33f   : > { %v2575_v62 = vpop.eup %2574  ;;  %v1827_v16 = vmul.f32 %v2573_v54, %v3227_v9  ;;  %v1734_v59 = vmax.f32 %v1701_v56, 1e-24 }
 0x340   : > { %v1812_v8 = vmul.f32 %v2575_v62, %v3241_v38  ;;  %2584 = vrsqrt.f32 %v1719_v55 }
 0x341   : > { %1859 = vst [vmem:[%s2923_s29 + $0xd8] sm:$0xff] %v1827_v16  ;;  %2586 = vrsqrt.f32 %v1734_v59  ;;  %v1703_v58 = vpop.xlane.xlu1 %1702 }
 0x342   : > { %v2577_v0 = vpop.eup %2576  ;;  %1844 = vst [vmem:[%s2923_s29 + $0x60] sm:$0xff] %v1812_v8  ;;  %v1735_v1 = vmax.f32 %v1703_v58, 1e-24 }
 0x343   : > { %v2579_v2 = vpop.eup %2578  ;;  %v1813_v4 = vmul.f32 %v2577_v0, %v3253_v50 }
 0x344   : > { %v1828_v5 = vmul.f32 %v2579_v2, %v3243_v39  ;;  %2588 = vrsqrt.f32 %v1735_v1 }
 0x345   : > { %1845 = vst [vmem:[%s2923_s29 + $0x68] sm:$0xff] %v1813_v4 }
 0x346   : > { %v2581_v9 = vpop.eup %2580  ;;  %1860 = vst [vmem:[%s2923_s29 + $0xe0] sm:$0xff] %v1828_v5 }
 0x347   : > { %v2583_v38 = vpop.eup %2582  ;;  %v1829_v28 = vmul.f32 %v2581_v9, %v3255_v53 }
 0x348   : > { %v1814_v17 = vmul.f32 %v2583_v38, %v3269_v13 }
 0x349   : > { %1861 = vst [vmem:[%s2923_s29 + $0xe8] sm:$0xff] %v1829_v28 }
 0x34a   : > { %v2585_v6 = vpop.eup %2584  ;;  %1846 = vst [vmem:[%s2923_s29 + $0x70] sm:$0xff] %v1814_v17 }
 0x34b   : > { %v2587_v7 = vpop.eup %2586  ;;  %v1815_v26 = vmul.f32 %v2585_v6, %v3279_v18 }
 0x34c   : > { %v1830_v50 = vmul.f32 %v2587_v7, %v3277_v3 }
 0x34d   : > { %1847 = vst [vmem:[%s2923_s29 + $0x78] sm:$0xff] %v1815_v26 }
 0x34e   : > { %v2589_v39 = vpop.eup %2588  ;;  %1862 = vst [vmem:[%s2923_s29 + $0xf0] sm:$0xff] %v1830_v50 }
 0x34f   : > { %v1831_v10 = vmul.f32 %v2589_v39, %v3283_v21 }
 0x351   : > { %1863 = vst [vmem:[%s2923_s29 + $0xf8] sm:$0xff] %v1831_v10 }
 0x352 PF: > { %s2099_s28 = sshll.u32 %s2688_s27, 12  ;;  %s1883_s0 = sshll.u32 %s2927_s24, 4  ;;  %s3366_s0 = int_to_ptr.vmem [resolvable:$true] %s1883_s0 }
 0x353   : > { %s3363_s13 = scalar_lea.hbm %s3433_s5, %s2099_s28  ;;  %s3370_s9 = scalar_lea.sflag [#allocation5], %s440_s10 }
 0x354   : > { %s2590_s29 = scalar_lea.vmem %s3366_s0, 4096  ;;  %s2703_s27 = smov [#allocation4]  }
 0x355   : > { %p2591_p6 = scmp.ne.s32.totalorder %s3366_s0, %s2590_s29  ;;  %s2594_s7 = sshll.u32 %s2703_s27, 4  ;;  %s2595_s7 = int_to_ptr.vmem [resolvable:$false] %s2594_s7 }
 0x356   : > { %s2596_s8 = scalar_lea.vmem %s2595_s7, 8192  ;;  %p2597_p10 = scmp.lt.s32.totalorder %s3366_s0, %s2595_s7 }
 0x357   : > { %p2592_p8 = pnand %p2591_p6, %p2813_p7  ;;  %p2598_p11 = scmp.lt.s32.totalorder %s2596_s8, %s2590_s29 }
 0x359   : > { %p2593_p9 = pneg %p2592_p8  ;;  %p2599_p13 = por %p2598_p11, %p2597_p10 }
 0x35b   : > { %p2600_p0 = pnand %p2599_p13, %p2593_p9 }
 0x35d   : > { %2603 = shalt.err (!%p2600_p0)
}
 0x35e   : > { %s2604_s10 = scalar_lea.hbm %s3363_s13, 4096  ;;  %s2608_s12 = scalar_lea.hbm %s3433_s5, 8192 }
 0x35f   : > { %p2605_p1 = scmp.ne.s32.totalorder %s3363_s13, %s2604_s10  ;;  %p2609_p4 = scmp.lt.u32.totalorder %s3363_s13, %s3433_s5 }
 0x360   : > { %p2610_p5 = scmp.lt.u32.totalorder %s2608_s12, %s2604_s10  ;;  %p2612_p8 = scmp.lt.u32.totalorder %s2604_s10, %s3363_s13 }
 0x361   : > { %p2606_p2 = pnand %p2605_p1, %p2813_p7 }
 0x362   : > { %p2611_p6 = por %p2610_p5, %p2609_p4 }
 0x363   : > { %p2607_p3 = pneg %p2606_p2 }
 0x364   : > { %p2613_p9 = por %p2612_p8, %p2611_p6 }
 0x366   : > { %p2614_p10 = pnand %p2613_p9, %p2607_p3 }
 0x368   : > { %2617 = shalt.err (!%p2614_p10)
}
 0x369   : > { %s2704_s28 = smov 128   ;;  %s2705_s17 = smov 8  }
 0x36a   : > { %2356 = dma.vmem_to_hbm [thread:$0]  (%p2813_p7), %s3366_s0, 4096, %s3363_s13, %s3370_s9, %s2704_s28, %s2704_s28, %s2705_s17  }
 0x36b PF: > { %p2362_p11 = scmp.ge.s32.totalorder %s2700_s30, 2  ;;  %s1902_s14 = sand.u32 1, %s2664_s21  }
 0x36c   : > { %s1903_s29 = scalar_lea.sflag [#allocation5], %s1902_s14 }
 0x36d   : > { %p2359_p13 = pnand %p2362_p11, %p2821_p12 }
 0x36f   : > { %2659 = dma.done.wait (!%p2359_p13), %s1903_s29, 4096  }
 0x370   : > { %2661 = vsyncadd (!%p2359_p13), %s1903_s29, 4294963200  ;;  %s20_s30 = sadd.s32 1, %s2700_s30   ;;  %s3448_s26 = sld [smem:[#allocation7_spill]] }
 0x371   : > { %p17_p0 = scmp.ge.s32.totalorder %s20_s30, 6   ;;  %s3449_s27 = sld [smem:[#allocation8_spill]] }
 0x372   : > { %s3450_s28 = sld [smem:[#allocation9_spill]]  ;;  %s3451_s29 = sld [smem:[#allocation10_spill]] }
 0x373   : > { %s3452_s21 = smov %s2668_s22  ;;  %s3453_s22 = smov %s2672_s23 }
 0x374   : > { %s3454_s23 = smov %s2826_s19  ;;  %s3455_s24 = smov %s2680_s25 }
 0x375   : > { %s3456_s25 = smov %s2829_s20  ;;  %19 = sbr.rel (!%p17_p0) target bundleno = 8 (0x8), region = 142 }
 0x37c   :  { %1916 = vsyncpa [#allocation5], 1 }
 0x37d   :  { %1918 = vsyncpa [#allocation5 + $0x1], 1 }

</bundles_post_ra>
